<compile_context>
chip_gen: v7x
topology: tpu7x:2x2x1
jax: 0.10.0
libtpu: 0.0.40
codegen_flags: <defaults>
</compile_context>

<pallas_src>
import jax
import jax.numpy as jnp
import numpy as np
from jax.experimental import pallas as pl
from jax.experimental.pallas import tpu as pltpu

_BN_EPS = 1e-5
_OFF = 8  # column offset of the data region inside the padded scratch (sublane-tile aligned)


# ----------------------------------------------------------------------------
# Fused kernel
# ----------------------------------------------------------------------------
def _make_fused_kernel(TB, H, W, Cin, K, NB):
    HW = H * W
    M = TB * HW
    f32 = jnp.float32
    bf16 = jnp.bfloat16

    def kernel(x_ref,
               sw_ref, ss_ref, sb_ref,
               bw_ref, bs_ref, bb_ref,
               pcw_ref, pcs_ref, pcb_ref, pfw_ref, pfb_ref,
               vcw_ref, vcs_ref, vcb_ref, v1w_ref, v1b_ref, v2w_ref, v2b_ref,
               pol_ref, val_ref,
               pad_in, pad_a, pad_b):

        def zero_border(ref, c):
            # Zero only the cells the conv reads as padding (not the whole buffer).
            wp = ref.shape[2]
            zr = jnp.zeros((TB, 1, wp, c), f32)
            ref[:, 0:1, :, :] = zr
            ref[:, H + 1:H + 2, :, :] = zr
            zc = jnp.zeros((TB, H + 2, 1, c), f32)
            ref[:, :, _OFF - 1:_OFF, :] = zc
            ref[:, :, _OFF + W:_OFF + W + 1, :] = zc

        zero_border(pad_in, Cin)
        zero_border(pad_a, K)
        zero_border(pad_b, K)

        # Place the TB input samples into the padded scratch interior (aligned store).
        pad_in[:, 1:H + 1, _OFF:_OFF + W, :] = x_ref[...].astype(f32)

        def conv3x3(src_ref, w_of_ky, scale, shift, cin, cout, skip=None):
            """3x3 conv (stride 1, pad 1) + folded BN affine (+skip) + ReLU.

            The three kx taps are fused into the contraction dim (3*cin), so the conv is
            3 MXU matmuls (one per ky) with M = TB*H*W rows.  Matmul inputs bf16, acc f32.
            """
            xp = src_ref[...]                                       # (TB, H+2, WP, cin) f32
            slab = jnp.concatenate(
                [xp[:, :, _OFF - 1:_OFF - 1 + W, :],                 # kx = 0
                 xp[:, :, _OFF:_OFF + W, :],                         # kx = 1
                 xp[:, :, _OFF + 1:_OFF + 1 + W, :]],                # kx = 2
                axis=3)                                              # (TB, H+2, W, 3*cin)
            acc = jnp.zeros((M, cout), f32)
            for ky in range(3):
                patch = slab[:, ky:ky + H, :, :].reshape(M, 3 * cin).astype(bf16)
                acc = acc + jnp.dot(patch, w_of_ky(ky),
                                    preferred_element_type=f32)
            y = acc * scale + shift                                  # folded BN (+ conv bias)
            if skip is not None:
                y = y + skip
            return jnp.maximum(y, 0.0)                               # (M, cout) f32

        def store_padded(dst_ref, y):
            dst_ref[:, 1:H + 1, _OFF:_OFF + W, :] = y.reshape(TB, H, W, K)

        # ---- feature trunk: stem conv + residual tower ----------------------------------
        hs = conv3x3(pad_in, lambda ky: sw_ref[ky], ss_ref[...], sb_ref[...], Cin, K)
        if NB > 0:
            store_padded(pad_a, hs)
            for i in range(NB):
                j1, j2 = 2 * i, 2 * i + 1
                y1 = conv3x3(pad_a, lambda ky, j=j1: bw_ref[j * 3 + ky],
                             bs_ref[j1:j1 + 1, :], bb_ref[j1:j1 + 1, :], K, K)
                store_padded(pad_b, y1)
                skip = pad_a[:, 1:H + 1, _OFF:_OFF + W, :].reshape(M, K)
                hs = conv3x3(pad_b, lambda ky, j=j2: bw_ref[j * 3 + ky],
                             bs_ref[j2:j2 + 1, :], bb_ref[j2:j2 + 1, :], K, K, skip=skip)
                if i < NB - 1:
                    store_padded(pad_a, hs)

        hsb = hs.astype(bf16)                                        # (M, K)

        # ---- head 1x1 convs in channels x spatial layout (lane axis = TB*H*W) ----------
        pt = jnp.einsum("ck,sk->cs", pcw_ref[...], hsb,
                        preferred_element_type=f32)                  # (2, M)
        pt = jnp.maximum(pt * pcs_ref[...] + pcb_ref[...], 0.0)
        vt = jnp.einsum("ck,sk->cs", vcw_ref[...], hsb,
                        preferred_element_type=f32)                  # (1, M)
        vt = jnp.maximum(vt * vcs_ref[...] + vcb_ref[...], 0.0)

        wpf = pfw_ref[...]                                           # (2*H*W, OUT) bf16
        pfb = pfb_ref[...]
        v1w = v1w_ref[...]
        v1b = v1b_ref[...]
        v2w = v2w_ref[...]
        v2b = v2b_ref[...]

        for b in range(TB):                                          # tiny per-sample FCs
            # policy: flatten order is NCHW -> [c=0 spatial, c=1 spatial]
            ptb = pt[:, b * HW:(b + 1) * HW].astype(bf16)            # (2, HW)
            pol = (jnp.dot(ptb[0:1, :], wpf[:HW, :], preferred_element_type=f32)
                   + jnp.dot(ptb[1:2, :], wpf[HW:, :], preferred_element_type=f32)
                   + pfb)                                            # (1, OUT)
            pol_ref[:, b:b + 1, :] = pol.reshape(1, 1, -1).astype(pol_ref.dtype)

            vtb = vt[:, b * HW:(b + 1) * HW].astype(bf16)            # (1, HW)
            v1 = jnp.maximum(jnp.dot(vtb, v1w, preferred_element_type=f32) + v1b, 0.0)
            val = jnp.tanh(jnp.dot(v1.astype(bf16), v2w, preferred_element_type=f32) + v2b)
            val_ref[:, b:b + 1, :] = val.reshape(1, 1, 1).astype(val_ref.dtype)

    return kernel


# ----------------------------------------------------------------------------
# Parameter packing + fused forward pass (equivalent of Model.forward)
# ----------------------------------------------------------------------------
def _pack_conv3(w):
    """(3, 3, cin, cout) -> (3, 3*cin, cout): per-ky, kx taps stacked on the contraction axis."""
    return jnp.concatenate([w[:, 0], w[:, 1], w[:, 2]], axis=1)


def _pack_kernel_params(params):
    bf16 = jnp.bfloat16
    stem = params["stem"]
    blocks = params["blocks"]
    K = stem["w"].shape[-1]

    if blocks:
        blk_w = jnp.concatenate(
            [jnp.concatenate([_pack_conv3(b["c1"]["w"]), _pack_conv3(b["c2"]["w"])], axis=0)
             for b in blocks], axis=0)                               # (NB*2*3, 3K, K)
        blk_scale = jnp.stack([s for b in blocks
                               for s in (b["c1"]["scale"], b["c2"]["scale"])])
        blk_shift = jnp.stack([s for b in blocks
                               for s in (b["c1"]["shift"], b["c2"]["shift"])])
    else:  # unused dummies (kernel never touches them when NB == 0)
        blk_w = jnp.zeros((3, 3 * K, K), jnp.float32)
        blk_scale = jnp.zeros((2, K), jnp.float32)
        blk_shift = jnp.zeros((2, K), jnp.float32)

    pc, vc = params["policy_conv"], params["value_conv"]
    return (
        _pack_conv3(stem["w"]).astype(bf16),
        stem["scale"].reshape(1, -1), stem["shift"].reshape(1, -1),
        blk_w.astype(bf16), blk_scale, blk_shift,
        pc["w"][0, 0].T.astype(bf16), pc["scale"].reshape(-1, 1), pc["shift"].reshape(-1, 1),
        params["policy_fc"]["w"].astype(bf16), params["policy_fc"]["b"].reshape(1, -1),
        vc["w"][0, 0].T.astype(bf16), vc["scale"].reshape(-1, 1), vc["shift"].reshape(-1, 1),
        params["value_fc1"]["w"].astype(bf16), params["value_fc1"]["b"].reshape(1, -1),
        params["value_fc2"]["w"].astype(bf16), params["value_fc2"]["b"].reshape(1, -1),
    )


@jax.jit
def forward(params, x_nchw):
    """Equivalent of Model.forward: returns (policy, value). Input is NCHW like PyTorch."""
    B, C, H, W = x_nchw.shape
    K = params["stem"]["w"].shape[-1]
    NB = len(params["blocks"])
    OUT = params["policy_fc"]["w"].shape[-1]

    # Batch folding: TB samples per grid step (matmul M = TB*H*W) while keeping >= 2 grid
    # steps so v7x's two TensorCores still split the "parallel" batch axis.
    TB = 1 if B <= 1 else min(8, max(1, B // 2))
    NG = -(-B // TB)
    B_pad = NG * TB

    x = jnp.transpose(x_nchw, (0, 2, 3, 1)).astype(jnp.float32)     # NCHW -> NHWC
    if B_pad != B:
        x = jnp.pad(x, ((0, B_pad - B), (0, 0), (0, 0), (0, 0)))

    weight_args = _pack_kernel_params(params)

    WP = _OFF + ((W + 8) // 8) * 8   # padded scratch width: >= _OFF + W + 1, 8-aligned

    def const_spec(a):
        return pl.BlockSpec(a.shape, lambda g, _r=a.ndim: (0,) * _r)

    in_specs = [pl.BlockSpec((TB, H, W, C), lambda g: (g, 0, 0, 0))]
    in_specs += [const_spec(a) for a in weight_args]

    pol3, val3 = pl.pallas_call(
        _make_fused_kernel(TB, H, W, C, K, NB),
        out_shape=(jax.ShapeDtypeStruct((NG, TB, OUT), jnp.float32),
                   jax.ShapeDtypeStruct((NG, TB, 1), jnp.float32)),
        grid=(NG,),
        in_specs=in_specs,
        out_specs=(pl.BlockSpec((1, TB, OUT), lambda g: (g, 0, 0)),
                   pl.BlockSpec((1, TB, 1), lambda g: (g, 0, 0))),
        scratch_shapes=[
            pltpu.VMEM((TB, H + 2, WP, C), jnp.float32),   # zero-border padded input
            pltpu.VMEM((TB, H + 2, WP, K), jnp.float32),   # padded activation (ping)
            pltpu.VMEM((TB, H + 2, WP, K), jnp.float32),   # padded activation (pong)
        ],
        compiler_params=pltpu.CompilerParams(
            dimension_semantics=("parallel",),
            vmem_limit_bytes=32 * 1024 * 1024),
    )(x, *weight_args)

    policy = pol3.reshape(B_pad, OUT)[:B]
    value = val3.reshape(B_pad, 1)[:B]
    return policy, value


# ----------------------------------------------------------------------------
# Parameter init (deterministic, mirrors the PyTorch module's shapes)
# ----------------------------------------------------------------------------
def _xavier_uniform(key, shape, fan_in, fan_out):
    limit = (6.0 / (fan_in + fan_out)) ** 0.5
    return jax.random.uniform(key, shape, jnp.float32, -limit, limit)


def _bn_fold(conv_bias):
    # BN inference mode: gamma=1, beta=0, running_mean=0, running_var=1 (PyTorch defaults)
    scale = jnp.full_like(conv_bias, 1.0 / jnp.sqrt(1.0 + _BN_EPS))
    shift = scale * conv_bias
    return scale, shift


def _conv_params(key, cin, cout, k):
    kw, kb = jax.random.split(key)
    w = _xavier_uniform(kw, (k, k, cin, cout), cin * k * k, cout * k * k)
    bias = 0.01 * jax.random.normal(kb, (cout,), jnp.float32)
    scale, shift = _bn_fold(bias)
    return {"w": w, "scale": scale, "shift": shift}


def _linear_params(key, fin, fout):
    kw, kb = jax.random.split(key)
    w = _xavier_uniform(kw, (fin, fout), fin, fout)
    b = 0.01 * jax.random.normal(kb, (fout,), jnp.float32)
    return {"w": w, "b": b}


def init_params(key, input_shape, outputs_count,
                residual_blocks_count=2, kernels_count=32):
    C, H, W = input_shape
    keys = jax.random.split(key, 4 + 2 * residual_blocks_count + 3)
    ki = iter(keys)

    params = {"stem": _conv_params(next(ki), C, kernels_count, 3), "blocks": []}
    for _ in range(residual_blocks_count):
        params["blocks"].append({
            "c1": _conv_params(next(ki), kernels_count, kernels_count, 3),
            "c2": _conv_params(next(ki), kernels_count, kernels_count, 3),
        })
    params["policy_conv"] = _conv_params(next(ki), kernels_count, 2, 1)
    params["policy_fc"] = _linear_params(next(ki), 2 * H * W, outputs_count)
    params["value_conv"] = _conv_params(next(ki), kernels_count, 1, 1)
    params["value_fc1"] = _linear_params(next(ki), H * W, 256)
    params["value_fc2"] = _linear_params(next(ki), 256, 1)
    return params


# ----------------------------------------------------------------------------
# Pure-JAX/XLA reference with matching matmul precision (bf16 inputs, f32 accumulate)
# ----------------------------------------------------------------------------
@jax.jit
def reference_forward(params, x_nchw):
    f32, bf16 = jnp.float32, jnp.bfloat16
    x = jnp.transpose(x_nchw, (0, 2, 3, 1)).astype(f32)

    def conv3x3(x, p):
        y = jax.lax.conv_general_dilated(
            x.astype(bf16), p["w"].astype(bf16), window_strides=(1, 1), padding="SAME",
            dimension_numbers=("NHWC", "HWIO", "NHWC"),
            preferred_element_type=f32)
        return y * p["scale"] + p["shift"]

    h = jax.nn.relu(conv3x3(x, params["stem"]))
    for blk in params["blocks"]:
        y = jax.nn.relu(conv3x3(h, blk["c1"]))
        h = jax.nn.relu(conv3x3(y, blk["c2"]) + h)

    B = h.shape[0]
    hb = h.astype(bf16)

    pc = params["policy_conv"]
    p = jax.nn.relu(jnp.einsum("bhwc,cf->bhwf", hb, pc["w"][0, 0].astype(bf16),
                               preferred_element_type=f32) * pc["scale"] + pc["shift"])
    p_flat = jnp.transpose(p, (0, 3, 1, 2)).reshape(B, -1)            # torch NCHW .view order
    policy = (jnp.dot(p_flat.astype(bf16), params["policy_fc"]["w"].astype(bf16),
                      preferred_element_type=f32) + params["policy_fc"]["b"])

    vc = params["value_conv"]
    v = jax.nn.relu(jnp.einsum("bhwc,cf->bhwf", hb, vc["w"][0, 0].astype(bf16),
                               preferred_element_type=f32) * vc["scale"] + vc["shift"])
    v_flat = jnp.transpose(v, (0, 3, 1, 2)).reshape(B, -1)
    v1 = jax.nn.relu(jnp.dot(v_flat.astype(bf16), params["value_fc1"]["w"].astype(bf16),
                             preferred_element_type=f32) + params["value_fc1"]["b"])
    value = jnp.tanh(jnp.dot(v1.astype(bf16), params["value_fc2"]["w"].astype(bf16),
                             preferred_element_type=f32) + params["value_fc2"]["b"])
    return policy, value


# ----------------------------------------------------------------------------
if __name__ == "__main__":
    key = jax.random.PRNGKey(0)
    k_param, k_in1, k_in2 = jax.random.split(key, 3)

    input_shape = (4, 8, 8)      # (C, H, W)
    outputs_count = 8
    params = init_params(k_param, input_shape, outputs_count,
                         residual_blocks_count=2, kernels_count=32)

    # primary small-shape run: batch=2 (TB=1, two "parallel" grid steps)
    x = jax.random.normal(k_in1, (2,) + input_shape, jnp.float32)    # NCHW, like PyTorch
    policy, value = forward(params, x)
    jax.block_until_ready((policy, value))
    assert policy.shape == (2, outputs_count)
    assert value.shape == (2, 1)
    assert bool(jnp.all(jnp.isfinite(policy))) and bool(jnp.all(jnp.isfinite(value)))
    ref_p, ref_v = reference_forward(params, x)
    np.testing.assert_allclose(np.asarray(policy), np.asarray(ref_p), rtol=2e-2, atol=2e-2)
    np.testing.assert_allclose(np.asarray(value), np.asarray(ref_v), rtol=2e-2, atol=2e-2)

    # batch-folded run: batch=8 -> TB=4 samples per grid step (conv matmul M = 256)
    x8 = jax.random.normal(k_in2, (8,) + input_shape, jnp.float32)
    policy8, value8 = forward(params, x8)
    jax.block_until_ready((policy8, value8))
    ref_p8, ref_v8 = reference_forward(params, x8)
    np.testing.assert_allclose(np.asarray(policy8), np.asarray(ref_p8), rtol=2e-2, atol=2e-2)
    np.testing.assert_allclose(np.asarray(value8), np.asarray(ref_v8), rtol=2e-2, atol=2e-2)

    print("KERNEL_OK")
</pallas_src>

<mosaic_0001>
module attributes {stable_mosaic.version = 11 : i64} {
  func.func @kernel(%arg0: i32, %arg1: memref<1x8x8x4xf32, #tpu.memory_space<vmem>>, %arg2: memref<3x12x32xbf16, #tpu.memory_space<vmem>>, %arg3: memref<1x32xf32, #tpu.memory_space<vmem>>, %arg4: memref<1x32xf32, #tpu.memory_space<vmem>>, %arg5: memref<12x96x32xbf16, #tpu.memory_space<vmem>>, %arg6: memref<4x32xf32, #tpu.memory_space<vmem>>, %arg7: memref<4x32xf32, #tpu.memory_space<vmem>>, %arg8: memref<2x32xbf16, #tpu.memory_space<vmem>>, %arg9: memref<2x1xf32, #tpu.memory_space<vmem>>, %arg10: memref<2x1xf32, #tpu.memory_space<vmem>>, %arg11: memref<128x8xbf16, #tpu.memory_space<vmem>>, %arg12: memref<1x8xf32, #tpu.memory_space<vmem>>, %arg13: memref<1x32xbf16, #tpu.memory_space<vmem>>, %arg14: memref<1x1xf32, #tpu.memory_space<vmem>>, %arg15: memref<1x1xf32, #tpu.memory_space<vmem>>, %arg16: memref<64x256xbf16, #tpu.memory_space<vmem>>, %arg17: memref<1x256xf32, #tpu.memory_space<vmem>>, %arg18: memref<256x1xbf16, #tpu.memory_space<vmem>>, %arg19: memref<1x1xf32, #tpu.memory_space<vmem>>, %arg20: memref<1x1x8xf32, #tpu.memory_space<vmem>>, %arg21: memref<1x1x1xf32, #tpu.memory_space<vmem>>, %arg22: memref<1x10x24x4xf32, #tpu.memory_space<vmem>>, %arg23: memref<1x10x24x32xf32, #tpu.memory_space<vmem>>, %arg24: memref<1x10x24x32xf32, #tpu.memory_space<vmem>>) attributes {dimension_semantics = [#tpu.dimension_semantics<parallel>], iteration_bounds = array<i64: 2>, scalar_prefetch = 0 : i64, scratch_operands = 3 : i64, tpu.core_type = #tpu.core_type<tc>, window_params = [{transform_indices = @transform_0, window_bounds = array<i64: 1, 8, 8, 4>}, {pipeline_mode = #tpu.pipeline_mode<synchronous>, transform_indices = @transform_1, window_bounds = array<i64: 3, 12, 32>}, {pipeline_mode = #tpu.pipeline_mode<synchronous>, transform_indices = @transform_2, window_bounds = array<i64: 1, 32>}, {pipeline_mode = #tpu.pipeline_mode<synchronous>, transform_indices = @transform_3, window_bounds = array<i64: 1, 32>}, {pipeline_mode = #tpu.pipeline_mode<synchronous>, transform_indices = @transform_4, window_bounds = array<i64: 12, 96, 32>}, {pipeline_mode = #tpu.pipeline_mode<synchronous>, transform_indices = @transform_5, window_bounds = array<i64: 4, 32>}, {pipeline_mode = #tpu.pipeline_mode<synchronous>, transform_indices = @transform_6, window_bounds = array<i64: 4, 32>}, {pipeline_mode = #tpu.pipeline_mode<synchronous>, transform_indices = @transform_7, window_bounds = array<i64: 2, 32>}, {pipeline_mode = #tpu.pipeline_mode<synchronous>, transform_indices = @transform_8, window_bounds = array<i64: 2, 1>}, {pipeline_mode = #tpu.pipeline_mode<synchronous>, transform_indices = @transform_9, window_bounds = array<i64: 2, 1>}, {pipeline_mode = #tpu.pipeline_mode<synchronous>, transform_indices = @transform_10, window_bounds = array<i64: 128, 8>}, {pipeline_mode = #tpu.pipeline_mode<synchronous>, transform_indices = @transform_11, window_bounds = array<i64: 1, 8>}, {pipeline_mode = #tpu.pipeline_mode<synchronous>, transform_indices = @transform_12, window_bounds = array<i64: 1, 32>}, {pipeline_mode = #tpu.pipeline_mode<synchronous>, transform_indices = @transform_13, window_bounds = array<i64: 1, 1>}, {pipeline_mode = #tpu.pipeline_mode<synchronous>, transform_indices = @transform_14, window_bounds = array<i64: 1, 1>}, {pipeline_mode = #tpu.pipeline_mode<synchronous>, transform_indices = @transform_15, window_bounds = array<i64: 64, 256>}, {pipeline_mode = #tpu.pipeline_mode<synchronous>, transform_indices = @transform_16, window_bounds = array<i64: 1, 256>}, {pipeline_mode = #tpu.pipeline_mode<synchronous>, transform_indices = @transform_17, window_bounds = array<i64: 256, 1>}, {pipeline_mode = #tpu.pipeline_mode<synchronous>, transform_indices = @transform_18, window_bounds = array<i64: 1, 1>}, {transform_indices = @transform_19, window_bounds = array<i64: 1, 1, 8>}, {transform_indices = @transform_20, window_bounds = array<i64: 1, 1, 1>}]} {
    %cst = arith.constant 0.000000e+00 : f32
    %0 = vector.broadcast %cst : f32 to vector<1x1x24x4xf32>
    %c0 = arith.constant 0 : index
    %c0_0 = arith.constant 0 : index
    %c0_1 = arith.constant 0 : index
    %c0_2 = arith.constant 0 : index
    %1 = vector.load %arg22[%c0, %c0_0, %c0_1, %c0_2] : memref<1x10x24x4xf32, #tpu.memory_space<vmem>>, vector<1x1x24x4xf32>
    tpu.vector_store %arg22[%c0, %c0_0, %c0_1, %c0_2], %0 {strides = array<i32>} : memref<1x10x24x4xf32, #tpu.memory_space<vmem>>, vector<1x1x24x4xf32>,
    %c0_3 = arith.constant 0 : index
    %c9 = arith.constant 9 : index
    %c0_4 = arith.constant 0 : index
    %c0_5 = arith.constant 0 : index
    %2 = vector.load %arg22[%c0_3, %c9, %c0_4, %c0_5] : memref<1x10x24x4xf32, #tpu.memory_space<vmem>>, vector<1x1x24x4xf32>
    tpu.vector_store %arg22[%c0_3, %c9, %c0_4, %c0_5], %0 {strides = array<i32>} : memref<1x10x24x4xf32, #tpu.memory_space<vmem>>, vector<1x1x24x4xf32>,
    %cst_6 = arith.constant 0.000000e+00 : f32
    %3 = vector.broadcast %cst_6 : f32 to vector<1x10x1x4xf32>
    %c0_7 = arith.constant 0 : index
    %c0_8 = arith.constant 0 : index
    %c7 = arith.constant 7 : index
    %c0_9 = arith.constant 0 : index
    %4 = vector.load %arg22[%c0_7, %c0_8, %c7, %c0_9] : memref<1x10x24x4xf32, #tpu.memory_space<vmem>>, vector<1x10x1x4xf32>
    tpu.vector_store %arg22[%c0_7, %c0_8, %c7, %c0_9], %3 {strides = array<i32>} : memref<1x10x24x4xf32, #tpu.memory_space<vmem>>, vector<1x10x1x4xf32>,
    %c0_10 = arith.constant 0 : index
    %c0_11 = arith.constant 0 : index
    %c16 = arith.constant 16 : index
    %c0_12 = arith.constant 0 : index
    %5 = vector.load %arg22[%c0_10, %c0_11, %c16, %c0_12] : memref<1x10x24x4xf32, #tpu.memory_space<vmem>>, vector<1x10x1x4xf32>
    tpu.vector_store %arg22[%c0_10, %c0_11, %c16, %c0_12], %3 {strides = array<i32>} : memref<1x10x24x4xf32, #tpu.memory_space<vmem>>, vector<1x10x1x4xf32>,
    %cst_13 = arith.constant 0.000000e+00 : f32
    %6 = vector.broadcast %cst_13 : f32 to vector<1x1x24x32xf32>
    %c0_14 = arith.constant 0 : index
    %c0_15 = arith.constant 0 : index
    %c0_16 = arith.constant 0 : index
    %c0_17 = arith.constant 0 : index
    %7 = vector.load %arg23[%c0_14, %c0_15, %c0_16, %c0_17] : memref<1x10x24x32xf32, #tpu.memory_space<vmem>>, vector<1x1x24x32xf32>
    tpu.vector_store %arg23[%c0_14, %c0_15, %c0_16, %c0_17], %6 {strides = array<i32>} : memref<1x10x24x32xf32, #tpu.memory_space<vmem>>, vector<1x1x24x32xf32>,
    %c0_18 = arith.constant 0 : index
    %c9_19 = arith.constant 9 : index
    %c0_20 = arith.constant 0 : index
    %c0_21 = arith.constant 0 : index
    %8 = vector.load %arg23[%c0_18, %c9_19, %c0_20, %c0_21] : memref<1x10x24x32xf32, #tpu.memory_space<vmem>>, vector<1x1x24x32xf32>
    tpu.vector_store %arg23[%c0_18, %c9_19, %c0_20, %c0_21], %6 {strides = array<i32>} : memref<1x10x24x32xf32, #tpu.memory_space<vmem>>, vector<1x1x24x32xf32>,
    %cst_22 = arith.constant 0.000000e+00 : f32
    %9 = vector.broadcast %cst_22 : f32 to vector<1x10x1x32xf32>
    %c0_23 = arith.constant 0 : index
    %c0_24 = arith.constant 0 : index
    %c7_25 = arith.constant 7 : index
    %c0_26 = arith.constant 0 : index
    %10 = vector.load %arg23[%c0_23, %c0_24, %c7_25, %c0_26] : memref<1x10x24x32xf32, #tpu.memory_space<vmem>>, vector<1x10x1x32xf32>
    tpu.vector_store %arg23[%c0_23, %c0_24, %c7_25, %c0_26], %9 {strides = array<i32>} : memref<1x10x24x32xf32, #tpu.memory_space<vmem>>, vector<1x10x1x32xf32>,
    %c0_27 = arith.constant 0 : index
    %c0_28 = arith.constant 0 : index
    %c16_29 = arith.constant 16 : index
    %c0_30 = arith.constant 0 : index
    %11 = vector.load %arg23[%c0_27, %c0_28, %c16_29, %c0_30] : memref<1x10x24x32xf32, #tpu.memory_space<vmem>>, vector<1x10x1x32xf32>
    tpu.vector_store %arg23[%c0_27, %c0_28, %c16_29, %c0_30], %9 {strides = array<i32>} : memref<1x10x24x32xf32, #tpu.memory_space<vmem>>, vector<1x10x1x32xf32>,
    %cst_31 = arith.constant 0.000000e+00 : f32
    %12 = vector.broadcast %cst_31 : f32 to vector<1x1x24x32xf32>
    %c0_32 = arith.constant 0 : index
    %c0_33 = arith.constant 0 : index
    %c0_34 = arith.constant 0 : index
    %c0_35 = arith.constant 0 : index
    %13 = vector.load %arg24[%c0_32, %c0_33, %c0_34, %c0_35] : memref<1x10x24x32xf32, #tpu.memory_space<vmem>>, vector<1x1x24x32xf32>
    tpu.vector_store %arg24[%c0_32, %c0_33, %c0_34, %c0_35], %12 {strides = array<i32>} : memref<1x10x24x32xf32, #tpu.memory_space<vmem>>, vector<1x1x24x32xf32>,
    %c0_36 = arith.constant 0 : index
    %c9_37 = arith.constant 9 : index
    %c0_38 = arith.constant 0 : index
    %c0_39 = arith.constant 0 : index
    %14 = vector.load %arg24[%c0_36, %c9_37, %c0_38, %c0_39] : memref<1x10x24x32xf32, #tpu.memory_space<vmem>>, vector<1x1x24x32xf32>
    tpu.vector_store %arg24[%c0_36, %c9_37, %c0_38, %c0_39], %12 {strides = array<i32>} : memref<1x10x24x32xf32, #tpu.memory_space<vmem>>, vector<1x1x24x32xf32>,
    %cst_40 = arith.constant 0.000000e+00 : f32
    %15 = vector.broadcast %cst_40 : f32 to vector<1x10x1x32xf32>
    %c0_41 = arith.constant 0 : index
    %c0_42 = arith.constant 0 : index
    %c7_43 = arith.constant 7 : index
    %c0_44 = arith.constant 0 : index
    %16 = vector.load %arg24[%c0_41, %c0_42, %c7_43, %c0_44] : memref<1x10x24x32xf32, #tpu.memory_space<vmem>>, vector<1x10x1x32xf32>
    tpu.vector_store %arg24[%c0_41, %c0_42, %c7_43, %c0_44], %15 {strides = array<i32>} : memref<1x10x24x32xf32, #tpu.memory_space<vmem>>, vector<1x10x1x32xf32>,
    %c0_45 = arith.constant 0 : index
    %c0_46 = arith.constant 0 : index
    %c16_47 = arith.constant 16 : index
    %c0_48 = arith.constant 0 : index
    %17 = vector.load %arg24[%c0_45, %c0_46, %c16_47, %c0_48] : memref<1x10x24x32xf32, #tpu.memory_space<vmem>>, vector<1x10x1x32xf32>
    tpu.vector_store %arg24[%c0_45, %c0_46, %c16_47, %c0_48], %15 {strides = array<i32>} : memref<1x10x24x32xf32, #tpu.memory_space<vmem>>, vector<1x10x1x32xf32>,
    %c0_49 = arith.constant 0 : index
    %c0_50 = arith.constant 0 : index
    %c0_51 = arith.constant 0 : index
    %c0_52 = arith.constant 0 : index
    %18 = vector.load %arg1[%c0_49, %c0_50, %c0_51, %c0_52] : memref<1x8x8x4xf32, #tpu.memory_space<vmem>>, vector<1x8x8x4xf32>
    %c0_53 = arith.constant 0 : index
    %c1 = arith.constant 1 : index
    %c8 = arith.constant 8 : index
    %c0_54 = arith.constant 0 : index
    %19 = vector.load %arg22[%c0_53, %c1, %c8, %c0_54] : memref<1x10x24x4xf32, #tpu.memory_space<vmem>>, vector<1x8x8x4xf32>
    tpu.vector_store %arg22[%c0_53, %c1, %c8, %c0_54], %18 {strides = array<i32>} : memref<1x10x24x4xf32, #tpu.memory_space<vmem>>, vector<1x8x8x4xf32>,
    %c0_55 = arith.constant 0 : index
    %c0_56 = arith.constant 0 : index
    %20 = vector.load %arg3[%c0_55, %c0_56] : memref<1x32xf32, #tpu.memory_space<vmem>>, vector<1x32xf32>
    %c0_57 = arith.constant 0 : index
    %c0_58 = arith.constant 0 : index
    %21 = vector.load %arg4[%c0_57, %c0_58] : memref<1x32xf32, #tpu.memory_space<vmem>>, vector<1x32xf32>
    %c0_59 = arith.constant 0 : index
    %c0_60 = arith.constant 0 : index
    %c0_61 = arith.constant 0 : index
    %c0_62 = arith.constant 0 : index
    %22 = vector.load %arg22[%c0_59, %c0_60, %c0_61, %c0_62] : memref<1x10x24x4xf32, #tpu.memory_space<vmem>>, vector<1x10x24x4xf32>
    %23 = vector.extract_strided_slice %22 {offsets = [0, 0, 7, 0], sizes = [1, 10, 8, 4], strides = [1, 1, 1, 1]} : vector<1x10x24x4xf32> to vector<1x10x8x4xf32>
    %24 = vector.extract_strided_slice %22 {offsets = [0, 0, 8, 0], sizes = [1, 10, 8, 4], strides = [1, 1, 1, 1]} : vector<1x10x24x4xf32> to vector<1x10x8x4xf32>
    %25 = vector.extract_strided_slice %22 {offsets = [0, 0, 9, 0], sizes = [1, 10, 8, 4], strides = [1, 1, 1, 1]} : vector<1x10x24x4xf32> to vector<1x10x8x4xf32>
    %26 = tpu.concatenate %23, %24, %25 in 3 : vector<1x10x8x4xf32>, vector<1x10x8x4xf32>, vector<1x10x8x4xf32> -> vector<1x10x8x12xf32>
    %cst_63 = arith.constant 0.000000e+00 : f32
    %27 = vector.broadcast %cst_63 : f32 to vector<64x32xf32>
    %28 = vector.extract_strided_slice %26 {offsets = [0, 0, 0, 0], sizes = [1, 8, 8, 12], strides = [1, 1, 1, 1]} : vector<1x10x8x12xf32> to vector<1x8x8x12xf32>
    %29 = vector.shape_cast %28 : vector<1x8x8x12xf32> to vector<64x12xf32>
    %30 = arith.truncf %29 : vector<64x12xf32> to vector<64x12xbf16>
    %c0_64 = arith.constant 0 : index
    %c0_65 = arith.constant 0 : index
    %c0_66 = arith.constant 0 : index
    %31 = vector.load %arg2[%c0_64, %c0_65, %c0_66] : memref<3x12x32xbf16, #tpu.memory_space<vmem>>, vector<1x12x32xbf16>
    %32 = vector.shape_cast %31 : vector<1x12x32xbf16> to vector<12x32xbf16>
    %cst_67 = arith.constant dense<0.000000e+00> : vector<64x32xf32>
    %33 = tpu.matmul %30, %32, %cst_67 {dimension_numbers = #tpu.dot_dimension_numbers<[1], [0], [0], [1], [0, 0, 1, 1], [], []>} : vector<64x12xbf16>, vector<12x32xbf16>, vector<64x32xf32> -> vector<64x32xf32>
    %34 = arith.addf %27, %33 : vector<64x32xf32>
    %35 = vector.extract_strided_slice %26 {offsets = [0, 1, 0, 0], sizes = [1, 8, 8, 12], strides = [1, 1, 1, 1]} : vector<1x10x8x12xf32> to vector<1x8x8x12xf32>
    %36 = vector.shape_cast %35 : vector<1x8x8x12xf32> to vector<64x12xf32>
    %37 = arith.truncf %36 : vector<64x12xf32> to vector<64x12xbf16>
    %c1_68 = arith.constant 1 : index
    %c0_69 = arith.constant 0 : index
    %c0_70 = arith.constant 0 : index
    %38 = vector.load %arg2[%c1_68, %c0_69, %c0_70] : memref<3x12x32xbf16, #tpu.memory_space<vmem>>, vector<1x12x32xbf16>
    %39 = vector.shape_cast %38 : vector<1x12x32xbf16> to vector<12x32xbf16>
    %cst_71 = arith.constant dense<0.000000e+00> : vector<64x32xf32>
    %40 = tpu.matmul %37, %39, %cst_71 {dimension_numbers = #tpu.dot_dimension_numbers<[1], [0], [0], [1], [0, 0, 1, 1], [], []>} : vector<64x12xbf16>, vector<12x32xbf16>, vector<64x32xf32> -> vector<64x32xf32>
    %41 = arith.addf %34, %40 : vector<64x32xf32>
    %42 = vector.extract_strided_slice %26 {offsets = [0, 2, 0, 0], sizes = [1, 8, 8, 12], strides = [1, 1, 1, 1]} : vector<1x10x8x12xf32> to vector<1x8x8x12xf32>
    %43 = vector.shape_cast %42 : vector<1x8x8x12xf32> to vector<64x12xf32>
    %44 = arith.truncf %43 : vector<64x12xf32> to vector<64x12xbf16>
    %c2 = arith.constant 2 : index
    %c0_72 = arith.constant 0 : index
    %c0_73 = arith.constant 0 : index
    %45 = vector.load %arg2[%c2, %c0_72, %c0_73] : memref<3x12x32xbf16, #tpu.memory_space<vmem>>, vector<1x12x32xbf16>
    %46 = vector.shape_cast %45 : vector<1x12x32xbf16> to vector<12x32xbf16>
    %cst_74 = arith.constant dense<0.000000e+00> : vector<64x32xf32>
    %47 = tpu.matmul %44, %46, %cst_74 {dimension_numbers = #tpu.dot_dimension_numbers<[1], [0], [0], [1], [0, 0, 1, 1], [], []>} : vector<64x12xbf16>, vector<12x32xbf16>, vector<64x32xf32> -> vector<64x32xf32>
    %48 = arith.addf %41, %47 : vector<64x32xf32>
    %49 = vector.broadcast %20 : vector<1x32xf32> to vector<64x32xf32>
    %50 = arith.mulf %48, %49 : vector<64x32xf32>
    %51 = vector.broadcast %21 : vector<1x32xf32> to vector<64x32xf32>
    %52 = arith.addf %50, %51 : vector<64x32xf32>
    %cst_75 = arith.constant 0.000000e+00 : f32
    %53 = vector.broadcast %cst_75 : f32 to vector<64x32xf32>
    %54 = arith.maximumf %52, %53 : vector<64x32xf32>
    %55 = vector.shape_cast %54 : vector<64x32xf32> to vector<1x8x8x32xf32>
    %c0_76 = arith.constant 0 : index
    %c1_77 = arith.constant 1 : index
    %c8_78 = arith.constant 8 : index
    %c0_79 = arith.constant 0 : index
    %56 = vector.load %arg23[%c0_76, %c1_77, %c8_78, %c0_79] : memref<1x10x24x32xf32, #tpu.memory_space<vmem>>, vector<1x8x8x32xf32>
    tpu.vector_store %arg23[%c0_76, %c1_77, %c8_78, %c0_79], %55 {strides = array<i32>} : memref<1x10x24x32xf32, #tpu.memory_space<vmem>>, vector<1x8x8x32xf32>,
    %c0_80 = arith.constant 0 : index
    %c0_81 = arith.constant 0 : index
    %57 = vector.load %arg6[%c0_80, %c0_81] : memref<4x32xf32, #tpu.memory_space<vmem>>, vector<1x32xf32>
    %c0_82 = arith.constant 0 : index
    %c0_83 = arith.constant 0 : index
    %58 = vector.load %arg7[%c0_82, %c0_83] : memref<4x32xf32, #tpu.memory_space<vmem>>, vector<1x32xf32>
    %c0_84 = arith.constant 0 : index
    %c0_85 = arith.constant 0 : index
    %c0_86 = arith.constant 0 : index
    %c0_87 = arith.constant 0 : index
    %59 = vector.load %arg23[%c0_84, %c0_85, %c0_86, %c0_87] : memref<1x10x24x32xf32, #tpu.memory_space<vmem>>, vector<1x10x24x32xf32>
    %60 = vector.extract_strided_slice %59 {offsets = [0, 0, 7, 0], sizes = [1, 10, 8, 32], strides = [1, 1, 1, 1]} : vector<1x10x24x32xf32> to vector<1x10x8x32xf32>
    %61 = vector.extract_strided_slice %59 {offsets = [0, 0, 8, 0], sizes = [1, 10, 8, 32], strides = [1, 1, 1, 1]} : vector<1x10x24x32xf32> to vector<1x10x8x32xf32>
    %62 = vector.extract_strided_slice %59 {offsets = [0, 0, 9, 0], sizes = [1, 10, 8, 32], strides = [1, 1, 1, 1]} : vector<1x10x24x32xf32> to vector<1x10x8x32xf32>
    %63 = tpu.concatenate %60, %61, %62 in 3 : vector<1x10x8x32xf32>, vector<1x10x8x32xf32>, vector<1x10x8x32xf32> -> vector<1x10x8x96xf32>
    %cst_88 = arith.constant 0.000000e+00 : f32
    %64 = vector.broadcast %cst_88 : f32 to vector<64x32xf32>
    %65 = vector.extract_strided_slice %63 {offsets = [0, 0, 0, 0], sizes = [1, 8, 8, 96], strides = [1, 1, 1, 1]} : vector<1x10x8x96xf32> to vector<1x8x8x96xf32>
    %66 = vector.shape_cast %65 : vector<1x8x8x96xf32> to vector<64x96xf32>
    %67 = arith.truncf %66 : vector<64x96xf32> to vector<64x96xbf16>
    %c0_89 = arith.constant 0 : index
    %c0_90 = arith.constant 0 : index
    %c0_91 = arith.constant 0 : index
    %68 = vector.load %arg5[%c0_89, %c0_90, %c0_91] : memref<12x96x32xbf16, #tpu.memory_space<vmem>>, vector<1x96x32xbf16>
    %69 = vector.shape_cast %68 : vector<1x96x32xbf16> to vector<96x32xbf16>
    %cst_92 = arith.constant dense<0.000000e+00> : vector<64x32xf32>
    %70 = tpu.matmul %67, %69, %cst_92 {dimension_numbers = #tpu.dot_dimension_numbers<[1], [0], [0], [1], [0, 0, 1, 1], [], []>} : vector<64x96xbf16>, vector<96x32xbf16>, vector<64x32xf32> -> vector<64x32xf32>
    %71 = arith.addf %64, %70 : vector<64x32xf32>
    %72 = vector.extract_strided_slice %63 {offsets = [0, 1, 0, 0], sizes = [1, 8, 8, 96], strides = [1, 1, 1, 1]} : vector<1x10x8x96xf32> to vector<1x8x8x96xf32>
    %73 = vector.shape_cast %72 : vector<1x8x8x96xf32> to vector<64x96xf32>
    %74 = arith.truncf %73 : vector<64x96xf32> to vector<64x96xbf16>
    %c1_93 = arith.constant 1 : index
    %c0_94 = arith.constant 0 : index
    %c0_95 = arith.constant 0 : index
    %75 = vector.load %arg5[%c1_93, %c0_94, %c0_95] : memref<12x96x32xbf16, #tpu.memory_space<vmem>>, vector<1x96x32xbf16>
    %76 = vector.shape_cast %75 : vector<1x96x32xbf16> to vector<96x32xbf16>
    %cst_96 = arith.constant dense<0.000000e+00> : vector<64x32xf32>
    %77 = tpu.matmul %74, %76, %cst_96 {dimension_numbers = #tpu.dot_dimension_numbers<[1], [0], [0], [1], [0, 0, 1, 1], [], []>} : vector<64x96xbf16>, vector<96x32xbf16>, vector<64x32xf32> -> vector<64x32xf32>
    %78 = arith.addf %71, %77 : vector<64x32xf32>
    %79 = vector.extract_strided_slice %63 {offsets = [0, 2, 0, 0], sizes = [1, 8, 8, 96], strides = [1, 1, 1, 1]} : vector<1x10x8x96xf32> to vector<1x8x8x96xf32>
    %80 = vector.shape_cast %79 : vector<1x8x8x96xf32> to vector<64x96xf32>
    %81 = arith.truncf %80 : vector<64x96xf32> to vector<64x96xbf16>
    %c2_97 = arith.constant 2 : index
    %c0_98 = arith.constant 0 : index
    %c0_99 = arith.constant 0 : index
    %82 = vector.load %arg5[%c2_97, %c0_98, %c0_99] : memref<12x96x32xbf16, #tpu.memory_space<vmem>>, vector<1x96x32xbf16>
    %83 = vector.shape_cast %82 : vector<1x96x32xbf16> to vector<96x32xbf16>
    %cst_100 = arith.constant dense<0.000000e+00> : vector<64x32xf32>
    %84 = tpu.matmul %81, %83, %cst_100 {dimension_numbers = #tpu.dot_dimension_numbers<[1], [0], [0], [1], [0, 0, 1, 1], [], []>} : vector<64x96xbf16>, vector<96x32xbf16>, vector<64x32xf32> -> vector<64x32xf32>
    %85 = arith.addf %78, %84 : vector<64x32xf32>
    %86 = vector.broadcast %57 : vector<1x32xf32> to vector<64x32xf32>
    %87 = arith.mulf %85, %86 : vector<64x32xf32>
    %88 = vector.broadcast %58 : vector<1x32xf32> to vector<64x32xf32>
    %89 = arith.addf %87, %88 : vector<64x32xf32>
    %cst_101 = arith.constant 0.000000e+00 : f32
    %90 = vector.broadcast %cst_101 : f32 to vector<64x32xf32>
    %91 = arith.maximumf %89, %90 : vector<64x32xf32>
    %92 = vector.shape_cast %91 : vector<64x32xf32> to vector<1x8x8x32xf32>
    %c0_102 = arith.constant 0 : index
    %c1_103 = arith.constant 1 : index
    %c8_104 = arith.constant 8 : index
    %c0_105 = arith.constant 0 : index
    %93 = vector.load %arg24[%c0_102, %c1_103, %c8_104, %c0_105] : memref<1x10x24x32xf32, #tpu.memory_space<vmem>>, vector<1x8x8x32xf32>
    tpu.vector_store %arg24[%c0_102, %c1_103, %c8_104, %c0_105], %92 {strides = array<i32>} : memref<1x10x24x32xf32, #tpu.memory_space<vmem>>, vector<1x8x8x32xf32>,
    %c0_106 = arith.constant 0 : index
    %c1_107 = arith.constant 1 : index
    %c8_108 = arith.constant 8 : index
    %c0_109 = arith.constant 0 : index
    %94 = vector.load %arg23[%c0_106, %c1_107, %c8_108, %c0_109] : memref<1x10x24x32xf32, #tpu.memory_space<vmem>>, vector<1x8x8x32xf32>
    %95 = vector.shape_cast %94 : vector<1x8x8x32xf32> to vector<64x32xf32>
    %c1_110 = arith.constant 1 : index
    %c0_111 = arith.constant 0 : index
    %96 = vector.load %arg6[%c1_110, %c0_111] : memref<4x32xf32, #tpu.memory_space<vmem>>, vector<1x32xf32>
    %c1_112 = arith.constant 1 : index
    %c0_113 = arith.constant 0 : index
    %97 = vector.load %arg7[%c1_112, %c0_113] : memref<4x32xf32, #tpu.memory_space<vmem>>, vector<1x32xf32>
    %c0_114 = arith.constant 0 : index
    %c0_115 = arith.constant 0 : index
    %c0_116 = arith.constant 0 : index
    %c0_117 = arith.constant 0 : index
    %98 = vector.load %arg24[%c0_114, %c0_115, %c0_116, %c0_117] : memref<1x10x24x32xf32, #tpu.memory_space<vmem>>, vector<1x10x24x32xf32>
    %99 = vector.extract_strided_slice %98 {offsets = [0, 0, 7, 0], sizes = [1, 10, 8, 32], strides = [1, 1, 1, 1]} : vector<1x10x24x32xf32> to vector<1x10x8x32xf32>
    %100 = vector.extract_strided_slice %98 {offsets = [0, 0, 8, 0], sizes = [1, 10, 8, 32], strides = [1, 1, 1, 1]} : vector<1x10x24x32xf32> to vector<1x10x8x32xf32>
    %101 = vector.extract_strided_slice %98 {offsets = [0, 0, 9, 0], sizes = [1, 10, 8, 32], strides = [1, 1, 1, 1]} : vector<1x10x24x32xf32> to vector<1x10x8x32xf32>
    %102 = tpu.concatenate %99, %100, %101 in 3 : vector<1x10x8x32xf32>, vector<1x10x8x32xf32>, vector<1x10x8x32xf32> -> vector<1x10x8x96xf32>
    %cst_118 = arith.constant 0.000000e+00 : f32
    %103 = vector.broadcast %cst_118 : f32 to vector<64x32xf32>
    %104 = vector.extract_strided_slice %102 {offsets = [0, 0, 0, 0], sizes = [1, 8, 8, 96], strides = [1, 1, 1, 1]} : vector<1x10x8x96xf32> to vector<1x8x8x96xf32>
    %105 = vector.shape_cast %104 : vector<1x8x8x96xf32> to vector<64x96xf32>
    %106 = arith.truncf %105 : vector<64x96xf32> to vector<64x96xbf16>
    %c3 = arith.constant 3 : index
    %c0_119 = arith.constant 0 : index
    %c0_120 = arith.constant 0 : index
    %107 = vector.load %arg5[%c3, %c0_119, %c0_120] : memref<12x96x32xbf16, #tpu.memory_space<vmem>>, vector<1x96x32xbf16>
    %108 = vector.shape_cast %107 : vector<1x96x32xbf16> to vector<96x32xbf16>
    %cst_121 = arith.constant dense<0.000000e+00> : vector<64x32xf32>
    %109 = tpu.matmul %106, %108, %cst_121 {dimension_numbers = #tpu.dot_dimension_numbers<[1], [0], [0], [1], [0, 0, 1, 1], [], []>} : vector<64x96xbf16>, vector<96x32xbf16>, vector<64x32xf32> -> vector<64x32xf32>
    %110 = arith.addf %103, %109 : vector<64x32xf32>
    %111 = vector.extract_strided_slice %102 {offsets = [0, 1, 0, 0], sizes = [1, 8, 8, 96], strides = [1, 1, 1, 1]} : vector<1x10x8x96xf32> to vector<1x8x8x96xf32>
    %112 = vector.shape_cast %111 : vector<1x8x8x96xf32> to vector<64x96xf32>
    %113 = arith.truncf %112 : vector<64x96xf32> to vector<64x96xbf16>
    %c4 = arith.constant 4 : index
    %c0_122 = arith.constant 0 : index
    %c0_123 = arith.constant 0 : index
    %114 = vector.load %arg5[%c4, %c0_122, %c0_123] : memref<12x96x32xbf16, #tpu.memory_space<vmem>>, vector<1x96x32xbf16>
    %115 = vector.shape_cast %114 : vector<1x96x32xbf16> to vector<96x32xbf16>
    %cst_124 = arith.constant dense<0.000000e+00> : vector<64x32xf32>
    %116 = tpu.matmul %113, %115, %cst_124 {dimension_numbers = #tpu.dot_dimension_numbers<[1], [0], [0], [1], [0, 0, 1, 1], [], []>} : vector<64x96xbf16>, vector<96x32xbf16>, vector<64x32xf32> -> vector<64x32xf32>
    %117 = arith.addf %110, %116 : vector<64x32xf32>
    %118 = vector.extract_strided_slice %102 {offsets = [0, 2, 0, 0], sizes = [1, 8, 8, 96], strides = [1, 1, 1, 1]} : vector<1x10x8x96xf32> to vector<1x8x8x96xf32>
    %119 = vector.shape_cast %118 : vector<1x8x8x96xf32> to vector<64x96xf32>
    %120 = arith.truncf %119 : vector<64x96xf32> to vector<64x96xbf16>
    %c5 = arith.constant 5 : index
    %c0_125 = arith.constant 0 : index
    %c0_126 = arith.constant 0 : index
    %121 = vector.load %arg5[%c5, %c0_125, %c0_126] : memref<12x96x32xbf16, #tpu.memory_space<vmem>>, vector<1x96x32xbf16>
    %122 = vector.shape_cast %121 : vector<1x96x32xbf16> to vector<96x32xbf16>
    %cst_127 = arith.constant dense<0.000000e+00> : vector<64x32xf32>
    %123 = tpu.matmul %120, %122, %cst_127 {dimension_numbers = #tpu.dot_dimension_numbers<[1], [0], [0], [1], [0, 0, 1, 1], [], []>} : vector<64x96xbf16>, vector<96x32xbf16>, vector<64x32xf32> -> vector<64x32xf32>
    %124 = arith.addf %117, %123 : vector<64x32xf32>
    %125 = vector.broadcast %96 : vector<1x32xf32> to vector<64x32xf32>
    %126 = arith.mulf %124, %125 : vector<64x32xf32>
    %127 = vector.broadcast %97 : vector<1x32xf32> to vector<64x32xf32>
    %128 = arith.addf %126, %127 : vector<64x32xf32>
    %129 = arith.addf %128, %95 : vector<64x32xf32>
    %cst_128 = arith.constant 0.000000e+00 : f32
    %130 = vector.broadcast %cst_128 : f32 to vector<64x32xf32>
    %131 = arith.maximumf %129, %130 : vector<64x32xf32>
    %132 = vector.shape_cast %131 : vector<64x32xf32> to vector<1x8x8x32xf32>
    %c0_129 = arith.constant 0 : index
    %c1_130 = arith.constant 1 : index
    %c8_131 = arith.constant 8 : index
    %c0_132 = arith.constant 0 : index
    %133 = vector.load %arg23[%c0_129, %c1_130, %c8_131, %c0_132] : memref<1x10x24x32xf32, #tpu.memory_space<vmem>>, vector<1x8x8x32xf32>
    tpu.vector_store %arg23[%c0_129, %c1_130, %c8_131, %c0_132], %132 {strides = array<i32>} : memref<1x10x24x32xf32, #tpu.memory_space<vmem>>, vector<1x8x8x32xf32>,
    %c2_133 = arith.constant 2 : index
    %c0_134 = arith.constant 0 : index
    %134 = vector.load %arg6[%c2_133, %c0_134] : memref<4x32xf32, #tpu.memory_space<vmem>>, vector<1x32xf32>
    %c2_135 = arith.constant 2 : index
    %c0_136 = arith.constant 0 : index
    %135 = vector.load %arg7[%c2_135, %c0_136] : memref<4x32xf32, #tpu.memory_space<vmem>>, vector<1x32xf32>
    %c0_137 = arith.constant 0 : index
    %c0_138 = arith.constant 0 : index
    %c0_139 = arith.constant 0 : index
    %c0_140 = arith.constant 0 : index
    %136 = vector.load %arg23[%c0_137, %c0_138, %c0_139, %c0_140] : memref<1x10x24x32xf32, #tpu.memory_space<vmem>>, vector<1x10x24x32xf32>
    %137 = vector.extract_strided_slice %136 {offsets = [0, 0, 7, 0], sizes = [1, 10, 8, 32], strides = [1, 1, 1, 1]} : vector<1x10x24x32xf32> to vector<1x10x8x32xf32>
    %138 = vector.extract_strided_slice %136 {offsets = [0, 0, 8, 0], sizes = [1, 10, 8, 32], strides = [1, 1, 1, 1]} : vector<1x10x24x32xf32> to vector<1x10x8x32xf32>
    %139 = vector.extract_strided_slice %136 {offsets = [0, 0, 9, 0], sizes = [1, 10, 8, 32], strides = [1, 1, 1, 1]} : vector<1x10x24x32xf32> to vector<1x10x8x32xf32>
    %140 = tpu.concatenate %137, %138, %139 in 3 : vector<1x10x8x32xf32>, vector<1x10x8x32xf32>, vector<1x10x8x32xf32> -> vector<1x10x8x96xf32>
    %cst_141 = arith.constant 0.000000e+00 : f32
    %141 = vector.broadcast %cst_141 : f32 to vector<64x32xf32>
    %142 = vector.extract_strided_slice %140 {offsets = [0, 0, 0, 0], sizes = [1, 8, 8, 96], strides = [1, 1, 1, 1]} : vector<1x10x8x96xf32> to vector<1x8x8x96xf32>
    %143 = vector.shape_cast %142 : vector<1x8x8x96xf32> to vector<64x96xf32>
    %144 = arith.truncf %143 : vector<64x96xf32> to vector<64x96xbf16>
    %c6 = arith.constant 6 : index
    %c0_142 = arith.constant 0 : index
    %c0_143 = arith.constant 0 : index
    %145 = vector.load %arg5[%c6, %c0_142, %c0_143] : memref<12x96x32xbf16, #tpu.memory_space<vmem>>, vector<1x96x32xbf16>
    %146 = vector.shape_cast %145 : vector<1x96x32xbf16> to vector<96x32xbf16>
    %cst_144 = arith.constant dense<0.000000e+00> : vector<64x32xf32>
    %147 = tpu.matmul %144, %146, %cst_144 {dimension_numbers = #tpu.dot_dimension_numbers<[1], [0], [0], [1], [0, 0, 1, 1], [], []>} : vector<64x96xbf16>, vector<96x32xbf16>, vector<64x32xf32> -> vector<64x32xf32>
    %148 = arith.addf %141, %147 : vector<64x32xf32>
    %149 = vector.extract_strided_slice %140 {offsets = [0, 1, 0, 0], sizes = [1, 8, 8, 96], strides = [1, 1, 1, 1]} : vector<1x10x8x96xf32> to vector<1x8x8x96xf32>
    %150 = vector.shape_cast %149 : vector<1x8x8x96xf32> to vector<64x96xf32>
    %151 = arith.truncf %150 : vector<64x96xf32> to vector<64x96xbf16>
    %c7_145 = arith.constant 7 : index
    %c0_146 = arith.constant 0 : index
    %c0_147 = arith.constant 0 : index
    %152 = vector.load %arg5[%c7_145, %c0_146, %c0_147] : memref<12x96x32xbf16, #tpu.memory_space<vmem>>, vector<1x96x32xbf16>
    %153 = vector.shape_cast %152 : vector<1x96x32xbf16> to vector<96x32xbf16>
    %cst_148 = arith.constant dense<0.000000e+00> : vector<64x32xf32>
    %154 = tpu.matmul %151, %153, %cst_148 {dimension_numbers = #tpu.dot_dimension_numbers<[1], [0], [0], [1], [0, 0, 1, 1], [], []>} : vector<64x96xbf16>, vector<96x32xbf16>, vector<64x32xf32> -> vector<64x32xf32>
    %155 = arith.addf %148, %154 : vector<64x32xf32>
    %156 = vector.extract_strided_slice %140 {offsets = [0, 2, 0, 0], sizes = [1, 8, 8, 96], strides = [1, 1, 1, 1]} : vector<1x10x8x96xf32> to vector<1x8x8x96xf32>
    %157 = vector.shape_cast %156 : vector<1x8x8x96xf32> to vector<64x96xf32>
    %158 = arith.truncf %157 : vector<64x96xf32> to vector<64x96xbf16>
    %c8_149 = arith.constant 8 : index
    %c0_150 = arith.constant 0 : index
    %c0_151 = arith.constant 0 : index
    %159 = vector.load %arg5[%c8_149, %c0_150, %c0_151] : memref<12x96x32xbf16, #tpu.memory_space<vmem>>, vector<1x96x32xbf16>
    %160 = vector.shape_cast %159 : vector<1x96x32xbf16> to vector<96x32xbf16>
    %cst_152 = arith.constant dense<0.000000e+00> : vector<64x32xf32>
    %161 = tpu.matmul %158, %160, %cst_152 {dimension_numbers = #tpu.dot_dimension_numbers<[1], [0], [0], [1], [0, 0, 1, 1], [], []>} : vector<64x96xbf16>, vector<96x32xbf16>, vector<64x32xf32> -> vector<64x32xf32>
    %162 = arith.addf %155, %161 : vector<64x32xf32>
    %163 = vector.broadcast %134 : vector<1x32xf32> to vector<64x32xf32>
    %164 = arith.mulf %162, %163 : vector<64x32xf32>
    %165 = vector.broadcast %135 : vector<1x32xf32> to vector<64x32xf32>
    %166 = arith.addf %164, %165 : vector<64x32xf32>
    %cst_153 = arith.constant 0.000000e+00 : f32
    %167 = vector.broadcast %cst_153 : f32 to vector<64x32xf32>
    %168 = arith.maximumf %166, %167 : vector<64x32xf32>
    %169 = vector.shape_cast %168 : vector<64x32xf32> to vector<1x8x8x32xf32>
    %c0_154 = arith.constant 0 : index
    %c1_155 = arith.constant 1 : index
    %c8_156 = arith.constant 8 : index
    %c0_157 = arith.constant 0 : index
    %170 = vector.load %arg24[%c0_154, %c1_155, %c8_156, %c0_157] : memref<1x10x24x32xf32, #tpu.memory_space<vmem>>, vector<1x8x8x32xf32>
    tpu.vector_store %arg24[%c0_154, %c1_155, %c8_156, %c0_157], %169 {strides = array<i32>} : memref<1x10x24x32xf32, #tpu.memory_space<vmem>>, vector<1x8x8x32xf32>,
    %c0_158 = arith.constant 0 : index
    %c1_159 = arith.constant 1 : index
    %c8_160 = arith.constant 8 : index
    %c0_161 = arith.constant 0 : index
    %171 = vector.load %arg23[%c0_158, %c1_159, %c8_160, %c0_161] : memref<1x10x24x32xf32, #tpu.memory_space<vmem>>, vector<1x8x8x32xf32>
    %172 = vector.shape_cast %171 : vector<1x8x8x32xf32> to vector<64x32xf32>
    %c3_162 = arith.constant 3 : index
    %c0_163 = arith.constant 0 : index
    %173 = vector.load %arg6[%c3_162, %c0_163] : memref<4x32xf32, #tpu.memory_space<vmem>>, vector<1x32xf32>
    %c3_164 = arith.constant 3 : index
    %c0_165 = arith.constant 0 : index
    %174 = vector.load %arg7[%c3_164, %c0_165] : memref<4x32xf32, #tpu.memory_space<vmem>>, vector<1x32xf32>
    %c0_166 = arith.constant 0 : index
    %c0_167 = arith.constant 0 : index
    %c0_168 = arith.constant 0 : index
    %c0_169 = arith.constant 0 : index
    %175 = vector.load %arg24[%c0_166, %c0_167, %c0_168, %c0_169] : memref<1x10x24x32xf32, #tpu.memory_space<vmem>>, vector<1x10x24x32xf32>
    %176 = vector.extract_strided_slice %175 {offsets = [0, 0, 7, 0], sizes = [1, 10, 8, 32], strides = [1, 1, 1, 1]} : vector<1x10x24x32xf32> to vector<1x10x8x32xf32>
    %177 = vector.extract_strided_slice %175 {offsets = [0, 0, 8, 0], sizes = [1, 10, 8, 32], strides = [1, 1, 1, 1]} : vector<1x10x24x32xf32> to vector<1x10x8x32xf32>
    %178 = vector.extract_strided_slice %175 {offsets = [0, 0, 9, 0], sizes = [1, 10, 8, 32], strides = [1, 1, 1, 1]} : vector<1x10x24x32xf32> to vector<1x10x8x32xf32>
    %179 = tpu.concatenate %176, %177, %178 in 3 : vector<1x10x8x32xf32>, vector<1x10x8x32xf32>, vector<1x10x8x32xf32> -> vector<1x10x8x96xf32>
    %cst_170 = arith.constant 0.000000e+00 : f32
    %180 = vector.broadcast %cst_170 : f32 to vector<64x32xf32>
    %181 = vector.extract_strided_slice %179 {offsets = [0, 0, 0, 0], sizes = [1, 8, 8, 96], strides = [1, 1, 1, 1]} : vector<1x10x8x96xf32> to vector<1x8x8x96xf32>
    %182 = vector.shape_cast %181 : vector<1x8x8x96xf32> to vector<64x96xf32>
    %183 = arith.truncf %182 : vector<64x96xf32> to vector<64x96xbf16>
    %c9_171 = arith.constant 9 : index
    %c0_172 = arith.constant 0 : index
    %c0_173 = arith.constant 0 : index
    %184 = vector.load %arg5[%c9_171, %c0_172, %c0_173] : memref<12x96x32xbf16, #tpu.memory_space<vmem>>, vector<1x96x32xbf16>
    %185 = vector.shape_cast %184 : vector<1x96x32xbf16> to vector<96x32xbf16>
    %cst_174 = arith.constant dense<0.000000e+00> : vector<64x32xf32>
    %186 = tpu.matmul %183, %185, %cst_174 {dimension_numbers = #tpu.dot_dimension_numbers<[1], [0], [0], [1], [0, 0, 1, 1], [], []>} : vector<64x96xbf16>, vector<96x32xbf16>, vector<64x32xf32> -> vector<64x32xf32>
    %187 = arith.addf %180, %186 : vector<64x32xf32>
    %188 = vector.extract_strided_slice %179 {offsets = [0, 1, 0, 0], sizes = [1, 8, 8, 96], strides = [1, 1, 1, 1]} : vector<1x10x8x96xf32> to vector<1x8x8x96xf32>
    %189 = vector.shape_cast %188 : vector<1x8x8x96xf32> to vector<64x96xf32>
    %190 = arith.truncf %189 : vector<64x96xf32> to vector<64x96xbf16>
    %c10 = arith.constant 10 : index
    %c0_175 = arith.constant 0 : index
    %c0_176 = arith.constant 0 : index
    %191 = vector.load %arg5[%c10, %c0_175, %c0_176] : memref<12x96x32xbf16, #tpu.memory_space<vmem>>, vector<1x96x32xbf16>
    %192 = vector.shape_cast %191 : vector<1x96x32xbf16> to vector<96x32xbf16>
    %cst_177 = arith.constant dense<0.000000e+00> : vector<64x32xf32>
    %193 = tpu.matmul %190, %192, %cst_177 {dimension_numbers = #tpu.dot_dimension_numbers<[1], [0], [0], [1], [0, 0, 1, 1], [], []>} : vector<64x96xbf16>, vector<96x32xbf16>, vector<64x32xf32> -> vector<64x32xf32>
    %194 = arith.addf %187, %193 : vector<64x32xf32>
    %195 = vector.extract_strided_slice %179 {offsets = [0, 2, 0, 0], sizes = [1, 8, 8, 96], strides = [1, 1, 1, 1]} : vector<1x10x8x96xf32> to vector<1x8x8x96xf32>
    %196 = vector.shape_cast %195 : vector<1x8x8x96xf32> to vector<64x96xf32>
    %197 = arith.truncf %196 : vector<64x96xf32> to vector<64x96xbf16>
    %c11 = arith.constant 11 : index
    %c0_178 = arith.constant 0 : index
    %c0_179 = arith.constant 0 : index
    %198 = vector.load %arg5[%c11, %c0_178, %c0_179] : memref<12x96x32xbf16, #tpu.memory_space<vmem>>, vector<1x96x32xbf16>
    %199 = vector.shape_cast %198 : vector<1x96x32xbf16> to vector<96x32xbf16>
    %cst_180 = arith.constant dense<0.000000e+00> : vector<64x32xf32>
    %200 = tpu.matmul %197, %199, %cst_180 {dimension_numbers = #tpu.dot_dimension_numbers<[1], [0], [0], [1], [0, 0, 1, 1], [], []>} : vector<64x96xbf16>, vector<96x32xbf16>, vector<64x32xf32> -> vector<64x32xf32>
    %201 = arith.addf %194, %200 : vector<64x32xf32>
    %202 = vector.broadcast %173 : vector<1x32xf32> to vector<64x32xf32>
    %203 = arith.mulf %201, %202 : vector<64x32xf32>
    %204 = vector.broadcast %174 : vector<1x32xf32> to vector<64x32xf32>
    %205 = arith.addf %203, %204 : vector<64x32xf32>
    %206 = arith.addf %205, %172 : vector<64x32xf32>
    %cst_181 = arith.constant 0.000000e+00 : f32
    %207 = vector.broadcast %cst_181 : f32 to vector<64x32xf32>
    %208 = arith.maximumf %206, %207 : vector<64x32xf32>
    %209 = arith.truncf %208 : vector<64x32xf32> to vector<64x32xbf16>
    %c0_182 = arith.constant 0 : index
    %c0_183 = arith.constant 0 : index
    %210 = vector.load %arg8[%c0_182, %c0_183] : memref<2x32xbf16, #tpu.memory_space<vmem>>, vector<2x32xbf16>
    "tpu.trace_start"() <{level = 10 : i32, message = "ck,sk->cs"}> : () -> ()
    %cst_184 = arith.constant dense<0.000000e+00> : vector<2x64xf32>
    %211 = tpu.matmul %210, %209, %cst_184 {dimension_numbers = #tpu.dot_dimension_numbers<[1], [1], [0], [0], [0, 0, 1, 0], [], []>} : vector<2x32xbf16>, vector<64x32xbf16>, vector<2x64xf32> -> vector<2x64xf32>
    "tpu.trace_stop"() : () -> ()
    %c0_185 = arith.constant 0 : index
    %c0_186 = arith.constant 0 : index
    %212 = vector.load %arg9[%c0_185, %c0_186] : memref<2x1xf32, #tpu.memory_space<vmem>>, vector<2x1xf32>
    %213 = vector.broadcast %212 : vector<2x1xf32> to vector<2x64xf32>
    %214 = arith.mulf %211, %213 : vector<2x64xf32>
    %c0_187 = arith.constant 0 : index
    %c0_188 = arith.constant 0 : index
    %215 = vector.load %arg10[%c0_187, %c0_188] : memref<2x1xf32, #tpu.memory_space<vmem>>, vector<2x1xf32>
    %216 = vector.broadcast %215 : vector<2x1xf32> to vector<2x64xf32>
    %217 = arith.addf %214, %216 : vector<2x64xf32>
    %cst_189 = arith.constant 0.000000e+00 : f32
    %218 = vector.broadcast %cst_189 : f32 to vector<2x64xf32>
    %219 = arith.maximumf %217, %218 : vector<2x64xf32>
    %c0_190 = arith.constant 0 : index
    %c0_191 = arith.constant 0 : index
    %220 = vector.load %arg13[%c0_190, %c0_191] : memref<1x32xbf16, #tpu.memory_space<vmem>>, vector<1x32xbf16>
    "tpu.trace_start"() <{level = 10 : i32, message = "ck,sk->cs"}> : () -> ()
    %cst_192 = arith.constant dense<0.000000e+00> : vector<1x64xf32>
    %221 = tpu.matmul %220, %209, %cst_192 {dimension_numbers = #tpu.dot_dimension_numbers<[1], [1], [0], [0], [0, 0, 1, 0], [], []>} : vector<1x32xbf16>, vector<64x32xbf16>, vector<1x64xf32> -> vector<1x64xf32>
    "tpu.trace_stop"() : () -> ()
    %c0_193 = arith.constant 0 : index
    %c0_194 = arith.constant 0 : index
    %222 = vector.load %arg14[%c0_193, %c0_194] : memref<1x1xf32, #tpu.memory_space<vmem>>, vector<1x1xf32>
    %223 = vector.broadcast %222 : vector<1x1xf32> to vector<1x64xf32>
    %224 = arith.mulf %221, %223 : vector<1x64xf32>
    %c0_195 = arith.constant 0 : index
    %c0_196 = arith.constant 0 : index
    %225 = vector.load %arg15[%c0_195, %c0_196] : memref<1x1xf32, #tpu.memory_space<vmem>>, vector<1x1xf32>
    %226 = vector.broadcast %225 : vector<1x1xf32> to vector<1x64xf32>
    %227 = arith.addf %224, %226 : vector<1x64xf32>
    %cst_197 = arith.constant 0.000000e+00 : f32
    %228 = vector.broadcast %cst_197 : f32 to vector<1x64xf32>
    %229 = arith.maximumf %227, %228 : vector<1x64xf32>
    %c0_198 = arith.constant 0 : index
    %c0_199 = arith.constant 0 : index
    %230 = vector.load %arg11[%c0_198, %c0_199] : memref<128x8xbf16, #tpu.memory_space<vmem>>, vector<128x8xbf16>
    %c0_200 = arith.constant 0 : index
    %c0_201 = arith.constant 0 : index
    %231 = vector.load %arg12[%c0_200, %c0_201] : memref<1x8xf32, #tpu.memory_space<vmem>>, vector<1x8xf32>
    %c0_202 = arith.constant 0 : index
    %c0_203 = arith.constant 0 : index
    %232 = vector.load %arg16[%c0_202, %c0_203] : memref<64x256xbf16, #tpu.memory_space<vmem>>, vector<64x256xbf16>
    %c0_204 = arith.constant 0 : index
    %c0_205 = arith.constant 0 : index
    %233 = vector.load %arg17[%c0_204, %c0_205] : memref<1x256xf32, #tpu.memory_space<vmem>>, vector<1x256xf32>
    %c0_206 = arith.constant 0 : index
    %c0_207 = arith.constant 0 : index
    %234 = vector.load %arg18[%c0_206, %c0_207] : memref<256x1xbf16, #tpu.memory_space<vmem>>, vector<256x1xbf16>
    %c0_208 = arith.constant 0 : index
    %c0_209 = arith.constant 0 : index
    %235 = vector.load %arg19[%c0_208, %c0_209] : memref<1x1xf32, #tpu.memory_space<vmem>>, vector<1x1xf32>
    %236 = arith.truncf %219 : vector<2x64xf32> to vector<2x64xbf16>
    %237 = vector.extract_strided_slice %236 {offsets = [0, 0], sizes = [1, 64], strides = [1, 1]} : vector<2x64xbf16> to vector<1x64xbf16>
    %238 = vector.extract_strided_slice %230 {offsets = [0, 0], sizes = [64, 8], strides = [1, 1]} : vector<128x8xbf16> to vector<64x8xbf16>
    %cst_210 = arith.constant dense<0.000000e+00> : vector<1x8xf32>
    %239 = tpu.matmul %237, %238, %cst_210 {dimension_numbers = #tpu.dot_dimension_numbers<[1], [0], [0], [1], [0, 0, 1, 1], [], []>} : vector<1x64xbf16>, vector<64x8xbf16>, vector<1x8xf32> -> vector<1x8xf32>
    %240 = vector.extract_strided_slice %236 {offsets = [1, 0], sizes = [1, 64], strides = [1, 1]} : vector<2x64xbf16> to vector<1x64xbf16>
    %241 = vector.extract_strided_slice %230 {offsets = [64, 0], sizes = [64, 8], strides = [1, 1]} : vector<128x8xbf16> to vector<64x8xbf16>
    %cst_211 = arith.constant dense<0.000000e+00> : vector<1x8xf32>
    %242 = tpu.matmul %240, %241, %cst_211 {dimension_numbers = #tpu.dot_dimension_numbers<[1], [0], [0], [1], [0, 0, 1, 1], [], []>} : vector<1x64xbf16>, vector<64x8xbf16>, vector<1x8xf32> -> vector<1x8xf32>
    %243 = arith.addf %239, %242 : vector<1x8xf32>
    %244 = arith.addf %243, %231 : vector<1x8xf32>
    %245 = vector.shape_cast %244 : vector<1x8xf32> to vector<1x1x8xf32>
    %c0_212 = arith.constant 0 : index
    %c0_213 = arith.constant 0 : index
    %c0_214 = arith.constant 0 : index
    %246 = vector.load %arg20[%c0_212, %c0_213, %c0_214] : memref<1x1x8xf32, #tpu.memory_space<vmem>>, vector<1x1x8xf32>
    tpu.vector_store %arg20[%c0_212, %c0_213, %c0_214], %245 {strides = array<i32>} : memref<1x1x8xf32, #tpu.memory_space<vmem>>, vector<1x1x8xf32>,
    %247 = arith.truncf %229 : vector<1x64xf32> to vector<1x64xbf16>
    %cst_215 = arith.constant dense<0.000000e+00> : vector<1x256xf32>
    %248 = tpu.matmul %247, %232, %cst_215 {dimension_numbers = #tpu.dot_dimension_numbers<[1], [0], [0], [1], [0, 0, 1, 1], [], []>} : vector<1x64xbf16>, vector<64x256xbf16>, vector<1x256xf32> -> vector<1x256xf32>
    %249 = arith.addf %248, %233 : vector<1x256xf32>
    %cst_216 = arith.constant 0.000000e+00 : f32
    %250 = vector.broadcast %cst_216 : f32 to vector<1x256xf32>
    %251 = arith.maximumf %249, %250 : vector<1x256xf32>
    %252 = arith.truncf %251 : vector<1x256xf32> to vector<1x256xbf16>
    %cst_217 = arith.constant dense<0.000000e+00> : vector<1x1xf32>
    %253 = tpu.matmul %252, %234, %cst_217 {dimension_numbers = #tpu.dot_dimension_numbers<[1], [0], [0], [1], [0, 0, 1, 1], [], []>} : vector<1x256xbf16>, vector<256x1xbf16>, vector<1x1xf32> -> vector<1x1xf32>
    %254 = arith.addf %253, %235 : vector<1x1xf32>
    %255 = math.tanh %254 : vector<1x1xf32>
    %256 = vector.shape_cast %255 : vector<1x1xf32> to vector<1x1x1xf32>
    %c0_218 = arith.constant 0 : index
    %c0_219 = arith.constant 0 : index
    %c0_220 = arith.constant 0 : index
    %257 = vector.load %arg21[%c0_218, %c0_219, %c0_220] : memref<1x1x1xf32, #tpu.memory_space<vmem>>, vector<1x1x1xf32>
    tpu.vector_store %arg21[%c0_218, %c0_219, %c0_220], %256 {strides = array<i32>} : memref<1x1x1xf32, #tpu.memory_space<vmem>>, vector<1x1x1xf32>,
    return
  }
  func.func @transform_0(%arg0: i32) -> (i32, i32, i32, i32) {
    %c0_i32 = arith.constant 0 : i32
    %c0_i32_0 = arith.constant 0 : i32
    %c0_i32_1 = arith.constant 0 : i32
    %c0_i32_2 = arith.constant 0 : i32
    return %arg0, %c0_i32, %c0_i32_0, %c0_i32_1 : i32, i32, i32, i32
  }
  func.func @transform_1(%arg0: i32) -> (i32, i32, i32) {
    %c0_i32 = arith.constant 0 : i32
    %c0_i32_0 = arith.constant 0 : i32
    %c0_i32_1 = arith.constant 0 : i32
    %c0_i32_2 = arith.constant 0 : i32
    return %c0_i32, %c0_i32_0, %c0_i32_1 : i32, i32, i32
  }
  func.func @transform_2(%arg0: i32) -> (i32, i32) {
    %c0_i32 = arith.constant 0 : i32
    %c0_i32_0 = arith.constant 0 : i32
    %c0_i32_1 = arith.constant 0 : i32
    return %c0_i32, %c0_i32_0 : i32, i32
  }
  func.func @transform_3(%arg0: i32) -> (i32, i32) {
    %c0_i32 = arith.constant 0 : i32
    %c0_i32_0 = arith.constant 0 : i32
    %c0_i32_1 = arith.constant 0 : i32
    return %c0_i32, %c0_i32_0 : i32, i32
  }
  func.func @transform_4(%arg0: i32) -> (i32, i32, i32) {
    %c0_i32 = arith.constant 0 : i32
    %c0_i32_0 = arith.constant 0 : i32
    %c0_i32_1 = arith.constant 0 : i32
    %c0_i32_2 = arith.constant 0 : i32
    return %c0_i32, %c0_i32_0, %c0_i32_1 : i32, i32, i32
  }
  func.func @transform_5(%arg0: i32) -> (i32, i32) {
    %c0_i32 = arith.constant 0 : i32
    %c0_i32_0 = arith.constant 0 : i32
    %c0_i32_1 = arith.constant 0 : i32
    return %c0_i32, %c0_i32_0 : i32, i32
  }
  func.func @transform_6(%arg0: i32) -> (i32, i32) {
    %c0_i32 = arith.constant 0 : i32
    %c0_i32_0 = arith.constant 0 : i32
    %c0_i32_1 = arith.constant 0 : i32
    return %c0_i32, %c0_i32_0 : i32, i32
  }
  func.func @transform_7(%arg0: i32) -> (i32, i32) {
    %c0_i32 = arith.constant 0 : i32
    %c0_i32_0 = arith.constant 0 : i32
    %c0_i32_1 = arith.constant 0 : i32
    return %c0_i32, %c0_i32_0 : i32, i32
  }
  func.func @transform_8(%arg0: i32) -> (i32, i32) {
    %c0_i32 = arith.constant 0 : i32
    %c0_i32_0 = arith.constant 0 : i32
    %c0_i32_1 = arith.constant 0 : i32
    return %c0_i32, %c0_i32_0 : i32, i32
  }
  func.func @transform_9(%arg0: i32) -> (i32, i32) {
    %c0_i32 = arith.constant 0 : i32
    %c0_i32_0 = arith.constant 0 : i32
    %c0_i32_1 = arith.constant 0 : i32
    return %c0_i32, %c0_i32_0 : i32, i32
  }
  func.func @transform_10(%arg0: i32) -> (i32, i32) {
    %c0_i32 = arith.constant 0 : i32
    %c0_i32_0 = arith.constant 0 : i32
    %c0_i32_1 = arith.constant 0 : i32
    return %c0_i32, %c0_i32_0 : i32, i32
  }
  func.func @transform_11(%arg0: i32) -> (i32, i32) {
    %c0_i32 = arith.constant 0 : i32
    %c0_i32_0 = arith.constant 0 : i32
    %c0_i32_1 = arith.constant 0 : i32
    return %c0_i32, %c0_i32_0 : i32, i32
  }
  func.func @transform_12(%arg0: i32) -> (i32, i32) {
    %c0_i32 = arith.constant 0 : i32
    %c0_i32_0 = arith.constant 0 : i32
    %c0_i32_1 = arith.constant 0 : i32
    return %c0_i32, %c0_i32_0 : i32, i32
  }
  func.func @transform_13(%arg0: i32) -> (i32, i32) {
    %c0_i32 = arith.constant 0 : i32
    %c0_i32_0 = arith.constant 0 : i32
    %c0_i32_1 = arith.constant 0 : i32
    return %c0_i32, %c0_i32_0 : i32, i32
  }
  func.func @transform_14(%arg0: i32) -> (i32, i32) {
    %c0_i32 = arith.constant 0 : i32
    %c0_i32_0 = arith.constant 0 : i32
    %c0_i32_1 = arith.constant 0 : i32
    return %c0_i32, %c0_i32_0 : i32, i32
  }
  func.func @transform_15(%arg0: i32) -> (i32, i32) {
    %c0_i32 = arith.constant 0 : i32
    %c0_i32_0 = arith.constant 0 : i32
    %c0_i32_1 = arith.constant 0 : i32
    return %c0_i32, %c0_i32_0 : i32, i32
  }
  func.func @transform_16(%arg0: i32) -> (i32, i32) {
    %c0_i32 = arith.constant 0 : i32
    %c0_i32_0 = arith.constant 0 : i32
    %c0_i32_1 = arith.constant 0 : i32
    return %c0_i32, %c0_i32_0 : i32, i32
  }
  func.func @transform_17(%arg0: i32) -> (i32, i32) {
    %c0_i32 = arith.constant 0 : i32
    %c0_i32_0 = arith.constant 0 : i32
    %c0_i32_1 = arith.constant 0 : i32
    return %c0_i32, %c0_i32_0 : i32, i32
  }
  func.func @transform_18(%arg0: i32) -> (i32, i32) {
    %c0_i32 = arith.constant 0 : i32
    %c0_i32_0 = arith.constant 0 : i32
    %c0_i32_1 = arith.constant 0 : i32
    return %c0_i32, %c0_i32_0 : i32, i32
  }
  func.func @transform_19(%arg0: i32) -> (i32, i32, i32) {
    %c0_i32 = arith.constant 0 : i32
    %c0_i32_0 = arith.constant 0 : i32
    %c0_i32_1 = arith.constant 0 : i32
    return %arg0, %c0_i32, %c0_i32_0 : i32, i32, i32
  }
  func.func @transform_20(%arg0: i32) -> (i32, i32, i32) {
    %c0_i32 = arith.constant 0 : i32
    %c0_i32_0 = arith.constant 0 : i32
    %c0_i32_1 = arith.constant 0 : i32
    return %arg0, %c0_i32, %c0_i32_0 : i32, i32, i32
  }
}

</mosaic_0001>

<bundles_post_ra>
// kernel: forward.1
= control target key start
LH: loop header
LB: loop body
LE: loop exit
PB: predicated region body
PF: predicated region fallthrough
CT: control target
= control target key end

     0   :  { %s7992_s0 = inlined_call_operand.vmem [shape: f32[2,8,8,4], index: 0, kind: input, shape index: {}]   ;;  %s7993_s1 = inlined_call_operand.vmem [shape: bf16[3,12,32], index: 1, kind: input, shape index: {}]   ;;  %s7994_s2 = inlined_call_operand.vmem [shape: f32[1,32], index: 2, kind: input, shape index: {}]   ;;  %s7995_s3 = inlined_call_operand.vmem [shape: f32[1,32], index: 3, kind: input, shape index: {}]   ;;  %s7996_s4 = inlined_call_operand.vmem [shape: bf16[12,96,32], index: 4, kind: input, shape index: {}]   ;;  %s7997_s5 = inlined_call_operand.vmem [shape: f32[4,32], index: 5, kind: input, shape index: {}]   ;;  %s7998_s6 = inlined_call_operand.vmem [shape: f32[4,32], index: 6, kind: input, shape index: {}]   ;;  %s7999_s7 = inlined_call_operand.vmem [shape: bf16[2,32], index: 7, kind: input, shape index: {}]   ;;  %s8000_s8 = inlined_call_operand.vmem [shape: f32[2,1], index: 8, kind: input, shape index: {}]   ;;  %s8001_s9 = inlined_call_operand.vmem [shape: f32[2,1], index: 9, kind: input, shape index: {}]   ;;  %s8002_s10 = inlined_call_operand.vmem [shape: bf16[128,8], index: 10, kind: input, shape index: {}]   ;;  %s8003_s11 = inlined_call_operand.vmem [shape: f32[1,8], index: 11, kind: input, shape index: {}]   ;;  %s8004_s12 = inlined_call_operand.vmem [shape: bf16[1,32], index: 12, kind: input, shape index: {}]   ;;  %s8005_s13 = inlined_call_operand.<no memory space> [shape: f32[1,1], index: 13, kind: input, shape index: {}]   ;;  %s8006_s15 = inlined_call_operand.vmem [shape: bf16[64,256], index: 15, kind: input, shape index: {}]   ;;  %s8007_s16 = inlined_call_operand.vmem [shape: f32[1,256], index: 16, kind: input, shape index: {}]   ;;  %s8008_s17 = inlined_call_operand.vmem [shape: bf16[256,1], index: 17, kind: input, shape index: {}]   ;;  %s8009_s19 = inlined_call_operand.hbm [shape: f32[2,1,8], index: 19, kind: output, shape index: {0}]   ;;  %s8010_s20 = inlined_call_operand.vmem [shape: f32[2,1,1], index: 20, kind: output, shape index: {1}]   ;;  %s8011_s14 = inlined_call_operand.<no memory space> [shape: f32[1,1], index: 14, kind: input, shape index: {}]   ;;  %s8012_s18 = inlined_call_operand.<no memory space> [shape: f32[1,1], index: 18, kind: input, shape index: {}]  }
   0x1   :  { %8023 = sst [smem:[#allocation14_spill]] %s7992_s0  ;;  %v26_v0 = vstv %s8005_s13  ;;  %v28_v1 = vstv %s8011_s14  ;;  %v30_v2 = vstv %s8012_s18 }
   0x2   :  { %8024 = sst [smem:[#allocation15_spill]] %s7993_s1  ;;  %27 = vst [vmem:[#allocation5] sm:$0x1] %v26_v0  ;;  %29 = vst [vmem:[#allocation6] sm:$0x1] %v28_v1 }
   0x3   :  { %8025 = sst [smem:[#allocation16_spill]] %s7994_s2  ;;  %31 = vst [vmem:[#allocation7] sm:$0x1] %v30_v2 }
   0x4   :  { %8026 = sst [smem:[#allocation17_spill]] %s7995_s3 }
   0x5   :  { %8027 = sst [smem:[#allocation18_spill]] %s7996_s4 }
   0x6   :  { %8028 = sst [smem:[#allocation19_spill]] %s7997_s5 }
   0x7   :  { %8029 = sst [smem:[#allocation20_spill]] %s7998_s6 }
   0x8   :  { %32 = vsyncpa [#allocation9], 0 }
   0x9   :  { %34 = vsyncpa [#allocation9 + $0x1], 0  ;;  %s6486_s3 = smov 0   ;;  %s6488_s26 = smov 0  }
   0xa   :  { %s6490_s27 = smov 0   ;;  %s6492_s13 = smov 0  }
   0xb LB: > { %8030 = sst [smem:[#allocation11_spill]] %s6358_s27  ;;  %s6507_s14 = sadd.s32 4294967295, %s6362_s13   ;;  %s6362_s13 = sphi %s6492_s13, %s8044_s13   ;;  %s6358_s27 = sphi %s6490_s27, %s8046_s27   ;;  %s6354_s26 = sphi %s6488_s26, %s8048_s26   ;;  %s6350_s3 = sphi %s6486_s3, %s8047_s3  }
   0xc   : > { %s4878_s18 = sadd.s32 4294967294, %s6362_s13   ;;  %s6511_s28 = sadd.s32 1, %s6362_s13  }
   0xd   : > { %8031 = sst [smem:[#allocation12_spill]] %s6511_s28  ;;  %s451_s4 = sadd.s32 1, %s6358_s27 }
   0xe   : > { %s448_s29 = ssub.s32 %s6362_s13, %s6511_s28  ;;  %p461_p0 = scmp.ne.s32.totalorder %s6358_s27, %s6354_s26 }
   0xf   : > { %p449_p1 = scmp.eq.s32.totalorder %s448_s29, 0  ;;  %p462_p2 = scmp.eq.s32.totalorder %s6507_s14, 1 }
  0x10   : > { %p467_p3 = scmp.ne.s32.totalorder %s6354_s26, %s6350_s3  ;;  %p468_p4 = scmp.eq.s32.totalorder %s4878_s18, 1 }
  0x11   : > { %s6522_s30 = scalar_select %p449_p1, %s6358_s27, %s451_s4  }
  0x12   : > { %p6524_p5 = por %p462_p2, %p461_p0  ;;  %p6528_p6 = por %p468_p4, %p467_p3 }
  0x13   : > { %8032 = sst [smem:[#allocation13_spill]] %s6522_s30  ;;  %p4881_p7 = scmp.ge.s32.totalorder %s6362_s13, 1 }
  0x14   : > { %p574_p8 = scmp.lt.s32.totalorder %s6362_s13, 3 }
  0x16   : > { %p575_p9 = pnand %p4881_p7, %p574_p8 }
  0x17   : > { %vm643_vm0 = vcmask (!%p575_p9), 31744   ;;  %vm651_vm1 = vcmask (!%p575_p9), 24576   ;;  %p634_p10 = scmp.lt.s32.totalorder (!%p575_p9), %s6507_s14, 1  ;;  %v6364_v3 = vmov (!%p575_p9), 0.0   ;;  %s8035_s2 = sld [smem:[#allocation14_spill]] (!%p575_p9)  ;;  %vm837_vm2 = vcmask (!%p575_p9), 1045504  }
  0x18   : > { %578 = sbr.rel (%p575_p9) target bundleno = 2812 (0xafc), region = 96  ;;  %645 = vst.msk [vmem:[#allocation2 + $0x8] sm:$0xff] (!%p575_p9), %vm643_vm0, %v6364_v3  ;;  %646 = vst.msk [vmem:[#allocation2 + $0x10] sm:$0xff] (!%p575_p9), %vm643_vm0, %v6364_v3  ;;  %s6365_s18 = smov (!%p575_p9), 8   ;;  %vm948_vm3 = vcmask (!%p575_p9), 64512   ;;  %vm985_vm4 = vcmask (!%p575_p9), 1040384  }
  0x19   : > { %644 = vst.msk [vmem:[#allocation2] sm:$0xff] (!%p575_p9), %vm643_vm0, %v6364_v3  ;;  %648 = vst.msk [vmem:[#allocation2 + $0xd8] sm:$0xff] (!%p575_p9), %vm643_vm0, %v6364_v3  ;;  %s6366_s4 = smov (!%p575_p9), 4   ;;  %s8036_s23 = sld [smem:[#allocation15_spill]] (!%p575_p9)  ;;  %vm1042_vm5 = vcmask (!%p575_p9), 97280   ;;  %vm672_vm6 = vcmask (!%p575_p9), 261120  }
  0x1a   : > { %649 = vst.msk [vmem:[#allocation2 + $0xe0] sm:$0xff] (!%p575_p9), %vm643_vm0, %v6364_v3  ;;  %650 = vst.msk [vmem:[#allocation2 + $0xe8] sm:$0xff] (!%p575_p9), %vm643_vm0, %v6364_v3  ;;  %vm680_vm7 = vcmask (!%p575_p9), 253952   ;;  %s8038_s24 = sld [smem:[#allocation16_spill]] (!%p575_p9)  ;;  %s8039_s29 = sld [smem:[#allocation17_spill]] (!%p575_p9)  ;;  %vm1549_vm8 = vcmask (!%p575_p9), 523264  }
  0x1b   : > { %653 = vst.msk [vmem:[#allocation2 + $0x1f] sm:$0x1] (!%p575_p9), %vm651_vm1, %v6364_v3  ;;  %654 = vst.msk [vmem:[#allocation2 + $0x37] sm:$0x1] (!%p575_p9), %vm651_vm1, %v6364_v3  ;;  %vm1693_vm9 = vcmask (!%p575_p9), 785408   ;;  %s8040_s5 = sld [smem:[#allocation19_spill]] (!%p575_p9) }
  0x1c   : > { %655 = vst.msk [vmem:[#allocation2 + $0x4f] sm:$0x1] (!%p575_p9), %vm651_vm1, %v6364_v3  ;;  %656 = vst.msk [vmem:[#allocation2 + $0x67] sm:$0x1] (!%p575_p9), %vm651_vm1, %v6364_v3  ;;  %s8041_s6 = sld [smem:[#allocation20_spill]] (!%p575_p9)  ;;  %vm6369_vm10 = vmmov (!%p575_p9), 0  }
  0x1d   : > { %657 = vst.msk [vmem:[#allocation2 + $0x7f] sm:$0x1] (!%p575_p9), %vm651_vm1, %v6364_v3  ;;  %658 = vst.msk [vmem:[#allocation2 + $0x97] sm:$0x1] (!%p575_p9), %vm651_vm1, %v6364_v3  ;;  %s627_s30 = sand.u32 (!%p575_p9), 1, %s6354_s26   ;;  %vm4544_vm11 = vcmask (!%p575_p9), 57344  }
  0x1e   : > { %659 = vst.msk [vmem:[#allocation2 + $0xaf] sm:$0x1] (!%p575_p9), %vm651_vm1, %v6364_v3  ;;  %660 = vst.msk [vmem:[#allocation2 + $0xc7] sm:$0x1] (!%p575_p9), %vm651_vm1, %v6364_v3  ;;  %s6371_s28 = smov (!%p575_p9), [#allocation8]  }
  0x1f   : > { %663 = vst.msk [vmem:[#allocation2 + $0x28] sm:$0x1] %vm651_vm1, %v6364_v3  ;;  %664 = vst.msk [vmem:[#allocation2 + $0x40] sm:$0x1] %vm651_vm1, %v6364_v3  ;;  %s6584_s1 = scalar_select %p634_p10, %s6507_s14, 1  ;;  %v6599_v10 = vld [vmem:[#allocation2 + $0x8] sm:$0xff] }
  0x20   : > { %665 = vst.msk [vmem:[#allocation2 + $0x58] sm:$0x1] %vm651_vm1, %v6364_v3  ;;  %666 = vst.msk [vmem:[#allocation2 + $0x70] sm:$0x1] %vm651_vm1, %v6364_v3  ;;  %v838_v12 = vrot.slane %v6599_v10, 2  ;;  %v787_v22 = vrot.slane %v6599_v10, 1 }
  0x21   : > { %667 = vst.msk [vmem:[#allocation2 + $0x88] sm:$0x1] %vm651_vm1, %v6364_v3  ;;  %668 = vst.msk [vmem:[#allocation2 + $0xa0] sm:$0x1] %vm651_vm1, %v6364_v3  ;;  %s5205_s22 = sshll.u32 %s6584_s1, 6  ;;  %v6650_v2 = vld [vmem:[#allocation2 + $0xe0] sm:$0xff] }
  0x22   : > { %669 = vst.msk [vmem:[#allocation2 + $0xb8] sm:$0x1] %vm651_vm1, %v6364_v3  ;;  %670 = vst.msk [vmem:[#allocation2 + $0xd0] sm:$0x1] %vm651_vm1, %v6364_v3  ;;  %s638_s25 = scalar_lea.vmem %s8035_s2, %s5205_s22  ;;  %s8037_s22 = sld [smem:[#allocation18_spill]] }
  0x23   : > { %662 = vst.msk [vmem:[#allocation2 + $0x10] sm:$0x1] %vm651_vm1, %v6364_v3  ;;  %652 = vst.msk [vmem:[#allocation2 + $0x7] sm:$0x1] %vm651_vm1, %v6364_v3  ;;  %v733_v4 = vld [vmem:[%s638_s25 + $0x28] sm:$0xff]  ;;  %v734_v5 = vld [vmem:[%s638_s25 + $0x30] sm:$0xff] }
  0x24   : > { %661 = vst.msk [vmem:[#allocation2 + $0xdf] sm:$0x1] %vm651_vm1, %v6364_v3  ;;  %671 = vst.msk [vmem:[#allocation2 + $0xe8] sm:$0x1] %vm651_vm1, %v6364_v3  ;;  %v728_v6 = vld [vmem:[%s638_s25] sm:$0xff]  ;;  %v729_v7 = vld [vmem:[%s638_s25 + $0x8] sm:$0xff] }
  0x25   : > { %742 = vst.msk [vmem:[#allocation2 + $0x98] sm:$0xff] %vm643_vm0, %v733_v4  ;;  %743 = vst.msk [vmem:[#allocation2 + $0xb0] sm:$0xff] %vm643_vm0, %v734_v5  ;;  %v730_v8 = vld [vmem:[%s638_s25 + $0x10] sm:$0xff]  ;;  %v731_v9 = vld [vmem:[%s638_s25 + $0x18] sm:$0xff]  ;;  %s8043_s2 = smov 32  }
  0x26   : > { %737 = vst.msk [vmem:[#allocation2 + $0x20] sm:$0xff] %vm643_vm0, %v728_v6  ;;  %738 = vst.msk [vmem:[#allocation2 + $0x38] sm:$0xff] %vm643_vm0, %v729_v7  ;;  %v732_v13 = vld [vmem:[%s638_s25 + $0x20] sm:$0xff]  ;;  %v752_v15 = vld [vmem:[#allocation2 + $0x28] sm:$0xff] }
  0x27   : > { %739 = vst.msk [vmem:[#allocation2 + $0x50] sm:$0xff] %vm643_vm0, %v730_v8  ;;  %740 = vst.msk [vmem:[#allocation2 + $0x68] sm:$0xff] %vm643_vm0, %v731_v9  ;;  %v758_v16 = vld [vmem:[#allocation2 + $0x58] sm:$0xff]  ;;  %v755_v20 = vld [vmem:[#allocation2 + $0x40] sm:$0xff]  ;;  %v842_v23 = vrot.slane %v752_v15, 2 }
  0x28   : > { %741 = vst.msk [vmem:[#allocation2 + $0x80] sm:$0xff] %vm643_vm0, %v732_v13  ;;  %v735_v17 = vld [vmem:[%s638_s25 + $0x38] sm:$0xff]  ;;  %v764_v19 = vld [vmem:[#allocation2 + $0x88] sm:$0xff]  ;;  %v761_v25 = vld [vmem:[#allocation2 + $0x70] sm:$0xff]  ;;  %v848_v30 = vrot.slane %v758_v16, 2  ;;  %v845_v46 = vrot.slane %v755_v20, 2 }
  0x29   : > { %744 = vst.msk [vmem:[#allocation2 + $0xc8] sm:$0xff] %vm643_vm0, %v735_v17  ;;  %v770_v24 = vld [vmem:[#allocation2 + $0xb8] sm:$0xff]  ;;  %v6609_v26 = vld [vmem:[#allocation2 + $0xa0] sm:$0xff]  ;;  %v854_v41 = vrot.slane %v764_v19, 2  ;;  %v851_v48 = vrot.slane %v761_v25, 2  ;;  %v773_v50 = vld [vmem:[#allocation2 + $0xd0] sm:$0xff] }
  0x2a   : > { %v749_v11 = vld [vmem:[#allocation2 + $0x10] sm:$0xff]  ;;  %v860_v47 = vrot.slane %v770_v24, 2  ;;  %v857_v49 = vrot.slane %v6609_v26, 2  ;;  %v863_v59 = vrot.slane %v773_v50, 2  ;;  %v6187_v4 = vld [vmem:[%s8036_s23] sm:$0x3f]  }
  0x2b   : > { %v839_v14 = vrot.slane %v749_v11, 2  ;;  %5782 = vmatprep.subr.msk.bf16.mxu0 %vm837_vm2, %v6187_v4  ;;  %v1141_v5 = vsel %vm837_vm2, %v6187_v4, 0  ;;  %v6188_v6 = vld [vmem:[%s8036_s23 + $0x10] sm:$0x3f]   ;;  %v6189_v15 = vld [vmem:[%s8036_s23 + $0x8] sm:$0x3f]  }
  0x2c   : > { %v6611_v27 = vld [vmem:[#allocation2 + $0x98] sm:$0xff]  ;;  %v6613_v28 = vld [vmem:[#allocation2 + $0xb0] sm:$0xff]  ;;  %5394 = vmatpush3.bf16.msra.mxu0 %v1141_v5  ;;  %v776_v16 = vld [vmem:[#allocation2 + $0xe8] sm:$0xff]  ;;  %v865_v19 = vrot.slane %v6650_v2, 2  ;;  %v1056_v20 = vsel %vm837_vm2, %v6189_v15, 0  ;;  %5781 = vmatprep.subr.msk.bf16.mxu1 %vm837_vm2, %v6189_v15  ;;  %v6690_v50 = vsel %vm837_vm2, %v6188_v6, 0 }
  0x2d   : > { %v840_v18 = vsel %vm837_vm2, %v838_v12, %v839_v14  ;;  %v6615_v29 = vld [vmem:[#allocation2 + $0x20] sm:$0xff]  ;;  %v793_v31 = vrot.slane %v6611_v27, 1  ;;  %v794_v32 = vrot.slane %v6613_v28, 1  ;;  %v6622_v35 = vld [vmem:[#allocation2 + $0x38] sm:$0xff]  ;;  %v859_v58 = vrot.slane %v6613_v28, 2  ;;  %5783 = vmatprep.subr.msk.bf16.mxu0 %vm837_vm2, %v6188_v6  ;;  %5384 = vmatpush3.bf16.msra.mxu1 %v1056_v20  ;;  %673 = vst.msk [vmem:[#allocation3] sm:$0xff] %vm672_vm6, %v6364_v3 }
  0x2e   : > { %v5830_v21 = vpack.i.bf16 %v840_v18, %v838_v12  ;;  %v788_v33 = vrot.slane %v6615_v29, 1  ;;  %v841_v34 = vrot.slane %v6615_v29, 2  ;;  %v6624_v36 = vld [vmem:[#allocation2 + $0x50] sm:$0xff]  ;;  %v789_v37 = vrot.slane %v6622_v35, 1  ;;  %v6629_v40 = vld [vmem:[#allocation2 + $0x68] sm:$0xff]  ;;  %v762_v20 = vld [vmem:[#allocation2 + $0x78] sm:$0xff] }
  0x2f   : > { %v790_v38 = vrot.slane %v6624_v36, 1  ;;  %v847_v39 = vrot.slane %v6624_v36, 2  ;;  %v5850_v42 = vpack.i.bf16 %v794_v32, %v793_v31  ;;  %v6632_v45 = vld [vmem:[#allocation2 + $0x80] sm:$0xff]  ;;  %v791_v53 = vrot.slane %v6629_v40, 1  ;;  %674 = vst.msk [vmem:[#allocation3 + $0x8] sm:$0xff] %vm672_vm6, %v6364_v3  ;;  %675 = vst.msk [vmem:[#allocation3 + $0x10] sm:$0xff] %vm672_vm6, %v6364_v3 }
  0x30   : > { %5831 = vrot.lane.b32.xlu1 %v5830_v21, %s6365_s18  ;;  %v5835_v43 = vpack.i.bf16 %v788_v33, %v787_v22  ;;  %v843_v44 = vsel %vm837_vm2, %v841_v34, %v842_v23  ;;  %v792_v54 = vrot.slane %v6632_v45, 1  ;;  %v853_v56 = vrot.slane %v6632_v45, 2  ;;  %v6646_v63 = vld [vmem:[#allocation2 + $0xc8] sm:$0xff]  ;;  %677 = vst.msk [vmem:[#allocation3 + $0xd8] sm:$0xff] %vm672_vm6, %v6364_v3  ;;  %678 = vst.msk [vmem:[#allocation3 + $0xe0] sm:$0xff] %vm672_vm6, %v6364_v3  ;;  %s8017_s25 = smov 64  }
  0x31   : > { %v5855_v51 = vpack.i.bf16 %v843_v44, %v841_v34  ;;  %v5840_v52 = vpack.i.bf16 %v790_v38, %v789_v37  ;;  %v849_v55 = vsel %vm837_vm2, %v847_v39, %v848_v30  ;;  %v844_v57 = vrot.slane %v6622_v35, 2  ;;  %679 = vst.msk [vmem:[#allocation3 + $0xe8] sm:$0xff] %vm672_vm6, %v6364_v3  ;;  %701 = vst.msk [vmem:[#allocation4] sm:$0xff] %vm672_vm6, %v6364_v3 }
  0x32   : > { %5836 = vrot.lane.b32.xlu0 %v5835_v43, %s6366_s4  ;;  %v5865_v60 = vpack.i.bf16 %v849_v55, %v847_v39  ;;  %v5845_v61 = vpack.i.bf16 %v792_v54, %v791_v53  ;;  %v850_v62 = vrot.slane %v6629_v40, 2  ;;  %v855_v0 = vsel %vm837_vm2, %v853_v56, %v854_v41  ;;  %v747_v39 = vld [vmem:[#allocation2] sm:$0xff]  ;;  %v750_v43 = vld [vmem:[#allocation2 + $0x18] sm:$0xff]  ;;  %702 = vst.msk [vmem:[#allocation4 + $0x8] sm:$0xff] %vm672_vm6, %v6364_v3 }
  0x33   : > { %v846_v1 = vsel %vm837_vm2, %v844_v57, %v845_v46  ;;  %v5875_v7 = vpack.i.bf16 %v855_v0, %v853_v56  ;;  %v856_v9 = vrot.slane %v6611_v27, 2  ;;  %v862_v11 = vrot.slane %v6646_v63, 2  ;;  %703 = vst.msk [vmem:[#allocation4 + $0x10] sm:$0xff] %vm672_vm6, %v6364_v3  ;;  %705 = vst.msk [vmem:[#allocation4 + $0xd8] sm:$0xff] %vm672_vm6, %v6364_v3 }
  0x34   : > { %5851 = vrot.lane.b32.xlu1 %v5850_v42, %s6366_s4  ;;  %v5860_v8 = vpack.i.bf16 %v846_v1, %v844_v57  ;;  %v861_v12 = vsel %vm837_vm2, %v859_v58, %v860_v47  ;;  %v852_v13 = vsel %vm837_vm2, %v850_v62, %v851_v48  ;;  %v796_v14 = vrot.slane %v6650_v2, 1  ;;  %v768_v47 = vld [vmem:[#allocation2 + $0xa8] sm:$0xff]  ;;  %v753_v1 = vld [vmem:[#allocation2 + $0x30] sm:$0xff]  ;;  %706 = vst.msk [vmem:[#allocation4 + $0xe0] sm:$0xff] %vm672_vm6, %v6364_v3 }
  0x35   : > { %v5885_v17 = vpack.i.bf16 %v861_v12, %v859_v58  ;;  %v5870_v18 = vpack.i.bf16 %v852_v13, %v850_v62  ;;  %v858_v21 = vsel %vm837_vm2, %v856_v9, %v857_v49  ;;  %v864_v22 = vsel %vm837_vm2, %v862_v11, %v863_v59  ;;  %v756_v58 = vld [vmem:[#allocation2 + $0x48] sm:$0xff]  ;;  %707 = vst.msk [vmem:[#allocation4 + $0xe8] sm:$0xff] %vm672_vm6, %v6364_v3 }
  0x36   : > { %5841 = vrot.lane.b32.xlu0 %v5840_v52, %s6366_s4  ;;  %v5880_v23 = vpack.i.bf16 %v858_v21, %v856_v9  ;;  %v795_v24 = vrot.slane %v6646_v63, 1  ;;  %v5895_v25 = vpack.i.bf16 %v864_v22, %v862_v11  ;;  %v866_v26 = vrot.slane %v776_v16, 2  ;;  %692 = vst.msk [vmem:[#allocation3 + $0x28] sm:$0x1] %vm680_vm7, %v6364_v3  ;;  %681 = vst.msk [vmem:[#allocation3 + $0x7] sm:$0x1] %vm680_vm7, %v6364_v3 }
  0x37   : > { %682 = vst.msk [vmem:[#allocation3 + $0x1f] sm:$0x1] %vm680_vm7, %v6364_v3  ;;  %683 = vst.msk [vmem:[#allocation3 + $0x37] sm:$0x1] %vm680_vm7, %v6364_v3 }
  0x38   : > { %5856 = vrot.lane.b32.xlu1 %v5855_v51, %s6365_s18  ;;  %v5890_v30 = vpack.i.bf16 %v796_v14, %v795_v24  ;;  %v867_v31 = vsel %vm837_vm2, %v865_v19, %v866_v26  ;;  %684 = vst.msk [vmem:[#allocation3 + $0x4f] sm:$0x1] %vm680_vm7, %v6364_v3  ;;  %685 = vst.msk [vmem:[#allocation3 + $0x67] sm:$0x1] %vm680_vm7, %v6364_v3 }
  0x39   : > { %v5900_v32 = vpack.i.bf16 %v867_v31, %v865_v19  ;;  %v759_v19 = vld [vmem:[#allocation2 + $0x60] sm:$0xff]  ;;  %686 = vst.msk [vmem:[#allocation3 + $0x7f] sm:$0x1] %vm680_vm7, %v6364_v3  ;;  %687 = vst.msk [vmem:[#allocation3 + $0x97] sm:$0x1] %vm680_vm7, %v6364_v3 }
  0x3a   : > { %5846 = vrot.lane.b32.xlu0 %v5845_v61, %s6366_s4  ;;  %688 = vst.msk [vmem:[#allocation3 + $0xaf] sm:$0x1] %vm680_vm7, %v6364_v3  ;;  %689 = vst.msk [vmem:[#allocation3 + $0xc7] sm:$0x1] %vm680_vm7, %v6364_v3 }
  0x3b   : > { %690 = vst.msk [vmem:[#allocation3 + $0xdf] sm:$0x1] %vm680_vm7, %v6364_v3  ;;  %691 = vst.msk [vmem:[#allocation3 + $0x10] sm:$0x1] %vm680_vm7, %v6364_v3 }
  0x3c   : > { %5866 = vrot.lane.b32.xlu1 %v5865_v60, %s6365_s18  ;;  %693 = vst.msk [vmem:[#allocation3 + $0x40] sm:$0x1] %vm680_vm7, %v6364_v3  ;;  %694 = vst.msk [vmem:[#allocation3 + $0x58] sm:$0x1] %vm680_vm7, %v6364_v3 }
  0x3d   : > { %695 = vst.msk [vmem:[#allocation3 + $0x70] sm:$0x1] %vm680_vm7, %v6364_v3  ;;  %696 = vst.msk [vmem:[#allocation3 + $0x88] sm:$0x1] %vm680_vm7, %v6364_v3 }
  0x3e   : > { %5861 = vrot.lane.b32.xlu0 %v5860_v8, %s6365_s18  ;;  %697 = vst.msk [vmem:[#allocation3 + $0xa0] sm:$0x1] %vm680_vm7, %v6364_v3  ;;  %698 = vst.msk [vmem:[#allocation3 + $0xb8] sm:$0x1] %vm680_vm7, %v6364_v3 }
  0x3f   : > { %699 = vst.msk [vmem:[#allocation3 + $0xd0] sm:$0x1] %vm680_vm7, %v6364_v3  ;;  %700 = vst.msk [vmem:[#allocation3 + $0xe8] sm:$0x1] %vm680_vm7, %v6364_v3 }
  0x40   : > { %5876 = vrot.lane.b32.xlu1 %v5875_v7, %s6365_s18  ;;  %708 = vst.msk [vmem:[#allocation4 + $0x7] sm:$0x1] %vm680_vm7, %v6364_v3  ;;  %709 = vst.msk [vmem:[#allocation4 + $0x1f] sm:$0x1] %vm680_vm7, %v6364_v3 }
  0x41   : > { %710 = vst.msk [vmem:[#allocation4 + $0x37] sm:$0x1] %vm680_vm7, %v6364_v3  ;;  %711 = vst.msk [vmem:[#allocation4 + $0x4f] sm:$0x1] %vm680_vm7, %v6364_v3 }
  0x42   : > { %5871 = vrot.lane.b32.xlu0 %v5870_v18, %s6365_s18  ;;  %712 = vst.msk [vmem:[#allocation4 + $0x67] sm:$0x1] %vm680_vm7, %v6364_v3  ;;  %713 = vst.msk [vmem:[#allocation4 + $0x7f] sm:$0x1] %vm680_vm7, %v6364_v3 }
  0x43   : > { %714 = vst.msk [vmem:[#allocation4 + $0x97] sm:$0x1] %vm680_vm7, %v6364_v3  ;;  %715 = vst.msk [vmem:[#allocation4 + $0xaf] sm:$0x1] %vm680_vm7, %v6364_v3 }
  0x44   : > { %5886 = vrot.lane.b32.xlu1 %v5885_v17, %s6365_s18  ;;  %716 = vst.msk [vmem:[#allocation4 + $0xc7] sm:$0x1] %vm680_vm7, %v6364_v3  ;;  %717 = vst.msk [vmem:[#allocation4 + $0xdf] sm:$0x1] %vm680_vm7, %v6364_v3 }
  0x45   : > { %718 = vst.msk [vmem:[#allocation4 + $0x10] sm:$0x1] %vm680_vm7, %v6364_v3  ;;  %719 = vst.msk [vmem:[#allocation4 + $0x28] sm:$0x1] %vm680_vm7, %v6364_v3 }
  0x46   : > { %5881 = vrot.lane.b32.xlu0 %v5880_v23, %s6365_s18  ;;  %720 = vst.msk [vmem:[#allocation4 + $0x40] sm:$0x1] %vm680_vm7, %v6364_v3  ;;  %721 = vst.msk [vmem:[#allocation4 + $0x58] sm:$0x1] %vm680_vm7, %v6364_v3 }
  0x47   : > { %722 = vst.msk [vmem:[#allocation4 + $0x70] sm:$0x1] %vm680_vm7, %v6364_v3  ;;  %723 = vst.msk [vmem:[#allocation4 + $0x88] sm:$0x1] %vm680_vm7, %v6364_v3 }
  0x48   : > { %5896 = vrot.lane.b32.xlu1 %v5895_v25, %s6365_s18  ;;  %724 = vst.msk [vmem:[#allocation4 + $0xa0] sm:$0x1] %vm680_vm7, %v6364_v3  ;;  %725 = vst.msk [vmem:[#allocation4 + $0xb8] sm:$0x1] %vm680_vm7, %v6364_v3 }
  0x49   : > { %726 = vst.msk [vmem:[#allocation4 + $0xd0] sm:$0x1] %vm680_vm7, %v6364_v3  ;;  %727 = vst.msk [vmem:[#allocation4 + $0xe8] sm:$0x1] %vm680_vm7, %v6364_v3 }
  0x4a   : > { %5891 = vrot.lane.b32.xlu0 %v5890_v30, %s6366_s4 }
  0x4e   : > { %5901 = vrot.lane.b32.xlu0 %v5900_v32, %s6365_s18 }
  0xa2   : > { %v5832_v33 = vpop.permute.xlu1 %5831 }
  0xa3   : > { %v5834_v44 = vunpack.i.h.bf16 %v5832_v33  ;;  %v5833_v46 = vunpack.i.l.bf16 %v5832_v33 }
  0xa4   : > { %v5837_v37 = vpop.permute.xlu0 %5836 }
  0xa5   : > { %v5838_v38 = vunpack.i.l.bf16 %v5837_v37  ;;  %v5839_v41 = vunpack.i.h.bf16 %v5837_v37 }
  0xa6   : > { %v6686_v34 = vpop.permute.xlu1 %5851 }
  0xa7   : > { %v5854_v42 = vunpack.i.h.bf16 %v6686_v34  ;;  %v928_v51 = vsel %vm643_vm0, %v747_v39, %v5838_v38  ;;  %v930_v55 = vsel %vm643_vm0, %v750_v43, %v5839_v41  ;;  %v931_v56 = vsel %vm643_vm0, %v6615_v29, %v5839_v41 }
  0xa8   : > { %v5842_v49 = vpop.permute.xlu0 %5841  ;;  %v929_v57 = vsel %vm643_vm0, %v6599_v10, %v5838_v38  ;;  %v5853_v61 = vunpack.i.l.bf16 %v6686_v34  ;;  %v949_v10 = vsel %vm948_vm3, %v928_v51, %v5833_v46 }
  0xa9   : > { %v5844_v54 = vunpack.i.h.bf16 %v5842_v49  ;;  %v5843_v59 = vunpack.i.l.bf16 %v5842_v49  ;;  %v942_v60 = vsel %vm643_vm0, %v768_v47, %v5854_v42  ;;  %v943_v4 = vsel %vm643_vm0, %v6613_v28, %v5854_v42 }
  0xaa   : > { %v5857_v48 = vpop.permute.xlu1 %5856  ;;  %v950_v12 = vsel %vm948_vm3, %v929_v57, %v5834_v44  ;;  %v986_v21 = vrot.slane %v949_v10, 7 }
  0xab   : > { %v5859_v52 = vunpack.i.h.bf16 %v5857_v48  ;;  %v5858_v53 = vunpack.i.l.bf16 %v5857_v48  ;;  %v934_v8 = vsel %vm643_vm0, %v756_v58, %v5844_v54  ;;  %v935_v13 = vsel %vm643_vm0, %v6624_v36, %v5844_v54 }
  0xac   : > { %v5847_v7 = vpop.permute.xlu0 %5846  ;;  %v932_v14 = vsel %vm643_vm0, %v753_v1, %v5843_v59  ;;  %v933_v16 = vsel %vm643_vm0, %v6622_v35, %v5843_v59  ;;  %v987_v26 = vrot.slane %v950_v12, 7 }
  0xad   : > { %v951_v62 = vsel %vm948_vm3, %v930_v55, %v5858_v53  ;;  %v952_v0 = vsel %vm948_vm3, %v931_v56, %v5859_v52  ;;  %v5849_v15 = vunpack.i.h.bf16 %v5847_v7  ;;  %v5848_v28 = vunpack.i.l.bf16 %v5847_v7  ;;  %v765_v52 = vld [vmem:[#allocation2 + $0x90] sm:$0xff] }
  0xae   : > { %v989_v5 = vrot.slane %v951_v62, 7  ;;  %v990_v6 = vrot.slane %v952_v0, 7  ;;  %v5867_v29 = vpop.permute.xlu1 %5866  ;;  %v988_v48 = vsel %vm985_vm4, %v986_v21, %v987_v26  ;;  %v774_v21 = vld [vmem:[#allocation2 + $0xd8] sm:$0xff] }
  0xaf   : > { %v5869_v9 = vunpack.i.h.bf16 %v5867_v29  ;;  %v5868_v11 = vunpack.i.l.bf16 %v5867_v29  ;;  %v938_v35 = vsel %vm643_vm0, %v762_v20, %v5849_v15  ;;  %v939_v37 = vsel %vm643_vm0, %v6632_v45, %v5849_v15  ;;  %v771_v20 = vld [vmem:[#allocation2 + $0xc0] sm:$0xff] }
  0xb0   : > { %v5862_v25 = vpop.permute.xlu0 %5861  ;;  %v991_v36 = vsel %vm985_vm4, %v989_v5, %v990_v6  ;;  %v936_v38 = vsel %vm643_vm0, %v759_v19, %v5848_v28  ;;  %v937_v39 = vsel %vm643_vm0, %v6629_v40, %v5848_v28  ;;  %v940_v6 = vsel %vm643_vm0, %v765_v52, %v5853_v61  ;;  %v6190_v52 = vld [vmem:[%s8037_s22 + $0x30] sm:$0xff]  }
  0xb1   : > { %v955_v17 = vsel %vm948_vm3, %v934_v8, %v5868_v11  ;;  %v956_v18 = vsel %vm948_vm3, %v935_v13, %v5869_v9  ;;  %v5864_v32 = vunpack.i.h.bf16 %v5862_v25  ;;  %v5863_v33 = vunpack.i.l.bf16 %v5862_v25  ;;  %5413 = vmatprep.subr.bf16.mxu1 %v6190_v52 }
  0xb2   : > { %v995_v22 = vrot.slane %v955_v17, 7  ;;  %v996_v23 = vrot.slane %v956_v18, 7  ;;  %v5877_v24 = vpop.permute.xlu1 %5876  ;;  %v1018_v53 = vpack.c.bf16 %v991_v36, %v988_v48  ;;  %v941_v29 = vsel %vm643_vm0, %v6611_v27, %v5853_v61 }
  0xb3   : > { %v5879_v30 = vunpack.i.h.bf16 %v5877_v24  ;;  %v5878_v31 = vunpack.i.l.bf16 %v5877_v24  ;;  %v953_v43 = vsel %vm948_vm3, %v932_v14, %v5863_v33  ;;  %v954_v44 = vsel %vm948_vm3, %v933_v16, %v5864_v32 }
  0xb4   : > { %v992_v46 = vrot.slane %v953_v43, 7  ;;  %v993_v47 = vrot.slane %v954_v44, 7  ;;  %v5872_v51 = vpop.permute.xlu0 %5871  ;;  %v997_v45 = vsel %vm985_vm4, %v995_v22, %v996_v23  ;;  %5395 = vmatprep.mubr.msk.bf16.mxu0 %vm1042_vm5, %v1018_v53  ;;  %v6191_v53 = vld [vmem:[%s8037_s22 + $0x38] sm:$0xff]  }
  0xb5   : > { %v959_v41 = vsel %vm948_vm3, %v938_v35, %v5878_v31  ;;  %v960_v42 = vsel %vm948_vm3, %v939_v37, %v5879_v30  ;;  %v5874_v55 = vunpack.i.h.bf16 %v5872_v51  ;;  %v5873_v58 = vunpack.i.l.bf16 %v5872_v51 }
  0xb6   : > { %v5887_v49 = vpop.permute.xlu1 %5886  ;;  %v1001_v56 = vrot.slane %v959_v41, 7  ;;  %v1002_v57 = vrot.slane %v960_v42, 7  ;;  %v994_v59 = vsel %vm985_vm4, %v992_v46, %v993_v47 }
  0xb7   : > { %v5889_v54 = vunpack.i.h.bf16 %v5887_v49  ;;  %v5888_v40 = vunpack.i.l.bf16 %v5887_v49  ;;  %v958_v1 = vsel %vm948_vm3, %v937_v39, %v5874_v55  ;;  %v1019_v5 = vpack.c.bf16 %v997_v45, %v994_v59 }
  0xb8   : > { %v957_v7 = vsel %vm948_vm3, %v936_v38, %v5873_v58  ;;  %v999_v10 = vrot.slane %v958_v1, 7  ;;  %v5882_v8 = vpop.permute.xlu0 %5881  ;;  %v1030_v12 = vpack.c.bf16 %v994_v59, %v991_v36  ;;  %v1003_v34 = vsel %vm985_vm4, %v1001_v56, %v1002_v57  ;;  %v4903_v1 = vld [vmem:[%s8038_s24] ss:$0 sm:$0xff]  ;;  %s8042_s24 = smov 64  }
  0xb9   : > { %v964_v62 = vsel %vm948_vm3, %v943_v4, %v5889_v54  ;;  %v963_v0 = vsel %vm948_vm3, %v942_v60, %v5888_v40  ;;  %v998_v4 = vrot.slane %v957_v7, 7  ;;  %v5884_v11 = vunpack.i.h.bf16 %v5882_v8  ;;  %5396 = vmatmul.mubr.msk.bf16.vlgmr.msra.gmra.mrb[0].mxu0 %vm1042_vm5, %v1019_v5  ;;  %v6192_v54 = vld [vmem:[%s8037_s22 + $0x40] sm:$0xff]  }
  0xba   : > { %v5897_v9 = vpop.permute.xlu1 %5896  ;;  %v5883_v60 = vunpack.i.l.bf16 %v5882_v8  ;;  %v1008_v13 = vrot.slane %v964_v62, 7  ;;  %v1007_v14 = vrot.slane %v963_v0, 7  ;;  %5404 = vmatpush3.bf16.msra.mxu0 %v6690_v50  ;;  %5385 = vmatprep.mubr.msk.bf16.mxu1 %vm1042_vm5, %v1030_v12  ;;  %v4904_v7 = vld [vmem:[%s8039_s29] ss:$0 sm:$0xff]  ;;  %s8015_s29 = smov 32  }
  0xbb   : > { %v5899_v15 = vunpack.i.h.bf16 %v5897_v9  ;;  %v962_v27 = vsel %vm948_vm3, %v941_v29, %v5884_v11  ;;  %v1000_v28 = vsel %vm985_vm4, %v998_v4, %v999_v10  ;;  %v5898_v16 = vunpack.i.l.bf16 %v5897_v9 }
  0xbc   : > { %v961_v61 = vsel %vm948_vm3, %v940_v6, %v5883_v60  ;;  %v1005_v17 = vrot.slane %v962_v27, 7  ;;  %v1031_v19 = vpack.c.bf16 %v1000_v28, %v997_v45  ;;  %v5892_v22 = vpop.permute.xlu0 %5891  ;;  %v1020_v23 = vpack.c.bf16 %v1003_v34, %v1000_v28 }
  0xbd   : > { %v1004_v18 = vrot.slane %v961_v61, 7  ;;  %v5894_v50 = vunpack.i.h.bf16 %v5892_v22  ;;  %v5893_v24 = vunpack.i.l.bf16 %v5892_v22  ;;  %v1009_v26 = vsel %vm985_vm4, %v1007_v14, %v1008_v13 }
  0xbe   : > { %5386 = vmatmul.mubr.msk.bf16.vlgmr.msra.gmra.mrb[0].mxu1 %vm1042_vm5, %v1031_v19  ;;  %5399 = vmatprep.mubr.msk.bf16.mxu0 %vm1042_vm5, %v1020_v23 }
  0xbf   : > { %v1006_v25 = vsel %vm985_vm4, %v1004_v18, %v1005_v17  ;;  %v946_v36 = vsel %vm643_vm0, %v774_v21, %v5894_v50  ;;  %v947_v30 = vsel %vm643_vm0, %v6650_v2, %v5894_v50  ;;  %v944_v31 = vsel %vm643_vm0, %v771_v20, %v5893_v24  ;;  %5414 = vmatpush3.bf16.msra.mxu1 %v6190_v52  ;;  %v6194_v52 = vld [vmem:[%s8037_s22 + $0x50] sm:$0xff]  }
  0xc0   : > { %v945_v32 = vsel %vm643_vm0, %v6646_v63, %v5893_v24  ;;  %v965_v33 = vsel %vm948_vm3, %v944_v31, %v5898_v16  ;;  %v1032_v37 = vpack.c.bf16 %v1006_v25, %v1003_v34  ;;  %v1021_v38 = vpack.c.bf16 %v1009_v26, %v1006_v25  ;;  %v5902_v39 = vpop.permute.xlu0 %5901  ;;  %5415 = vmatprep.subr.bf16.mxu1 %v6191_v53 }
  0xc1   : > { %v966_v35 = vsel %vm948_vm3, %v945_v32, %v5899_v15  ;;  %v1026_v41 = vrot.slane %v965_v33, 7  ;;  %v5904_v43 = vunpack.i.h.bf16 %v5902_v39  ;;  %v5903_v44 = vunpack.i.l.bf16 %v5902_v39  ;;  %v1354_v33 = vld [vmem:[#allocation3 + $0x28] sm:$0xff] }
  0xc2   : > { %v1027_v42 = vrot.slane %v966_v35, 7  ;;  %5389 = vmatprep.mubr.msk.bf16.mxu1 %vm1042_vm5, %v1032_v37  ;;  %5400 = vmatmul.mubr.msk.bf16.gmra.mrb[4].mxu0 %vm1042_vm5, %v1021_v38 }
  0xc3   : > { %5405 = vmatprep.mubr.msk.bf16.mxu0 %vm1042_vm5, %v1019_v5  ;;  %v967_v46 = vsel %vm948_vm3, %v946_v36, %v5903_v44  ;;  %v968_v47 = vsel %vm948_vm3, %v947_v30, %v5904_v43  ;;  %5416 = vmatpush3.bf16.msra.mxu1 %v6191_v53  ;;  %v6193_v30 = vld [vmem:[%s8037_s22 + $0x48] sm:$0xff]   ;;  %v1443_v44 = vrot.slane %v1354_v33, 2 }
  0xc4   : > { %v1028_v2 = vsel %vm985_vm4, %v1026_v41, %v1027_v42  ;;  %v1210_v48 = vrot.slane %v967_v46, 7  ;;  %v1211_v49 = vrot.slane %v968_v47, 7  ;;  %5417 = vmatprep.subr.bf16.mxu1 %v6192_v54  ;;  %v1357_v41 = vld [vmem:[#allocation3 + $0x40] sm:$0xff] }
  0xc5   : > { %v1033_v63 = vpack.c.bf16 %v1028_v2, %v1009_v26 }
  0xc6   : > { %v1212_v51 = vsel %vm985_vm4, %v1210_v48, %v1211_v49 }
  0xc7   : > { %5390 = vmatmul.mubr.msk.bf16.gmra.mrb[4].mxu1 %vm1042_vm5, %v1033_v63  ;;  %v1214_v45 = vpack.c.bf16 %v1212_v51, %v1028_v2  ;;  %v1446_v51 = vrot.slane %v1357_v41, 2 }
  0xc8   : > { %5418 = vmatpush3.bf16.msra.mxu1 %v6192_v54 }
  0xc9   : > { %5419 = vmatprep.subr.bf16.mxu1 %v6193_v30 }
  0xca   : > { %5406 = vmatmul.mubr.msk.bf16.vlgmr.msra.gmra.mrb[0].mxu0 %vm1042_vm5, %v1020_v23 }
  0xcb   : > { %5409 = vmatprep.mubr.msk.bf16.mxu0 %vm1042_vm5, %v1021_v38 }
  0xcc   : > { %5420 = vmatpush3.bf16.msra.mxu1 %v6193_v30  ;;  %v6952_v30 = vld [vmem:[#allocation3 + $0x8] sm:$0xff] }
  0xcd   : > { %5421 = vmatprep.subr.bf16.mxu1 %v6194_v52 }
  0xd0   : > { %5422 = vmatpush3.bf16.msra.mxu1 %v6194_v52 }
  0xd2   : > { %5410 = vmatmul.mubr.msk.bf16.gmra.mrb[4].mxu0 %vm1042_vm5, %v1214_v45  ;;  %v1360_v45 = vld [vmem:[#allocation3 + $0x58] sm:$0xff] }
 0x191   : > { %v5387_v40 = vpop.f32.mrb[0].mxu1 }
 0x192   : > { %v1092_v55 = vpop.f32.mrb[1].mxu1 }
 0x193   : > { %v5388_v56 = vpop.f32.mrb[2].mxu1 }
 0x194   : > { %v1095_v57 = vpop.f32.mrb[3].mxu1 }
 0x19a   : > { %v5391_v58 = vpop.f32.mrb[4].mxu1 }
 0x19b   : > { %v1108_v59 = vpop.f32.mrb[5].mxu1 }
 0x19c   : > { %v5392_v62 = vpop.f32.mrb[6].mxu1 }
 0x19d   : > { %v1111_v0 = vpop.f32.mrb[7].mxu1  ;;  %v5407_v5 = vpop.f32.mrb[0].mxu0 }
 0x19e   : > { %v5701_v6 = vadd.f32 %v5407_v5, %v5387_v40  ;;  %v1263_v29 = vpop.f32.mrb[1].mxu0 }
 0x19f   : > { %v5702_v10 = vadd.f32 %v1263_v29, %v1092_v55  ;;  %v5408_v8 = vpop.f32.mrb[2].mxu0  ;;  %v1363_v55 = vld [vmem:[#allocation3 + $0x70] sm:$0xff] }
 0x1a0   : > { %v1310_v9 = vmul.f32 %v5701_v6, %v4903_v1  ;;  %v5703_v4 = vadd.f32 %v5408_v8, %v5388_v56  ;;  %v1266_v11 = vpop.f32.mrb[3].mxu0  ;;  %v1452_v6 = vrot.slane %v1363_v55, 2  ;;  %v6195_v8 = vld [vmem:[%s8037_s22 + $0x58] sm:$0xff]  }
 0x1a1   : > { %v1308_v60 = vmul.f32 %v5702_v10, %v4903_v1  ;;  %v5704_v12 = vadd.f32 %v1266_v11, %v1095_v57  ;;  %v1366_v10 = vld [vmem:[#allocation3 + $0x88] sm:$0xff]  ;;  %5423 = vmatprep.subr.bf16.mxu1 %v6195_v8 }
 0x1a2   : > { %v1324_v13 = vadd.f32 %v4904_v7, %v1310_v9  ;;  %v1311_v14 = vmul.f32 %v5703_v4, %v4903_v1  ;;  %5424 = vmatpush3.bf16.msra.mxu1 %v6195_v8 }
 0x1a3   : > { %v1322_v15 = vadd.f32 %v4904_v7, %v1308_v60  ;;  %v1309_v34 = vmul.f32 %v5704_v12, %v4903_v1 }
 0x1a4   : > { %v1332_v27 = vmax.f32 %v1324_v13, 0.0  ;;  %v1325_v61 = vadd.f32 %v4904_v7, %v1311_v14  ;;  %v1455_v14 = vrot.slane %v1366_v10, 2  ;;  %v1355_v10 = vld [vmem:[#allocation3 + $0x30] sm:$0xff] }
 0x1a5   : > { %v1330_v28 = vmax.f32 %v1322_v15, 0.0  ;;  %v1323_v16 = vadd.f32 %v4904_v7, %v1309_v34  ;;  %v5411_v17 = vpop.f32.mrb[4].mxu0  ;;  %v6936_v34 = vld [vmem:[%s8037_s22] sm:$0xff]  }
 0x1a6   : > { %1341 = vst.msk [vmem:[#allocation3 + $0x50] sm:$0xff] %vm672_vm6, %v1332_v27  ;;  %v1333_v18 = vmax.f32 %v1325_v61, 0.0  ;;  %v5705_v19 = vadd.f32 %v5411_v17, %v5391_v58  ;;  %v1279_v20 = vpop.f32.mrb[5].mxu0  ;;  %v1369_v61 = vld [vmem:[#allocation3 + $0xa0] sm:$0xff]  ;;  %5433 = vmatprep.subr.bf16.mxu1 %v6936_v34 }
 0x1a7   : > { %1339 = vst.msk [vmem:[#allocation3 + $0x20] sm:$0xff] %vm672_vm6, %v1330_v28  ;;  %v1331_v21 = vmax.f32 %v1323_v16, 0.0  ;;  %v5706_v22 = vadd.f32 %v1279_v20, %v1108_v59  ;;  %v5412_v23 = vpop.f32.mrb[6].mxu0 }
 0x1a8   : > { %1342 = vst.msk [vmem:[#allocation3 + $0x68] sm:$0xff] %vm672_vm6, %v1333_v18  ;;  %v1314_v50 = vmul.f32 %v5705_v19, %v4903_v1  ;;  %v5707_v24 = vadd.f32 %v5412_v23, %v5392_v62  ;;  %v1282_v25 = vpop.f32.mrb[7].mxu0 }
 0x1a9   : > { %1340 = vst.msk [vmem:[#allocation3 + $0x38] sm:$0xff] %vm672_vm6, %v1331_v21  ;;  %v1312_v26 = vmul.f32 %v5706_v22, %v4903_v1  ;;  %v5708_v36 = vadd.f32 %v1282_v25, %v1111_v0  ;;  %v1449_v0 = vrot.slane %v1360_v45, 2  ;;  %v1458_v21 = vrot.slane %v1369_v61, 2  ;;  %v1372_v22 = vld [vmem:[#allocation3 + $0xb8] sm:$0xff] }
 0x1aa   : > { %v1328_v31 = vadd.f32 %v4904_v7, %v1314_v50  ;;  %v1315_v32 = vmul.f32 %v5707_v24, %v4903_v1  ;;  %v1375_v50 = vld [vmem:[#allocation3 + $0xd0] sm:$0xff] }
 0x1ab   : > { %v1326_v35 = vadd.f32 %v4904_v7, %v1312_v26  ;;  %v1313_v37 = vmul.f32 %v5708_v36, %v4903_v1  ;;  %v1461_v36 = vrot.slane %v1372_v22, 2 }
 0x1ac   : > { %v1336_v38 = vmax.f32 %v1328_v31, 0.0  ;;  %v1329_v39 = vadd.f32 %v4904_v7, %v1315_v32  ;;  %v1351_v31 = vld [vmem:[#allocation3 + $0x10] sm:$0xff] }
 0x1ad   : > { %v1334_v42 = vmax.f32 %v1326_v35, 0.0  ;;  %v1327_v43 = vadd.f32 %v4904_v7, %v1313_v37  ;;  %v6896_v2 = vld [vmem:[#allocation3 + $0x50] sm:$0xff]  ;;  %v1464_v35 = vrot.slane %v1375_v50, 2  ;;  %v1440_v41 = vrot.slane %v1351_v31, 2 }
 0x1ae   : > { %1345 = vst.msk [vmem:[#allocation3 + $0xb0] sm:$0xff] %vm672_vm6, %v1336_v38  ;;  %v1337_v63 = vmax.f32 %v1329_v39, 0.0  ;;  %v6899_v46 = vld [vmem:[#allocation3 + $0x20] sm:$0xff]  ;;  %v1392_v53 = vrot.slane %v6896_v2, 1  ;;  %v1448_v29 = vrot.slane %v6896_v2, 2  ;;  %v1439_v39 = vrot.slane %v6952_v30, 2 }
 0x1af   : > { %1343 = vst.msk [vmem:[#allocation3 + $0x80] sm:$0xff] %vm672_vm6, %v1334_v42  ;;  %v1335_v47 = vmax.f32 %v1327_v43, 0.0  ;;  %v1442_v48 = vrot.slane %v6899_v46, 2  ;;  %v6903_v49 = vld [vmem:[#allocation3 + $0x68] sm:$0xff]  ;;  %v1390_v7 = vrot.slane %v6899_v46, 1 }
 0x1b0   : > { %1346 = vst.msk [vmem:[#allocation3 + $0xc8] sm:$0xff] %vm672_vm6, %v1337_v63  ;;  %v1393_v54 = vrot.slane %v6903_v49, 1  ;;  %v6911_v40 = vld [vmem:[#allocation3 + $0x38] sm:$0xff]  ;;  %v1451_v5 = vrot.slane %v6903_v49, 2  ;;  %v1450_v12 = vsel %vm837_vm2, %v1448_v29, %v1449_v0  ;;  %v1378_v63 = vld [vmem:[#allocation3 + $0xe8] sm:$0xff] }
 0x1b1   : > { %1344 = vst.msk [vmem:[#allocation3 + $0x98] sm:$0xff] %vm672_vm6, %v1335_v47  ;;  %v1444_v56 = vsel %vm837_vm2, %v1442_v48, %v1443_v44  ;;  %v1445_v57 = vrot.slane %v6911_v40, 2  ;;  %v1391_v62 = vrot.slane %v6911_v40, 1  ;;  %v5920_v17 = vpack.i.bf16 %v1450_v12, %v1448_v29  ;;  %v6961_v44 = vld [vmem:[#allocation3 + $0xe0] sm:$0xff] }
 0x1b2   : > { %v5910_v58 = vpack.i.bf16 %v1444_v56, %v1442_v48  ;;  %v5905_v59 = vpack.i.bf16 %v1393_v54, %v1392_v53  ;;  %v1453_v60 = vsel %vm837_vm2, %v1451_v5, %v1452_v6  ;;  %v1466_v45 = vrot.slane %v6961_v44, 2 }
 0x1b3   : > { %v1447_v1 = vsel %vm837_vm2, %v1445_v57, %v1446_v51  ;;  %v5915_v4 = vpack.i.bf16 %v1391_v62, %v1390_v7  ;;  %v5930_v16 = vpack.i.bf16 %v1453_v60, %v1451_v5  ;;  %v1441_v51 = vsel %vm837_vm2, %v1439_v39, %v1440_v41  ;;  %v1361_v5 = vld [vmem:[#allocation3 + $0x60] sm:$0xff]  ;;  %v1352_v7 = vld [vmem:[#allocation3 + $0x18] sm:$0xff] }
 0x1b4   : > { %5911 = vrot.lane.b32.xlu1 %v5910_v58, %s8017_s25  ;;  %5906 = vrot.lane.b32.xlu0 %v5905_v59, %s8015_s29  ;;  %v5925_v9 = vpack.i.bf16 %v1447_v1, %v1445_v57  ;;  %v1467_v52 = vrot.slane %v1378_v63, 2  ;;  %v5965_v55 = vpack.i.bf16 %v1441_v51, %v1439_v39  ;;  %v1389_v56 = vrot.slane %v6952_v30, 1 }
 0x1b5   : > { %v6942_v28 = vld [vmem:[#allocation3 + $0xb0] sm:$0xff]  ;;  %v1398_v59 = vrot.slane %v6961_v44, 1 }
 0x1b6   : > { %v6926_v11 = vld [vmem:[#allocation3 + $0x80] sm:$0xff]  ;;  %v1396_v23 = vrot.slane %v6942_v28, 1  ;;  %v1460_v37 = vrot.slane %v6942_v28, 2  ;;  %v1468_v57 = vsel %vm837_vm2, %v1466_v45, %v1467_v52 }
 0x1b7   : > { %v1454_v13 = vrot.slane %v6926_v11, 2  ;;  %v6931_v15 = vld [vmem:[#allocation3 + $0xc8] sm:$0xff]  ;;  %v1394_v38 = vrot.slane %v6926_v11, 1  ;;  %v5970_v58 = vpack.i.bf16 %v1468_v57, %v1466_v45 }
 0x1b8   : > { %5926 = vrot.lane.b32.xlu0 %v5925_v9, %s8017_s25  ;;  %5916 = vrot.lane.b32.xlu1 %v5915_v4, %s8015_s29  ;;  %v6940_v27 = vld [vmem:[#allocation3 + $0x98] sm:$0xff]  ;;  %v1397_v18 = vrot.slane %v6931_v15, 1  ;;  %v1463_v33 = vrot.slane %v6931_v15, 2  ;;  %v1462_v48 = vsel %vm837_vm2, %v1460_v37, %v1461_v36 }
 0x1b9   : > { %v1456_v19 = vsel %vm837_vm2, %v1454_v13, %v1455_v14  ;;  %v1457_v20 = vrot.slane %v6940_v27, 2  ;;  %v1395_v26 = vrot.slane %v6940_v27, 1  ;;  %v5950_v54 = vpack.i.bf16 %v1462_v48, %v1460_v37 }
 0x1ba   : > { %v5940_v24 = vpack.i.bf16 %v1456_v19, %v1454_v13  ;;  %v5935_v25 = vpack.i.bf16 %v1397_v18, %v1396_v23  ;;  %v1465_v47 = vsel %vm837_vm2, %v1463_v33, %v1464_v35 }
 0x1bb   : > { %v1459_v32 = vsel %vm837_vm2, %v1457_v20, %v1458_v21  ;;  %v5945_v43 = vpack.i.bf16 %v1395_v26, %v1394_v38  ;;  %v5960_v53 = vpack.i.bf16 %v1465_v47, %v1463_v33  ;;  %v1358_v21 = vld [vmem:[#allocation3 + $0x48] sm:$0xff] }
 0x1bc   : > { %5931 = vrot.lane.b32.xlu0 %v5930_v16, %s8017_s25  ;;  %5921 = vrot.lane.b32.xlu1 %v5920_v17, %s8017_s25  ;;  %v5955_v42 = vpack.i.bf16 %v1459_v32, %v1457_v20 }
 0x1c0   : > { %5941 = vrot.lane.b32.xlu1 %v5940_v24, %s8017_s25  ;;  %5936 = vrot.lane.b32.xlu0 %v5935_v25, %s8015_s29 }
 0x1c4   : > { %5956 = vrot.lane.b32.xlu0 %v5955_v42, %s8017_s25  ;;  %5946 = vrot.lane.b32.xlu1 %v5945_v43, %s8015_s29 }
 0x1c8   : > { %5961 = vrot.lane.b32.xlu0 %v5960_v53, %s8017_s25  ;;  %5951 = vrot.lane.b32.xlu1 %v5950_v54, %s8017_s25 }
 0x1cc   : > { %5966 = vrot.lane.b32.xlu0 %v5965_v55, %s8017_s25  ;;  %1399 = vrot.lane.b32.xlu1 %v1389_v56, %s8015_s29 }
 0x1d0   : > { %5971 = vrot.lane.b32.xlu0 %v5970_v58, %s8017_s25  ;;  %1417 = vrot.lane.b32.xlu1 %v1398_v59, %s8015_s29  ;;  %v1373_v58 = vld [vmem:[#allocation3 + $0xc0] sm:$0xff]  ;;  %s5202_s25 = sshll.u32 %s6507_s14, 4 }
 0x1d1   : > { %s7950_s23 = scalar_lea.hbm %s8009_s19, %s5202_s25 }
 0x226   : > { %v5912_v62 = vpop.permute.xlu1 %5911  ;;  %v5907_v0 = vpop.permute.xlu0 %5906 }
 0x227   : > { %v5909_v1 = vunpack.i.h.bf16 %v5907_v0  ;;  %v5914_v6 = vunpack.i.h.bf16 %v5912_v62  ;;  %v5913_v13 = vunpack.i.l.bf16 %v5912_v62  ;;  %v5908_v16 = vunpack.i.l.bf16 %v5907_v0 }
 0x229   : > { %v1537_v14 = vsel %vm672_vm6, %v1361_v5, %v5909_v1  ;;  %v1538_v61 = vsel %vm672_vm6, %v6903_v49, %v5909_v1  ;;  %v1536_v38 = vsel %vm672_vm6, %v6896_v2, %v5908_v16 }
 0x22a   : > { %v5927_v29 = vpop.permute.xlu0 %5926  ;;  %v5917_v8 = vpop.permute.xlu1 %5916 }
 0x22b   : > { %v5929_v9 = vunpack.i.h.bf16 %v5927_v29  ;;  %v5928_v4 = vunpack.i.l.bf16 %v5927_v29  ;;  %v5919_v60 = vunpack.i.h.bf16 %v5917_v8  ;;  %v5918_v12 = vunpack.i.l.bf16 %v5917_v8  ;;  %v1367_v29 = vld [vmem:[#allocation3 + $0x90] sm:$0xff] }
 0x22d   : > { %v1533_v17 = vsel %vm672_vm6, %v1355_v10, %v5919_v60  ;;  %v1534_v18 = vsel %vm672_vm6, %v6911_v40, %v5919_v60  ;;  %v1531_v19 = vsel %vm672_vm6, %v1352_v7, %v5918_v12  ;;  %v1532_v20 = vsel %vm672_vm6, %v6899_v46, %v5918_v12  ;;  %v6197_v7 = vld [vmem:[%s8037_s22 + $0x8] sm:$0xff]  }
 0x22e   : > { %v1554_v22 = vsel %vm1549_vm8, %v1533_v17, %v5928_v4  ;;  %v1555_v23 = vsel %vm1549_vm8, %v1534_v18, %v5929_v9  ;;  %v1552_v50 = vsel %vm1549_vm8, %v1531_v19, %v5913_v13  ;;  %v1553_v49 = vsel %vm1549_vm8, %v1532_v20, %v5914_v6  ;;  %v5932_v24 = vpop.permute.xlu0 %5931  ;;  %v5922_v25 = vpop.permute.xlu1 %5921  ;;  %v1364_v6 = vld [vmem:[#allocation3 + $0x78] sm:$0xff]  ;;  %v1370_v20 = vld [vmem:[#allocation3 + $0xa8] sm:$0xff] }
 0x22f   : > { %v1592_v26 = vrot.slane %v1554_v22, 7  ;;  %v1593_v36 = vrot.slane %v1555_v23, 7  ;;  %v1589_v31 = vrot.slane %v1552_v50, 7  ;;  %v1590_v40 = vrot.slane %v1553_v49, 7 }
 0x230   : > { %v5934_v32 = vunpack.i.h.bf16 %v5932_v24  ;;  %v5933_v33 = vunpack.i.l.bf16 %v5932_v24  ;;  %v5924_v35 = vunpack.i.h.bf16 %v5922_v25  ;;  %v5923_v37 = vunpack.i.l.bf16 %v5922_v25 }
 0x231   : > { %v1535_v46 = vsel %vm672_vm6, %v1358_v21, %v5908_v16  ;;  %v6995_v39 = vsel %vm985_vm4, %v1589_v31, %v1590_v40  ;;  %v6998_v41 = vsel %vm985_vm4, %v1592_v26, %v1593_v36 }
 0x232   : > { %v1559_v42 = vsel %vm1549_vm8, %v1538_v61, %v5934_v32  ;;  %v1558_v43 = vsel %vm1549_vm8, %v1537_v14, %v5933_v33  ;;  %v1557_v63 = vsel %vm1549_vm8, %v1536_v38, %v5924_v35  ;;  %v1556_v47 = vsel %vm1549_vm8, %v1535_v46, %v5923_v37  ;;  %v5942_v48 = vpop.permute.xlu1 %5941  ;;  %v5937_v51 = vpop.permute.xlu0 %5936  ;;  %v1349_v33 = vld [vmem:[#allocation3] sm:$0xff] }
 0x233   : > { %v1599_v45 = vrot.slane %v1559_v42, 7  ;;  %v1598_v52 = vrot.slane %v1558_v43, 7  ;;  %v1596_v53 = vrot.slane %v1557_v63, 7  ;;  %v1595_v2 = vrot.slane %v1556_v47, 7 }
 0x234   : > { %v5939_v55 = vunpack.i.h.bf16 %v5937_v51  ;;  %v1640_v57 = vpack.c.bf16 %v6998_v41, %v6995_v39  ;;  %v5944_v10 = vunpack.i.h.bf16 %v5942_v48  ;;  %v5943_v4 = vunpack.i.l.bf16 %v5942_v48 }
 0x235   : > { %v7005_v54 = vsel %vm985_vm4, %v1598_v52, %v1599_v45  ;;  %v7008_v56 = vsel %vm985_vm4, %v1595_v2, %v1596_v53  ;;  %v5938_v13 = vunpack.i.l.bf16 %v5937_v51 }
 0x236   : > { %v5957_v59 = vpop.permute.xlu0 %5956  ;;  %v5947_v62 = vpop.permute.xlu1 %5946  ;;  %v1641_v0 = vpack.c.bf16 %v7005_v54, %v7008_v56  ;;  %5425 = vmatprep.mubr.msk.bf16.mxu1 %vm1693_vm9, %v1640_v57  ;;  %v1545_v60 = vsel %vm672_vm6, %v1373_v58, %v5939_v55  ;;  %v1546_v12 = vsel %vm672_vm6, %v6931_v15, %v5939_v55 }
 0x237   : > { %v5959_v1 = vunpack.i.h.bf16 %v5957_v59  ;;  %v5958_v5 = vunpack.i.l.bf16 %v5957_v59  ;;  %v5949_v8 = vunpack.i.h.bf16 %v5947_v62  ;;  %v5948_v9 = vunpack.i.l.bf16 %v5947_v62 }
 0x238   : > { %5426 = vmatmul.mubr.msk.bf16.vlgmr.msra.gmra.mrb[8].mxu1 %vm1693_vm9, %v1641_v0  ;;  %v1543_v31 = vsel %vm672_vm6, %v1370_v20, %v5938_v13  ;;  %v1544_v40 = vsel %vm672_vm6, %v6942_v28, %v5938_v13  ;;  %v6199_v28 = vld [vmem:[%s8037_s22 + $0x18] sm:$0xff]   ;;  %v1376_v13 = vld [vmem:[#allocation3 + $0xd8] sm:$0xff] }
 0x239   : > { %v1541_v14 = vsel %vm672_vm6, %v1367_v29, %v5949_v8  ;;  %v1542_v61 = vsel %vm672_vm6, %v6940_v27, %v5949_v8  ;;  %v1539_v16 = vsel %vm672_vm6, %v1364_v6, %v5948_v9  ;;  %v1540_v17 = vsel %vm672_vm6, %v6926_v11, %v5948_v9  ;;  %5434 = vmatpush3.bf16.msra.mxu1 %v6936_v34  ;;  %v6198_v27 = vld [vmem:[%s8037_s22 + $0x10] sm:$0xff]   ;;  %v6202_v8 = vld [vmem:[%s8037_s22 + $0x60] sm:$0xff]  }
 0x23a   : > { %v5962_v18 = vpop.permute.xlu0 %5961  ;;  %v5952_v19 = vpop.permute.xlu1 %5951  ;;  %v1562_v15 = vsel %vm1549_vm8, %v1541_v14, %v5958_v5  ;;  %v1563_v21 = vsel %vm1549_vm8, %v1542_v61, %v5959_v1  ;;  %v1560_v22 = vsel %vm1549_vm8, %v1539_v16, %v5943_v4  ;;  %v1561_v23 = vsel %vm1549_vm8, %v1540_v17, %v5944_v10  ;;  %5435 = vmatprep.subr.bf16.mxu1 %v6197_v7  ;;  %v6200_v1 = vld [vmem:[%s8037_s22 + $0x20] sm:$0xff]   ;;  %v6201_v10 = vld [vmem:[%s8037_s22 + $0x28] sm:$0xff]  }
 0x23b   : > { %v1604_v50 = vrot.slane %v1562_v15, 7  ;;  %v1605_v11 = vrot.slane %v1563_v21, 7  ;;  %v1601_v49 = vrot.slane %v1560_v22, 7  ;;  %v1602_v34 = vrot.slane %v1561_v23, 7  ;;  %v6207_v61 = vld [vmem:[%s8037_s22 + $0x88] sm:$0xff]  }
 0x23c   : > { %v5964_v24 = vunpack.i.h.bf16 %v5962_v18  ;;  %v5963_v25 = vunpack.i.l.bf16 %v5962_v18  ;;  %v5954_v26 = vunpack.i.h.bf16 %v5952_v19  ;;  %v5953_v36 = vunpack.i.l.bf16 %v5952_v19 }
 0x23d   : > { %5436 = vmatpush3.bf16.msra.mxu1 %v6197_v7  ;;  %v1603_v37 = vsel %vm985_vm4, %v1601_v49, %v1602_v34  ;;  %v1606_v46 = vsel %vm985_vm4, %v1604_v50, %v1605_v11  ;;  %v1619_v9 = vpack.c.bf16 %v7008_v56, %v6998_v41  ;;  %v6205_v41 = vld [vmem:[%s8037_s22 + $0x78] sm:$0xff]   ;;  %v6209_v50 = vld [vmem:[%s8037_s22 + $0xc8] sm:$0xff]   ;;  %v6210_v11 = vld [vmem:[%s8037_s22 + $0xd0] sm:$0xff]  }
 0x23e   : > { %v5967_v32 = vpop.permute.xlu0 %5966  ;;  %v1400_v35 = vpop.permute.xlu1 %1399  ;;  %v1567_v38 = vsel %vm1549_vm8, %v1546_v12, %v5964_v24  ;;  %v1566_v42 = vsel %vm1549_vm8, %v1545_v60, %v5963_v25  ;;  %v1565_v43 = vsel %vm1549_vm8, %v1544_v40, %v5954_v26  ;;  %v1564_v63 = vsel %vm1549_vm8, %v1543_v31, %v5953_v36  ;;  %5437 = vmatprep.subr.bf16.mxu1 %v6198_v27  ;;  %v6204_v60 = vld [vmem:[%s8037_s22 + $0x70] sm:$0xff]   ;;  %v4959_v49 = vld [vmem:[%s8040_s5] ss:$0 sm:$0xff] }
 0x23f   : > { %v1637_v47 = vrot.slane %v1567_v38, 7  ;;  %v1636_v48 = vrot.slane %v1566_v42, 7  ;;  %v1608_v51 = vrot.slane %v1565_v43, 7  ;;  %v1607_v45 = vrot.slane %v1564_v63, 7  ;;  %v4960_v34 = vld [vmem:[%s8041_s6] ss:$0 sm:$0xff] }
 0x240   : > { %v5969_v52 = vunpack.i.h.bf16 %v5967_v32  ;;  %v5968_v53 = vunpack.i.l.bf16 %v5967_v32  ;;  %v1529_v2 = vsel %vm672_vm6, %v1349_v33, %v1400_v35  ;;  %v1530_v55 = vsel %vm672_vm6, %v6952_v30, %v1400_v35 }
 0x241   : > { %5438 = vmatpush3.bf16.msra.mxu1 %v6198_v27  ;;  %v1642_v57 = vpack.c.bf16 %v1606_v46, %v1603_v37  ;;  %v1609_v58 = vsel %vm985_vm4, %v1607_v45, %v1608_v51  ;;  %v1638_v59 = vsel %vm985_vm4, %v1636_v48, %v1637_v47  ;;  %v1620_v4 = vpack.c.bf16 %v1603_v37, %v7005_v54  ;;  %v6206_v54 = vld [vmem:[%s8037_s22 + $0x80] sm:$0xff]  }
 0x242   : > { %v1550_v62 = vsel %vm1549_vm8, %v1529_v2, %v5968_v53  ;;  %v1551_v0 = vsel %vm1549_vm8, %v1530_v55, %v5969_v52  ;;  %5439 = vmatprep.subr.bf16.mxu1 %v6199_v28  ;;  %v1643_v30 = vpack.c.bf16 %v1638_v59, %v1609_v58  ;;  %v1621_v12 = vpack.c.bf16 %v1609_v58, %v1606_v46  ;;  %v5972_v56 = vpop.permute.xlu0 %5971  ;;  %v1418_v14 = vpop.permute.xlu1 %1417  ;;  %v6211_v53 = vld [vmem:[%s8037_s22 + $0xd8] sm:$0xff]   ;;  %v2072_v58 = vld [vmem:[#allocation4 + $0x28] sm:$0xff] }
 0x243   : > { %v1586_v5 = vrot.slane %v1550_v62, 7  ;;  %v1587_v6 = vrot.slane %v1551_v0, 7  ;;  %5429 = vmatprep.mubr.msk.bf16.mxu1 %vm1693_vm9, %v1642_v57  ;;  %v5974_v16 = vunpack.i.h.bf16 %v5972_v56  ;;  %v5973_v17 = vunpack.i.l.bf16 %v5972_v56 }
 0x244   : > { %5430 = vmatmul.mubr.msk.bf16.gmra.mrb[12].mxu1 %vm1693_vm9, %v1643_v30  ;;  %v1547_v18 = vsel %vm672_vm6, %v1376_v13, %v1418_v14  ;;  %v1548_v19 = vsel %vm672_vm6, %v6961_v44, %v1418_v14  ;;  %v6208_v44 = vld [vmem:[%s8037_s22 + $0xc0] sm:$0xff]   ;;  %v2081_v14 = vld [vmem:[#allocation4 + $0x70] sm:$0xff] }
 0x245   : > { %5440 = vmatpush3.bf16.msra.mxu1 %v6199_v28  ;;  %v1588_v29 = vsel %vm985_vm4, %v1586_v5, %v1587_v6  ;;  %v1568_v20 = vsel %vm1549_vm8, %v1547_v18, %v5973_v17  ;;  %v1569_v15 = vsel %vm1549_vm8, %v1548_v19, %v5974_v16  ;;  %5473 = vmatprep.subr.bf16.mxu0 %v6208_v44  ;;  %v2075_v5 = vld [vmem:[#allocation4 + $0x40] sm:$0xff] }
 0x246   : > { %5441 = vmatprep.subr.bf16.mxu1 %v6200_v1  ;;  %v1618_v7 = vpack.c.bf16 %v6995_v39, %v1588_v29  ;;  %v6203_v39 = vld [vmem:[%s8037_s22 + $0x68] sm:$0xff]   ;;  %v1886_v21 = vrot.slane %v1568_v20, 7  ;;  %v1887_v22 = vrot.slane %v1569_v15, 7  ;;  %5474 = vmatpush3.bf16.msra.mxu0 %v6208_v44  ;;  %v2161_v29 = vrot.slane %v2072_v58, 2 }
 0x247   : > { %5475 = vmatprep.subr.bf16.mxu0 %v6209_v50 }
 0x248   : > { %5445 = vmatprep.mubr.msk.bf16.mxu1 %vm1693_vm9, %v1618_v7  ;;  %v1888_v23 = vsel %vm985_vm4, %v1886_v21, %v1887_v22  ;;  %v2170_v22 = vrot.slane %v2081_v14, 2 }
 0x249   : > { %5442 = vmatpush3.bf16.msra.mxu1 %v6200_v1  ;;  %v1890_v27 = vpack.c.bf16 %v1888_v23, %v1638_v59 }
 0x24a   : > { %5443 = vmatprep.subr.bf16.mxu1 %v6201_v10  ;;  %5476 = vmatpush3.bf16.msra.mxu0 %v6209_v50  ;;  %v2084_v50 = vld [vmem:[#allocation4 + $0x88] sm:$0xff] }
 0x24b   : > { %5477 = vmatprep.subr.bf16.mxu0 %v6210_v11 }
 0x24d   : > { %5444 = vmatpush3.bf16.msra.mxu1 %v6201_v10 }
 0x24e   : > { %5453 = vmatprep.subr.bf16.mxu1 %v6202_v8  ;;  %5478 = vmatpush3.bf16.msra.mxu0 %v6210_v11 }
 0x24f   : > { %5479 = vmatprep.subr.bf16.mxu0 %v6211_v53 }
 0x250   : > { %5446 = vmatmul.mubr.msk.bf16.vlgmr.msra.gmra.mrb[8].mxu1 %vm1693_vm9, %v1619_v9 }
 0x251   : > { %5449 = vmatprep.mubr.msk.bf16.mxu1 %vm1693_vm9, %v1620_v4  ;;  %5454 = vmatpush3.bf16.msra.mxu1 %v6202_v8 }
 0x252   : > { %5455 = vmatprep.subr.bf16.mxu1 %v6203_v39  ;;  %5480 = vmatpush3.bf16.msra.mxu0 %v6211_v53 }
 0x255   : > { %5456 = vmatpush3.bf16.msra.mxu1 %v6203_v39 }
 0x256   : > { %5457 = vmatprep.subr.bf16.mxu1 %v6204_v60 }
 0x258   : > { %5450 = vmatmul.mubr.msk.bf16.gmra.mrb[12].mxu1 %vm1693_vm9, %v1621_v12 }
 0x259   : > { %5458 = vmatpush3.bf16.msra.mxu1 %v6204_v60  ;;  %5465 = vmatprep.mubr.msk.bf16.mxu1 %vm1693_vm9, %v1619_v9  ;;  %v2164_v60 = vrot.slane %v2075_v5, 2 }
 0x25a   : > { %5459 = vmatprep.subr.bf16.mxu1 %v6205_v41 }
 0x25d   : > { %5460 = vmatpush3.bf16.msra.mxu1 %v6205_v41  ;;  %v6212_v41 = vld [vmem:[%s8037_s22 + $0xe0] sm:$0xff]  }
 0x25e   : > { %5461 = vmatprep.subr.bf16.mxu1 %v6206_v54  ;;  %5481 = vmatprep.subr.bf16.mxu0 %v6212_v41 }
 0x25f   : > { %5482 = vmatpush3.bf16.msra.mxu0 %v6212_v41 }
 0x261   : > { %5462 = vmatpush3.bf16.msra.mxu1 %v6206_v54 }
 0x262   : > { %5463 = vmatprep.subr.bf16.mxu1 %v6207_v61 }
 0x265   : > { %5464 = vmatpush3.bf16.msra.mxu1 %v6207_v61 }
 0x268   : > { %5466 = vmatmul.mubr.msk.bf16.vlgmr.msra.gmra.mrb[8].mxu1 %vm1693_vm9, %v1620_v4 }
 0x269   : > { %5469 = vmatprep.mubr.msk.bf16.mxu1 %vm1693_vm9, %v1621_v12  ;;  %v2078_v12 = vld [vmem:[#allocation4 + $0x58] sm:$0xff] }
 0x26a   : > { %v2167_v20 = vrot.slane %v2078_v12, 2 }
 0x270   : > { %5470 = vmatmul.mubr.msk.bf16.gmra.mrb[12].mxu1 %vm1693_vm9, %v1890_v27  ;;  %v6213_v27 = vld [vmem:[%s8037_s22 + $0xe8] sm:$0xff]  }
 0x271   : > { %5483 = vmatprep.subr.bf16.mxu0 %v6213_v27 }
 0x272   : > { %5484 = vmatpush3.bf16.msra.mxu0 %v6213_v27  ;;  %v2070_v27 = vld [vmem:[#allocation4 + $0x18] sm:$0xff] }
 0x33b   : > { %v5467_v24 = vpop.f32.mrb[8].mxu1 }
 0x33c   : > { %v2022_v25 = vmul.f32 %v5467_v24, %v4959_v49  ;;  %v1977_v26 = vpop.f32.mrb[9].mxu1 }
 0x33d   : > { %v2020_v36 = vmul.f32 %v4959_v49, %v1977_v26  ;;  %v5468_v31 = vpop.f32.mrb[10].mxu1 }
 0x33e   : > { %v2034_v40 = vadd.f32 %v4960_v34, %v2022_v25  ;;  %v2023_v32 = vmul.f32 %v5468_v31, %v4959_v49  ;;  %v1980_v33 = vpop.f32.mrb[11].mxu1 }
 0x33f   : > { %v2032_v35 = vadd.f32 %v4960_v34, %v2020_v36  ;;  %v2021_v37 = vmul.f32 %v4959_v49, %v1980_v33  ;;  %v2173_v36 = vrot.slane %v2084_v50, 2  ;;  %v2087_v33 = vld [vmem:[#allocation4 + $0xa0] sm:$0xff] }
 0x340   : > { %v2042_v46 = vmax.f32 %v2034_v40, 0.0  ;;  %v2035_v38 = vadd.f32 %v4960_v34, %v2023_v32  ;;  %v7162_v40 = vld [vmem:[%s8037_s22 + $0x90] sm:$0xff]  }
 0x341   : > { %v2040_v42 = vmax.f32 %v2032_v35, 0.0  ;;  %v2033_v43 = vadd.f32 %v4960_v34, %v2021_v37  ;;  %5493 = vmatprep.subr.bf16.mxu0 %v7162_v40 }
 0x342   : > { %2051 = vst.msk [vmem:[#allocation4 + $0x50] sm:$0xff] %vm672_vm6, %v2042_v46  ;;  %v2043_v63 = vmax.f32 %v2035_v38, 0.0 }
 0x343   : > { %2049 = vst.msk [vmem:[#allocation4 + $0x20] sm:$0xff] %vm672_vm6, %v2040_v42  ;;  %v2041_v28 = vmax.f32 %v2033_v43, 0.0  ;;  %v5471_v47 = vpop.f32.mrb[12].mxu1 }
 0x344   : > { %2052 = vst.msk [vmem:[#allocation4 + $0x68] sm:$0xff] %vm672_vm6, %v2043_v63  ;;  %v2026_v48 = vmul.f32 %v5471_v47, %v4959_v49  ;;  %v1993_v51 = vpop.f32.mrb[13].mxu1  ;;  %v2176_v63 = vrot.slane %v2087_v33, 2 }
 0x345   : > { %2050 = vst.msk [vmem:[#allocation4 + $0x38] sm:$0xff] %vm672_vm6, %v2041_v28  ;;  %v2024_v45 = vmul.f32 %v4959_v49, %v1993_v51  ;;  %v5472_v52 = vpop.f32.mrb[14].mxu1  ;;  %v2090_v28 = vld [vmem:[#allocation4 + $0xb8] sm:$0xff] }
 0x346   : > { %v2038_v2 = vadd.f32 %v4960_v34, %v2026_v48  ;;  %v2027_v55 = vmul.f32 %v5472_v52, %v4959_v49  ;;  %v1996_v57 = vpop.f32.mrb[15].mxu1  ;;  %v2093_v48 = vld [vmem:[#allocation4 + $0xd0] sm:$0xff]  ;;  %v2179_v53 = vrot.slane %v2090_v28, 2 }
 0x347   : > { %v2036_v59 = vadd.f32 %v4960_v34, %v2024_v45  ;;  %v2025_v62 = vmul.f32 %v4959_v49, %v1996_v57 }
 0x348   : > { %v2046_v0 = vmax.f32 %v2038_v2, 0.0  ;;  %v2039_v1 = vadd.f32 %v4960_v34, %v2027_v55  ;;  %v7178_v2 = vld [vmem:[#allocation4 + $0x8] sm:$0xff]  ;;  %v2069_v55 = vld [vmem:[#allocation4 + $0x10] sm:$0xff] }
 0x349   : > { %v2044_v6 = vmax.f32 %v2036_v59, 0.0  ;;  %v2037_v30 = vadd.f32 %v4960_v34, %v2025_v62  ;;  %v7122_v7 = vld [vmem:[#allocation4 + $0x50] sm:$0xff]  ;;  %v2182_v59 = vrot.slane %v2093_v48, 2  ;;  %v2158_v5 = vrot.slane %v2069_v55, 2 }
 0x34a   : > { %2055 = vst.msk [vmem:[#allocation4 + $0xb0] sm:$0xff] %vm672_vm6, %v2046_v0  ;;  %v2047_v10 = vmax.f32 %v2039_v1, 0.0  ;;  %v7125_v8 = vld [vmem:[#allocation4 + $0x20] sm:$0xff]  ;;  %v2110_v54 = vrot.slane %v7122_v7, 1  ;;  %v2166_v23 = vrot.slane %v7122_v7, 2  ;;  %v2157_v1 = vrot.slane %v7178_v2, 2 }
 0x34b   : > { %2053 = vst.msk [vmem:[#allocation4 + $0x80] sm:$0xff] %vm672_vm6, %v2044_v6  ;;  %v2045_v9 = vmax.f32 %v2037_v30, 0.0  ;;  %v2160_v39 = vrot.slane %v7125_v8, 2  ;;  %v7129_v4 = vld [vmem:[#allocation4 + $0x68] sm:$0xff]  ;;  %v2108_v44 = vrot.slane %v7125_v8, 1 }
 0x34c   : > { %2056 = vst.msk [vmem:[#allocation4 + $0xc8] sm:$0xff] %vm672_vm6, %v2047_v10  ;;  %v2111_v56 = vrot.slane %v7129_v4, 1  ;;  %v7137_v13 = vld [vmem:[#allocation4 + $0x38] sm:$0xff]  ;;  %v2169_v21 = vrot.slane %v7129_v4, 2  ;;  %v2168_v25 = vsel %vm837_vm2, %v2166_v23, %v2167_v20  ;;  %v2096_v10 = vld [vmem:[#allocation4 + $0xe8] sm:$0xff] }
 0x34d   : > { %2054 = vst.msk [vmem:[#allocation4 + $0x98] sm:$0xff] %vm672_vm6, %v2045_v9  ;;  %v2162_v61 = vsel %vm837_vm2, %v2160_v39, %v2161_v29  ;;  %v2163_v16 = vrot.slane %v7137_v13, 2  ;;  %v2109_v19 = vrot.slane %v7137_v13, 1  ;;  %v5990_v46 = vpack.i.bf16 %v2168_v25, %v2166_v23  ;;  %v7187_v29 = vld [vmem:[#allocation4 + $0xe0] sm:$0xff] }
 0x34e   : > { %v5980_v17 = vpack.i.bf16 %v2162_v61, %v2160_v39  ;;  %v5975_v18 = vpack.i.bf16 %v2111_v56, %v2110_v54  ;;  %v2171_v24 = vsel %vm837_vm2, %v2169_v21, %v2170_v22  ;;  %v2184_v12 = vrot.slane %v7187_v29, 2 }
 0x34f   : > { %v2165_v15 = vsel %vm837_vm2, %v2163_v16, %v2164_v60  ;;  %v5985_v49 = vpack.i.bf16 %v2109_v19, %v2108_v44  ;;  %v6000_v37 = vpack.i.bf16 %v2171_v24, %v2169_v21  ;;  %v2159_v60 = vsel %vm837_vm2, %v2157_v1, %v2158_v5  ;;  %v2079_v21 = vld [vmem:[#allocation4 + $0x60] sm:$0xff]  ;;  %v2073_v44 = vld [vmem:[#allocation4 + $0x30] sm:$0xff] }
 0x350   : > { %5981 = vrot.lane.b32.xlu1 %v5980_v17, %s8042_s24  ;;  %5976 = vrot.lane.b32.xlu0 %v5975_v18, %s8043_s2  ;;  %v5995_v11 = vpack.i.bf16 %v2165_v15, %v2163_v16  ;;  %v2185_v41 = vrot.slane %v2096_v10, 2  ;;  %v6035_v14 = vpack.i.bf16 %v2159_v60, %v2157_v1  ;;  %v2107_v61 = vrot.slane %v7178_v2, 1 }
 0x351   : > { %v7168_v35 = vld [vmem:[#allocation4 + $0xb0] sm:$0xff]  ;;  %v2116_v18 = vrot.slane %v7187_v29, 1 }
 0x352   : > { %v7152_v34 = vld [vmem:[#allocation4 + $0x80] sm:$0xff]  ;;  %v2114_v47 = vrot.slane %v7168_v35, 1  ;;  %v2178_v62 = vrot.slane %v7168_v35, 2  ;;  %v2186_v16 = vsel %vm837_vm2, %v2184_v12, %v2185_v41 }
 0x353   : > { %v2172_v26 = vrot.slane %v7152_v34, 2  ;;  %v7157_v31 = vld [vmem:[#allocation4 + $0xc8] sm:$0xff]  ;;  %v2112_v0 = vrot.slane %v7152_v34, 1  ;;  %v6040_v17 = vpack.i.bf16 %v2186_v16, %v2184_v12 }
 0x354   : > { %5996 = vrot.lane.b32.xlu0 %v5995_v11, %s8042_s24  ;;  %5986 = vrot.lane.b32.xlu1 %v5985_v49, %s8043_s2  ;;  %v7166_v32 = vld [vmem:[#allocation4 + $0x98] sm:$0xff]  ;;  %v2115_v38 = vrot.slane %v7157_v31, 1  ;;  %v2181_v58 = vrot.slane %v7157_v31, 2  ;;  %v2180_v39 = vsel %vm837_vm2, %v2178_v62, %v2179_v53 }
 0x355   : > { %v2174_v42 = vsel %vm837_vm2, %v2172_v26, %v2173_v36  ;;  %v2175_v43 = vrot.slane %v7166_v32, 2  ;;  %v2113_v52 = vrot.slane %v7166_v32, 1  ;;  %v6020_v56 = vpack.i.bf16 %v2180_v39, %v2178_v62 }
 0x356   : > { %v6010_v51 = vpack.i.bf16 %v2174_v42, %v2172_v26  ;;  %v6005_v45 = vpack.i.bf16 %v2115_v38, %v2114_v47  ;;  %v2183_v9 = vsel %vm837_vm2, %v2181_v58, %v2182_v59 }
 0x357   : > { %v2177_v57 = vsel %vm837_vm2, %v2175_v43, %v2176_v63  ;;  %v6015_v30 = vpack.i.bf16 %v2113_v52, %v2112_v0  ;;  %v6030_v54 = vpack.i.bf16 %v2183_v9, %v2181_v58  ;;  %v2076_v63 = vld [vmem:[#allocation4 + $0x48] sm:$0xff] }
 0x358   : > { %6001 = vrot.lane.b32.xlu0 %v6000_v37, %s8042_s24  ;;  %5991 = vrot.lane.b32.xlu1 %v5990_v46, %s8042_s24  ;;  %v6025_v6 = vpack.i.bf16 %v2177_v57, %v2175_v43 }
 0x35c   : > { %6011 = vrot.lane.b32.xlu1 %v6010_v51, %s8042_s24  ;;  %6006 = vrot.lane.b32.xlu0 %v6005_v45, %s8043_s2 }
 0x360   : > { %6026 = vrot.lane.b32.xlu0 %v6025_v6, %s8042_s24  ;;  %6016 = vrot.lane.b32.xlu1 %v6015_v30, %s8043_s2 }
 0x364   : > { %6031 = vrot.lane.b32.xlu0 %v6030_v54, %s8042_s24  ;;  %6021 = vrot.lane.b32.xlu1 %v6020_v56, %s8042_s24 }
 0x368   : > { %6036 = vrot.lane.b32.xlu0 %v6035_v14, %s8042_s24  ;;  %2117 = vrot.lane.b32.xlu1 %v2107_v61, %s8043_s2 }
 0x36c   : > { %6041 = vrot.lane.b32.xlu0 %v6040_v17, %s8042_s24  ;;  %2135 = vrot.lane.b32.xlu1 %v2116_v18, %s8043_s2  ;;  %v2091_v17 = vld [vmem:[#allocation4 + $0xc0] sm:$0xff] }
 0x3c2   : > { %v5982_v19 = vpop.permute.xlu1 %5981  ;;  %v5977_v20 = vpop.permute.xlu0 %5976 }
 0x3c3   : > { %v5979_v15 = vunpack.i.h.bf16 %v5977_v20  ;;  %v5984_v22 = vunpack.i.h.bf16 %v5982_v19  ;;  %v5983_v26 = vunpack.i.l.bf16 %v5982_v19  ;;  %v5978_v37 = vunpack.i.l.bf16 %v5977_v20 }
 0x3c5   : > { %v2255_v36 = vsel %vm672_vm6, %v2079_v21, %v5979_v15  ;;  %v2256_v33 = vsel %vm672_vm6, %v7129_v4, %v5979_v15  ;;  %v2254_v0 = vsel %vm672_vm6, %v7122_v7, %v5978_v37 }
 0x3c6   : > { %v5997_v23 = vpop.permute.xlu0 %5996  ;;  %v5987_v50 = vpop.permute.xlu1 %5986 }
 0x3c7   : > { %v5999_v11 = vunpack.i.h.bf16 %v5997_v23  ;;  %v5998_v49 = vunpack.i.l.bf16 %v5997_v23  ;;  %v5989_v24 = vunpack.i.h.bf16 %v5987_v50  ;;  %v5988_v25 = vunpack.i.l.bf16 %v5987_v50  ;;  %v2085_v23 = vld [vmem:[#allocation4 + $0x90] sm:$0xff] }
 0x3c9   : > { %v2251_v46 = vsel %vm672_vm6, %v2073_v44, %v5989_v24  ;;  %v2252_v38 = vsel %vm672_vm6, %v7137_v13, %v5989_v24  ;;  %v2249_v42 = vsel %vm672_vm6, %v2070_v27, %v5988_v25  ;;  %v2250_v43 = vsel %vm672_vm6, %v7125_v8, %v5988_v25  ;;  %v6215_v27 = vld [vmem:[%s8037_s22 + $0x98] sm:$0xff]  }
 0x3ca   : > { %v2271_v28 = vsel %vm1549_vm8, %v2251_v46, %v5998_v49  ;;  %v2272_v47 = vsel %vm1549_vm8, %v2252_v38, %v5999_v11  ;;  %v2269_v48 = vsel %vm1549_vm8, %v2249_v42, %v5983_v26  ;;  %v2270_v4 = vsel %vm1549_vm8, %v2250_v43, %v5984_v22  ;;  %v6002_v51 = vpop.permute.xlu0 %6001  ;;  %v5992_v45 = vpop.permute.xlu1 %5991  ;;  %v2082_v22 = vld [vmem:[#allocation4 + $0x78] sm:$0xff]  ;;  %v2088_v43 = vld [vmem:[#allocation4 + $0xa8] sm:$0xff] }
 0x3cb   : > { %v2309_v52 = vrot.slane %v2271_v28, 7  ;;  %v2310_v53 = vrot.slane %v2272_v47, 7  ;;  %v2306_v55 = vrot.slane %v2269_v48, 7  ;;  %v2307_v13 = vrot.slane %v2270_v4, 7 }
 0x3cc   : > { %v6004_v57 = vunpack.i.h.bf16 %v6002_v51  ;;  %v6003_v58 = vunpack.i.l.bf16 %v6002_v51  ;;  %v5994_v59 = vunpack.i.h.bf16 %v5992_v45  ;;  %v5993_v62 = vunpack.i.l.bf16 %v5992_v45 }
 0x3cd   : > { %v2253_v8 = vsel %vm672_vm6, %v2076_v63, %v5978_v37  ;;  %v7221_v1 = vsel %vm985_vm4, %v2306_v55, %v2307_v13  ;;  %v7224_v5 = vsel %vm985_vm4, %v2309_v52, %v2310_v53 }
 0x3ce   : > { %v2276_v6 = vsel %vm1549_vm8, %v2256_v33, %v6004_v57  ;;  %v2275_v30 = vsel %vm1549_vm8, %v2255_v36, %v6003_v58  ;;  %v2274_v10 = vsel %vm1549_vm8, %v2254_v0, %v5994_v59  ;;  %v2273_v9 = vsel %vm1549_vm8, %v2253_v8, %v5993_v62  ;;  %v6012_v39 = vpop.permute.xlu1 %6011  ;;  %v6007_v60 = vpop.permute.xlu0 %6006  ;;  %v2067_v58 = vld [vmem:[#allocation4] sm:$0xff] }
 0x3cf   : > { %v2316_v12 = vrot.slane %v2276_v6, 7  ;;  %v2315_v41 = vrot.slane %v2275_v30, 7  ;;  %v2313_v54 = vrot.slane %v2274_v10, 7  ;;  %v2312_v7 = vrot.slane %v2273_v9, 7 }
 0x3d0   : > { %v6009_v14 = vunpack.i.h.bf16 %v6007_v60  ;;  %v2358_v16 = vpack.c.bf16 %v7224_v5, %v7221_v1  ;;  %v6014_v44 = vunpack.i.h.bf16 %v6012_v39  ;;  %v6013_v49 = vunpack.i.l.bf16 %v6012_v39 }
 0x3d1   : > { %v7231_v56 = vsel %vm985_vm4, %v2315_v41, %v2316_v12  ;;  %v7234_v61 = vsel %vm985_vm4, %v2312_v7, %v2313_v54  ;;  %v6008_v26 = vunpack.i.l.bf16 %v6007_v60 }
 0x3d2   : > { %v6027_v18 = vpop.permute.xlu0 %6026  ;;  %v6017_v19 = vpop.permute.xlu1 %6016  ;;  %v2359_v20 = vpack.c.bf16 %v7231_v56, %v7234_v61  ;;  %5485 = vmatprep.mubr.msk.bf16.mxu0 %vm1693_vm9, %v2358_v16  ;;  %v2263_v24 = vsel %vm672_vm6, %v2091_v17, %v6009_v14  ;;  %v2264_v25 = vsel %vm672_vm6, %v7157_v31, %v6009_v14 }
 0x3d3   : > { %v6029_v15 = vunpack.i.h.bf16 %v6027_v18  ;;  %v6028_v21 = vunpack.i.l.bf16 %v6027_v18  ;;  %v6019_v50 = vunpack.i.h.bf16 %v6017_v19  ;;  %v6018_v11 = vunpack.i.l.bf16 %v6017_v19 }
 0x3d4   : > { %5486 = vmatmul.mubr.msk.bf16.vlgmr.msra.gmra.mrb[8].mxu0 %vm1693_vm9, %v2359_v20  ;;  %v2261_v55 = vsel %vm672_vm6, %v2088_v43, %v6008_v26  ;;  %v2262_v13 = vsel %vm672_vm6, %v7168_v35, %v6008_v26  ;;  %v6217_v35 = vld [vmem:[%s8037_s22 + $0xa8] sm:$0xff]   ;;  %v2094_v26 = vld [vmem:[#allocation4 + $0xd8] sm:$0xff] }
 0x3d5   : > { %v2259_v36 = vsel %vm672_vm6, %v2085_v23, %v6019_v50  ;;  %v2260_v33 = vsel %vm672_vm6, %v7166_v32, %v6019_v50  ;;  %v2257_v37 = vsel %vm672_vm6, %v2082_v22, %v6018_v11  ;;  %v2258_v46 = vsel %vm672_vm6, %v7152_v34, %v6018_v11  ;;  %5494 = vmatpush3.bf16.msra.mxu0 %v7162_v40  ;;  %v6216_v32 = vld [vmem:[%s8037_s22 + $0xa0] sm:$0xff]   ;;  %v6220_v50 = vld [vmem:[%s8037_s22 + $0xf0] sm:$0xff]  }
 0x3d6   : > { %v6032_v38 = vpop.permute.xlu0 %6031  ;;  %v6022_v42 = vpop.permute.xlu1 %6021  ;;  %v2279_v31 = vsel %vm1549_vm8, %v2259_v36, %v6028_v21  ;;  %v2280_v63 = vsel %vm1549_vm8, %v2260_v33, %v6029_v15  ;;  %v2277_v28 = vsel %vm1549_vm8, %v2257_v37, %v6013_v49  ;;  %v2278_v47 = vsel %vm1549_vm8, %v2258_v46, %v6014_v44  ;;  %5495 = vmatprep.subr.bf16.mxu0 %v6215_v27  ;;  %v6218_v15 = vld [vmem:[%s8037_s22 + $0xb0] sm:$0xff]   ;;  %v6219_v44 = vld [vmem:[%s8037_s22 + $0xb8] sm:$0xff]  }
 0x3d7   : > { %v2321_v48 = vrot.slane %v2279_v31, 7  ;;  %v2322_v34 = vrot.slane %v2280_v63, 7  ;;  %v2318_v4 = vrot.slane %v2277_v28, 7  ;;  %v2319_v40 = vrot.slane %v2278_v47, 7  ;;  %v6225_v33 = vld [vmem:[%s8037_s22 + $0x118] sm:$0xff]  }
 0x3d8   : > { %v6034_v51 = vunpack.i.h.bf16 %v6032_v38  ;;  %v6033_v45 = vunpack.i.l.bf16 %v6032_v38  ;;  %v6024_v52 = vunpack.i.h.bf16 %v6022_v42  ;;  %v6023_v53 = vunpack.i.l.bf16 %v6022_v42 }
 0x3d9   : > { %5496 = vmatpush3.bf16.msra.mxu0 %v6215_v27  ;;  %v2320_v62 = vsel %vm985_vm4, %v2318_v4, %v2319_v40  ;;  %v2323_v8 = vsel %vm985_vm4, %v2321_v48, %v2322_v34  ;;  %v2336_v11 = vpack.c.bf16 %v7234_v61, %v7224_v5  ;;  %v6223_v5 = vld [vmem:[%s8037_s22 + $0x108] sm:$0xff]   ;;  %v6227_v48 = vld [vmem:[%s8037_s22 + $0x158] sm:$0xff]   ;;  %v6228_v34 = vld [vmem:[%s8037_s22 + $0x160] sm:$0xff]  }
 0x3da   : > { %v6037_v57 = vpop.permute.xlu0 %6036  ;;  %v2118_v59 = vpop.permute.xlu1 %2117  ;;  %v2284_v0 = vsel %vm1549_vm8, %v2264_v25, %v6034_v51  ;;  %v2283_v6 = vsel %vm1549_vm8, %v2263_v24, %v6033_v45  ;;  %v2282_v30 = vsel %vm1549_vm8, %v2262_v13, %v6024_v52  ;;  %v2281_v10 = vsel %vm1549_vm8, %v2261_v55, %v6023_v53  ;;  %5497 = vmatprep.subr.bf16.mxu0 %v6216_v32  ;;  %v6222_v24 = vld [vmem:[%s8037_s22 + $0x100] sm:$0xff]  }
 0x3db   : > { %v2355_v9 = vrot.slane %v2284_v0, 7  ;;  %v2354_v39 = vrot.slane %v2283_v6, 7  ;;  %v2325_v60 = vrot.slane %v2282_v30, 7  ;;  %v2324_v12 = vrot.slane %v2281_v10, 7  ;;  %v5027_v4 = vld [vmem:[%s8040_s5 + $0x1] ss:$0 sm:$0xff] }
 0x3dc   : > { %v6039_v41 = vunpack.i.h.bf16 %v6037_v57  ;;  %v6038_v54 = vunpack.i.l.bf16 %v6037_v57  ;;  %v2247_v7 = vsel %vm672_vm6, %v2067_v58, %v2118_v59  ;;  %v2248_v14 = vsel %vm672_vm6, %v7178_v2, %v2118_v59  ;;  %v5028_v40 = vld [vmem:[%s8041_s6 + $0x1] ss:$0 sm:$0xff]  ;;  %v2057_v6 = vld [vmem:[#allocation3 + $0x20] sm:$0xff] }
 0x3dd   : > { %5498 = vmatpush3.bf16.msra.mxu0 %v6216_v32  ;;  %v2360_v16 = vpack.c.bf16 %v2323_v8, %v2320_v62  ;;  %v2326_v17 = vsel %vm985_vm4, %v2324_v12, %v2325_v60  ;;  %v2356_v18 = vsel %vm985_vm4, %v2354_v39, %v2355_v9  ;;  %v2337_v49 = vpack.c.bf16 %v2320_v62, %v7231_v56  ;;  %v6224_v56 = vld [vmem:[%s8037_s22 + $0x110] sm:$0xff]   ;;  %v2059_v59 = vld [vmem:[#allocation3 + $0x50] sm:$0xff]  ;;  %v2058_v12 = vld [vmem:[#allocation3 + $0x38] sm:$0xff] }
 0x3de   : > { %v2267_v19 = vsel %vm1549_vm8, %v2247_v7, %v6038_v54  ;;  %v2268_v20 = vsel %vm1549_vm8, %v2248_v14, %v6039_v41  ;;  %5499 = vmatprep.subr.bf16.mxu0 %v6217_v35  ;;  %v2361_v2 = vpack.c.bf16 %v2356_v18, %v2326_v17  ;;  %v2338_v25 = vpack.c.bf16 %v2326_v17, %v2323_v8  ;;  %v6042_v61 = vpop.permute.xlu0 %6041  ;;  %v2136_v36 = vpop.permute.xlu1 %2135 }
 0x3df   : > { %v2303_v21 = vrot.slane %v2267_v19, 7  ;;  %v2304_v22 = vrot.slane %v2268_v20, 7  ;;  %5489 = vmatprep.mubr.msk.bf16.mxu0 %vm1693_vm9, %v2360_v16  ;;  %v6044_v37 = vunpack.i.h.bf16 %v6042_v61  ;;  %v6043_v46 = vunpack.i.l.bf16 %v6042_v61 }
 0x3e0   : > { %5490 = vmatmul.mubr.msk.bf16.gmra.mrb[12].mxu0 %vm1693_vm9, %v2361_v2  ;;  %v2265_v38 = vsel %vm672_vm6, %v2094_v26, %v2136_v36  ;;  %v2266_v42 = vsel %vm672_vm6, %v7187_v29, %v2136_v36  ;;  %v6226_v29 = vld [vmem:[%s8037_s22 + $0x150] sm:$0xff]   ;;  %v2063_v2 = vld [vmem:[#allocation3 + $0xb0] sm:$0xff]  ;;  %v2062_v26 = vld [vmem:[#allocation3 + $0x98] sm:$0xff] }
 0x3e1   : > { %5500 = vmatpush3.bf16.msra.mxu0 %v6217_v35  ;;  %v2305_v23 = vsel %vm985_vm4, %v2303_v21, %v2304_v22  ;;  %v2285_v43 = vsel %vm1549_vm8, %v2265_v38, %v6043_v46  ;;  %v2286_v31 = vsel %vm1549_vm8, %v2266_v42, %v6044_v37  ;;  %5533 = vmatprep.subr.bf16.mxu1 %v6226_v29  ;;  %v2060_v35 = vld [vmem:[#allocation3 + $0x68] sm:$0xff]  ;;  %v2791_v36 = vld [vmem:[#allocation3 + $0x40] sm:$0xff] }
 0x3e2   : > { %5501 = vmatprep.subr.bf16.mxu0 %v6218_v15  ;;  %v2335_v27 = vpack.c.bf16 %v7221_v1, %v2305_v23  ;;  %v6221_v1 = vld [vmem:[%s8037_s22 + $0xf8] sm:$0xff]   ;;  %v2603_v63 = vrot.slane %v2285_v43, 7  ;;  %v2604_v28 = vrot.slane %v2286_v31, 7  ;;  %5534 = vmatpush3.bf16.msra.mxu1 %v6226_v29  ;;  %v6230_v42 = vld [vmem:[%s8037_s22 + $0x170] sm:$0xff]   ;;  %v2794_v29 = vld [vmem:[#allocation3 + $0x58] sm:$0xff] }
 0x3e3   : > { %5535 = vmatprep.subr.bf16.mxu1 %v6227_v48 }
 0x3e4   : > { %5505 = vmatprep.mubr.msk.bf16.mxu0 %vm1693_vm9, %v2335_v27  ;;  %v2605_v47 = vsel %vm985_vm4, %v2603_v63, %v2604_v28 }
 0x3e5   : > { %5502 = vmatpush3.bf16.msra.mxu0 %v6218_v15  ;;  %v2607_v32 = vpack.c.bf16 %v2605_v47, %v2356_v18 }
 0x3e6   : > { %5503 = vmatprep.subr.bf16.mxu0 %v6219_v44  ;;  %5536 = vmatpush3.bf16.msra.mxu1 %v6227_v48 }
 0x3e7   : > { %5537 = vmatprep.subr.bf16.mxu1 %v6228_v34 }
 0x3e9   : > { %5504 = vmatpush3.bf16.msra.mxu0 %v6219_v44  ;;  %v6229_v44 = vld [vmem:[%s8037_s22 + $0x168] sm:$0xff]  }
 0x3ea   : > { %5513 = vmatprep.subr.bf16.mxu0 %v6220_v50  ;;  %5538 = vmatpush3.bf16.msra.mxu1 %v6228_v34 }
 0x3eb   : > { %5539 = vmatprep.subr.bf16.mxu1 %v6229_v44 }
 0x3ec   : > { %5506 = vmatmul.mubr.msk.bf16.vlgmr.msra.gmra.mrb[8].mxu0 %vm1693_vm9, %v2336_v11 }
 0x3ed   : > { %5509 = vmatprep.mubr.msk.bf16.mxu0 %vm1693_vm9, %v2337_v49  ;;  %5514 = vmatpush3.bf16.msra.mxu0 %v6220_v50 }
 0x3ee   : > { %5515 = vmatprep.subr.bf16.mxu0 %v6221_v1  ;;  %5540 = vmatpush3.bf16.msra.mxu1 %v6229_v44 }
 0x3ef   : > { %5541 = vmatprep.subr.bf16.mxu1 %v6230_v42 }
 0x3f1   : > { %5516 = vmatpush3.bf16.msra.mxu0 %v6221_v1 }
 0x3f2   : > { %5517 = vmatprep.subr.bf16.mxu0 %v6222_v24  ;;  %5542 = vmatpush3.bf16.msra.mxu1 %v6230_v42  ;;  %v2812_v42 = vld [vmem:[#allocation3 + $0xe8] sm:$0xff] }
 0x3f4   : > { %5510 = vmatmul.mubr.msk.bf16.gmra.mrb[12].mxu0 %vm1693_vm9, %v2338_v25 }
 0x3f5   : > { %5518 = vmatpush3.bf16.msra.mxu0 %v6222_v24  ;;  %5525 = vmatprep.mubr.msk.bf16.mxu0 %vm1693_vm9, %v2336_v11  ;;  %v2061_v11 = vld [vmem:[#allocation3 + $0x80] sm:$0xff] }
 0x3f6   : > { %5519 = vmatprep.subr.bf16.mxu0 %v6223_v5 }
 0x3f9   : > { %5520 = vmatpush3.bf16.msra.mxu0 %v6223_v5 }
 0x3fa   : > { %5521 = vmatprep.subr.bf16.mxu0 %v6224_v56 }
 0x3fd   : > { %5522 = vmatpush3.bf16.msra.mxu0 %v6224_v56 }
 0x3fe   : > { %5523 = vmatprep.subr.bf16.mxu0 %v6225_v33 }
 0x401   : > { %5524 = vmatpush3.bf16.msra.mxu0 %v6225_v33 }
 0x404   : > { %5526 = vmatmul.mubr.msk.bf16.vlgmr.msra.gmra.mrb[8].mxu0 %vm1693_vm9, %v2337_v49  ;;  %v2788_v49 = vld [vmem:[#allocation3 + $0x28] sm:$0xff] }
 0x405   : > { %5529 = vmatprep.mubr.msk.bf16.mxu0 %vm1693_vm9, %v2338_v25  ;;  %v2064_v25 = vld [vmem:[#allocation3 + $0xc8] sm:$0xff]  ;;  %v2877_v46 = vrot.slane %v2788_v49, 2  ;;  %v2785_v49 = vld [vmem:[#allocation3 + $0x10] sm:$0xff] }
 0x40c   : > { %5530 = vmatmul.mubr.msk.bf16.gmra.mrb[12].mxu0 %vm1693_vm9, %v2607_v32  ;;  %v2880_v32 = vrot.slane %v2791_v36, 2  ;;  %v2874_v36 = vrot.slane %v2785_v49, 2 }
 0x4d7   : > { %v5527_v51 = vpop.f32.mrb[8].mxu0 }
 0x4d8   : > { %v2739_v45 = vmul.f32 %v5527_v51, %v5027_v4  ;;  %v2694_v52 = vpop.f32.mrb[9].mxu0 }
 0x4d9   : > { %v2737_v53 = vmul.f32 %v5027_v4, %v2694_v52  ;;  %v5528_v55 = vpop.f32.mrb[10].mxu0  ;;  %v6231_v52 = vld [vmem:[%s8037_s22 + $0x178] sm:$0xff]  }
 0x4da   : > { %v2751_v13 = vadd.f32 %v5028_v40, %v2739_v45  ;;  %v2740_v57 = vmul.f32 %v5528_v55, %v5027_v4  ;;  %v2697_v58 = vpop.f32.mrb[11].mxu0  ;;  %5543 = vmatprep.subr.bf16.mxu1 %v6231_v52 }
 0x4db   : > { %v2749_v62 = vadd.f32 %v5028_v40, %v2737_v53  ;;  %v2738_v8 = vmul.f32 %v5027_v4, %v2697_v58  ;;  %5544 = vmatpush3.bf16.msra.mxu1 %v6231_v52 }
 0x4dc   : > { %v2759_v0 = vadd.f32 %v2751_v13, %v2059_v59  ;;  %v2752_v30 = vadd.f32 %v5028_v40, %v2740_v57  ;;  %v2883_v57 = vrot.slane %v2794_v29, 2  ;;  %v2901_v29 = vrot.slane %v2812_v42, 2 }
 0x4dd   : > { %v2757_v10 = vadd.f32 %v2749_v62, %v2057_v6  ;;  %v2750_v9 = vadd.f32 %v5028_v40, %v2738_v8  ;;  %v2800_v6 = vld [vmem:[#allocation3 + $0x88] sm:$0xff] }
 0x4de   : > { %v2767_v39 = vmax.f32 %v2759_v0, 0.0  ;;  %v2760_v60 = vadd.f32 %v2752_v30, %v2060_v35 }
 0x4df   : > { %v2765_v41 = vmax.f32 %v2757_v10, 0.0  ;;  %v2758_v54 = vadd.f32 %v2750_v9, %v2058_v12  ;;  %v5531_v7 = vpop.f32.mrb[12].mxu0  ;;  %v2889_v12 = vrot.slane %v2800_v6, 2 }
 0x4e0   : > { %2775 = vst.msk [vmem:[#allocation3 + $0x50] sm:$0xff] %vm672_vm6, %v2767_v39  ;;  %v2768_v14 = vmax.f32 %v2760_v60, 0.0  ;;  %v2743_v16 = vmul.f32 %v5531_v7, %v5027_v4  ;;  %v2710_v17 = vpop.f32.mrb[13].mxu0 }
 0x4e1   : > { %2773 = vst.msk [vmem:[#allocation3 + $0x20] sm:$0xff] %vm672_vm6, %v2765_v41  ;;  %v2766_v18 = vmax.f32 %v2758_v54, 0.0  ;;  %v2741_v19 = vmul.f32 %v5027_v4, %v2710_v17  ;;  %v5532_v20 = vpop.f32.mrb[14].mxu0  ;;  %v7388_v54 = vld [vmem:[%s8037_s22 + $0x120] sm:$0xff]  }
 0x4e2   : > { %2776 = vst.msk [vmem:[#allocation3 + $0x68] sm:$0xff] %vm672_vm6, %v2768_v14  ;;  %v2755_v15 = vadd.f32 %v5028_v40, %v2743_v16  ;;  %v2744_v21 = vmul.f32 %v5532_v20, %v5027_v4  ;;  %v2713_v22 = vpop.f32.mrb[15].mxu0  ;;  %v2803_v14 = vld [vmem:[#allocation3 + $0xa0] sm:$0xff]  ;;  %5553 = vmatprep.subr.bf16.mxu1 %v7388_v54 }
 0x4e3   : > { %2774 = vst.msk [vmem:[#allocation3 + $0x38] sm:$0xff] %vm672_vm6, %v2766_v18  ;;  %v2753_v23 = vadd.f32 %v5028_v40, %v2741_v19  ;;  %v2742_v27 = vmul.f32 %v5027_v4, %v2713_v22  ;;  %v2806_v22 = vld [vmem:[#allocation3 + $0xb8] sm:$0xff] }
 0x4e4   : > { %v2763_v50 = vadd.f32 %v2755_v15, %v2063_v2  ;;  %v2756_v1 = vadd.f32 %v5028_v40, %v2744_v21  ;;  %v2892_v21 = vrot.slane %v2803_v14, 2 }
 0x4e5   : > { %v2761_v24 = vadd.f32 %v2753_v23, %v2061_v11  ;;  %v2754_v5 = vadd.f32 %v5028_v40, %v2742_v27  ;;  %v2797_v40 = vld [vmem:[#allocation3 + $0x70] sm:$0xff]  ;;  %v2895_v11 = vrot.slane %v2806_v22, 2 }
 0x4e6   : > { %v2771_v56 = vmax.f32 %v2763_v50, 0.0  ;;  %v2764_v61 = vadd.f32 %v2756_v1, %v2064_v25  ;;  %v2886_v62 = vrot.slane %v2797_v40, 2  ;;  %v2809_v23 = vld [vmem:[#allocation3 + $0xd0] sm:$0xff]  ;;  %v7404_v1 = vld [vmem:[#allocation3 + $0x8] sm:$0xff] }
 0x4e7   : > { %v2769_v33 = vmax.f32 %v2761_v24, 0.0  ;;  %v2762_v37 = vadd.f32 %v2754_v5, %v2062_v26  ;;  %v7348_v38 = vld [vmem:[#allocation3 + $0x50] sm:$0xff]  ;;  %v2898_v5 = vrot.slane %v2809_v23, 2  ;;  %v2873_v26 = vrot.slane %v7404_v1, 2 }
 0x4e8   : > { %2779 = vst.msk [vmem:[#allocation3 + $0xb0] sm:$0xff] %vm672_vm6, %v2771_v56  ;;  %v2772_v43 = vmax.f32 %v2764_v61, 0.0  ;;  %v7354_v31 = vld [vmem:[#allocation3 + $0x20] sm:$0xff]  ;;  %v2826_v48 = vrot.slane %v7348_v38, 1  ;;  %v2882_v8 = vrot.slane %v7348_v38, 2 }
 0x4e9   : > { %2777 = vst.msk [vmem:[#allocation3 + $0x80] sm:$0xff] %vm672_vm6, %v2769_v33  ;;  %v2770_v63 = vmax.f32 %v2762_v37, 0.0  ;;  %v2876_v28 = vrot.slane %v7354_v31, 2  ;;  %v7358_v47 = vld [vmem:[#allocation3 + $0x68] sm:$0xff]  ;;  %v2824_v0 = vrot.slane %v7354_v31, 1 }
 0x4ea   : > { %2780 = vst.msk [vmem:[#allocation3 + $0xc8] sm:$0xff] %vm672_vm6, %v2772_v43  ;;  %v2827_v34 = vrot.slane %v7358_v47, 1  ;;  %v7363_v4 = vld [vmem:[#allocation3 + $0x38] sm:$0xff]  ;;  %v2885_v59 = vrot.slane %v7358_v47, 2  ;;  %v2884_v39 = vsel %vm837_vm2, %v2882_v8, %v2883_v57 }
 0x4eb   : > { %2778 = vst.msk [vmem:[#allocation3 + $0x98] sm:$0xff] %vm672_vm6, %v2770_v63  ;;  %v2878_v51 = vsel %vm837_vm2, %v2876_v28, %v2877_v46  ;;  %v2879_v45 = vrot.slane %v7363_v4, 2  ;;  %v2825_v13 = vrot.slane %v7363_v4, 1  ;;  %v6060_v18 = vpack.i.bf16 %v2884_v39, %v2882_v8  ;;  %v7413_v46 = vld [vmem:[#allocation3 + $0xe0] sm:$0xff]  ;;  %v2786_v8 = vld [vmem:[#allocation3 + $0x18] sm:$0xff] }
 0x4ec   : > { %v6050_v53 = vpack.i.bf16 %v2878_v51, %v2876_v28  ;;  %v6045_v55 = vpack.i.bf16 %v2827_v34, %v2826_v48  ;;  %v2887_v9 = vsel %vm837_vm2, %v2885_v59, %v2886_v62  ;;  %v2875_v28 = vsel %vm837_vm2, %v2873_v26, %v2874_v36 }
 0x4ed   : > { %v2881_v58 = vsel %vm837_vm2, %v2879_v45, %v2880_v32  ;;  %v6055_v10 = vpack.i.bf16 %v2825_v13, %v2824_v0  ;;  %v6070_v17 = vpack.i.bf16 %v2887_v9, %v2885_v59  ;;  %v2900_v32 = vrot.slane %v7413_v46, 2  ;;  %v2789_v0 = vld [vmem:[#allocation3 + $0x30] sm:$0xff] }
 0x4ee   : > { %6051 = vrot.lane.b32.xlu1 %v6050_v53, %s8042_s24  ;;  %6046 = vrot.lane.b32.xlu0 %v6045_v55, %s8043_s2  ;;  %v6065_v30 = vpack.i.bf16 %v2881_v58, %v2879_v45  ;;  %v6105_v40 = vpack.i.bf16 %v2875_v28, %v2873_v26  ;;  %v2823_v51 = vrot.slane %v7404_v1, 1  ;;  %v2832_v53 = vrot.slane %v7413_v46, 1  ;;  %v2795_v58 = vld [vmem:[#allocation3 + $0x60] sm:$0xff] }
 0x4ef   : > { %v7394_v16 = vld [vmem:[#allocation3 + $0xb0] sm:$0xff]  ;;  %v2902_v45 = vsel %vm837_vm2, %v2900_v32, %v2901_v29 }
 0x4f0   : > { %v7378_v35 = vld [vmem:[#allocation3 + $0x80] sm:$0xff]  ;;  %v2830_v2 = vrot.slane %v7394_v16, 1  ;;  %v2894_v56 = vrot.slane %v7394_v16, 2  ;;  %v6110_v52 = vpack.i.bf16 %v2902_v45, %v2900_v32 }
 0x4f1   : > { %v2888_v60 = vrot.slane %v7378_v35, 2  ;;  %v7383_v41 = vld [vmem:[#allocation3 + $0xc8] sm:$0xff]  ;;  %v2828_v61 = vrot.slane %v7378_v35, 1 }
 0x4f2   : > { %6066 = vrot.lane.b32.xlu0 %v6065_v30, %s8042_s24  ;;  %6056 = vrot.lane.b32.xlu1 %v6055_v10, %s8043_s2  ;;  %v7392_v7 = vld [vmem:[#allocation3 + $0x98] sm:$0xff]  ;;  %v2831_v19 = vrot.slane %v7383_v41, 1  ;;  %v2897_v25 = vrot.slane %v7383_v41, 2  ;;  %v2896_v63 = vsel %vm837_vm2, %v2894_v56, %v2895_v11 }
 0x4f3   : > { %v2890_v20 = vsel %vm837_vm2, %v2888_v60, %v2889_v12  ;;  %v2891_v15 = vrot.slane %v7392_v7, 2  ;;  %v2829_v50 = vrot.slane %v7392_v7, 1  ;;  %v6090_v34 = vpack.i.bf16 %v2896_v63, %v2894_v56 }
 0x4f4   : > { %v6080_v27 = vpack.i.bf16 %v2890_v20, %v2888_v60  ;;  %v6075_v44 = vpack.i.bf16 %v2831_v19, %v2830_v2  ;;  %v2899_v43 = vsel %vm837_vm2, %v2897_v25, %v2898_v5 }
 0x4f5   : > { %v2893_v24 = vsel %vm837_vm2, %v2891_v15, %v2892_v21  ;;  %v6085_v37 = vpack.i.bf16 %v2829_v50, %v2828_v61  ;;  %v6100_v48 = vpack.i.bf16 %v2899_v43, %v2897_v25  ;;  %v2792_v21 = vld [vmem:[#allocation3 + $0x48] sm:$0xff] }
 0x4f6   : > { %6071 = vrot.lane.b32.xlu0 %v6070_v17, %s8042_s24  ;;  %6061 = vrot.lane.b32.xlu1 %v6060_v18, %s8042_s24  ;;  %v6095_v33 = vpack.i.bf16 %v2893_v24, %v2891_v15 }
 0x4fa   : > { %6081 = vrot.lane.b32.xlu1 %v6080_v27, %s8042_s24  ;;  %6076 = vrot.lane.b32.xlu0 %v6075_v44, %s8043_s2 }
 0x4fe   : > { %6096 = vrot.lane.b32.xlu0 %v6095_v33, %s8042_s24  ;;  %6086 = vrot.lane.b32.xlu1 %v6085_v37, %s8043_s2 }
 0x502   : > { %6101 = vrot.lane.b32.xlu0 %v6100_v48, %s8042_s24  ;;  %6091 = vrot.lane.b32.xlu1 %v6090_v34, %s8042_s24 }
 0x506   : > { %6106 = vrot.lane.b32.xlu0 %v6105_v40, %s8042_s24  ;;  %2833 = vrot.lane.b32.xlu1 %v2823_v51, %s8043_s2 }
 0x50a   : > { %6111 = vrot.lane.b32.xlu0 %v6110_v52, %s8042_s24  ;;  %2851 = vrot.lane.b32.xlu1 %v2832_v53, %s8043_s2  ;;  %v2807_v52 = vld [vmem:[#allocation3 + $0xc0] sm:$0xff] }
 0x560   : > { %v6052_v55 = vpop.permute.xlu1 %6051  ;;  %v6047_v13 = vpop.permute.xlu0 %6046 }
 0x561   : > { %v6049_v57 = vunpack.i.h.bf16 %v6047_v13  ;;  %v6054_v59 = vunpack.i.h.bf16 %v6052_v55  ;;  %v6053_v60 = vunpack.i.l.bf16 %v6052_v55  ;;  %v6048_v17 = vunpack.i.l.bf16 %v6047_v13 }
 0x563   : > { %v2971_v12 = vsel %vm672_vm6, %v2795_v58, %v6049_v57  ;;  %v2972_v14 = vsel %vm672_vm6, %v7358_v47, %v6049_v57  ;;  %v2970_v61 = vsel %vm672_vm6, %v7348_v38, %v6048_v17 }
 0x564   : > { %v6067_v62 = vpop.permute.xlu0 %6066  ;;  %v6057_v6 = vpop.permute.xlu1 %6056 }
 0x565   : > { %v6069_v30 = vunpack.i.h.bf16 %v6067_v62  ;;  %v6068_v10 = vunpack.i.l.bf16 %v6067_v62  ;;  %v6059_v9 = vunpack.i.h.bf16 %v6057_v6  ;;  %v6058_v39 = vunpack.i.l.bf16 %v6057_v6  ;;  %v2801_v62 = vld [vmem:[#allocation3 + $0x90] sm:$0xff] }
 0x567   : > { %v2967_v18 = vsel %vm672_vm6, %v2789_v0, %v6059_v9  ;;  %v2968_v19 = vsel %vm672_vm6, %v7363_v4, %v6059_v9  ;;  %v2965_v20 = vsel %vm672_vm6, %v2786_v8, %v6058_v39  ;;  %v2966_v15 = vsel %vm672_vm6, %v7354_v31, %v6058_v39  ;;  %v6233_v8 = vld [vmem:[%s8037_s22 + $0x128] sm:$0xff]  }
 0x568   : > { %v2987_v22 = vsel %vm1549_vm8, %v2967_v18, %v6068_v10  ;;  %v2988_v2 = vsel %vm1549_vm8, %v2968_v19, %v6069_v30  ;;  %v2985_v23 = vsel %vm1549_vm8, %v2965_v20, %v6053_v60  ;;  %v2986_v47 = vsel %vm1549_vm8, %v2966_v15, %v6054_v59  ;;  %v6072_v27 = vpop.permute.xlu0 %6071  ;;  %v6062_v44 = vpop.permute.xlu1 %6061  ;;  %v2798_v59 = vld [vmem:[#allocation3 + $0x78] sm:$0xff]  ;;  %v2804_v15 = vld [vmem:[#allocation3 + $0xa8] sm:$0xff] }
 0x569   : > { %v3025_v50 = vrot.slane %v2987_v22, 7  ;;  %v3026_v11 = vrot.slane %v2988_v2, 7  ;;  %v3022_v49 = vrot.slane %v2985_v23, 7  ;;  %v3023_v4 = vrot.slane %v2986_v47, 7 }
 0x56a   : > { %v6074_v24 = vunpack.i.h.bf16 %v6072_v27  ;;  %v6073_v25 = vunpack.i.l.bf16 %v6072_v27  ;;  %v6064_v5 = vunpack.i.h.bf16 %v6062_v44  ;;  %v6063_v56 = vunpack.i.l.bf16 %v6062_v44 }
 0x56b   : > { %v2969_v31 = vsel %vm672_vm6, %v2792_v21, %v6048_v17  ;;  %v7447_v26 = vsel %vm985_vm4, %v3022_v49, %v3023_v4  ;;  %v7450_v36 = vsel %vm985_vm4, %v3025_v50, %v3026_v11 }
 0x56c   : > { %v2992_v33 = vsel %vm1549_vm8, %v2972_v14, %v6074_v24  ;;  %v2991_v37 = vsel %vm1549_vm8, %v2971_v12, %v6073_v25  ;;  %v2990_v42 = vsel %vm1549_vm8, %v2970_v61, %v6064_v5  ;;  %v2989_v43 = vsel %vm1549_vm8, %v2969_v31, %v6063_v56  ;;  %v6082_v63 = vpop.permute.xlu1 %6081  ;;  %v6077_v28 = vpop.permute.xlu0 %6076  ;;  %v2783_v25 = vld [vmem:[#allocation3] sm:$0xff] }
 0x56d   : > { %v3032_v32 = vrot.slane %v2992_v33, 7  ;;  %v3031_v29 = vrot.slane %v2991_v37, 7  ;;  %v3029_v48 = vrot.slane %v2990_v42, 7  ;;  %v3028_v38 = vrot.slane %v2989_v43, 7 }
 0x56e   : > { %v6079_v40 = vunpack.i.h.bf16 %v6077_v28  ;;  %v3074_v45 = vpack.c.bf16 %v7450_v36, %v7447_v26  ;;  %v6084_v0 = vunpack.i.h.bf16 %v6082_v63  ;;  %v6083_v10 = vunpack.i.l.bf16 %v6082_v63 }
 0x56f   : > { %v7457_v34 = vsel %vm985_vm4, %v3031_v29, %v3032_v32  ;;  %v7460_v51 = vsel %vm985_vm4, %v3028_v38, %v3029_v48  ;;  %v6078_v60 = vunpack.i.l.bf16 %v6077_v28 }
 0x570   : > { %v6097_v53 = vpop.permute.xlu0 %6096  ;;  %v6087_v55 = vpop.permute.xlu1 %6086  ;;  %v3075_v13 = vpack.c.bf16 %v7457_v34, %v7460_v51  ;;  %5545 = vmatprep.mubr.msk.bf16.mxu1 %vm1693_vm9, %v3074_v45  ;;  %v2979_v9 = vsel %vm672_vm6, %v2807_v52, %v6079_v40  ;;  %v2980_v39 = vsel %vm672_vm6, %v7383_v41, %v6079_v40 }
 0x571   : > { %v6099_v57 = vunpack.i.h.bf16 %v6097_v53  ;;  %v6098_v58 = vunpack.i.l.bf16 %v6097_v53  ;;  %v6089_v6 = vunpack.i.h.bf16 %v6087_v55  ;;  %v6088_v30 = vunpack.i.l.bf16 %v6087_v55 }
 0x572   : > { %5546 = vmatmul.mubr.msk.bf16.vlgmr.msra.gmra.mrb[16].mxu1 %vm1693_vm9, %v3075_v13  ;;  %v2977_v49 = vsel %vm672_vm6, %v2804_v15, %v6078_v60  ;;  %v2978_v4 = vsel %vm672_vm6, %v7394_v16, %v6078_v60  ;;  %v6235_v16 = vld [vmem:[%s8037_s22 + $0x138] sm:$0xff]   ;;  %v2810_v60 = vld [vmem:[#allocation3 + $0xd8] sm:$0xff] }
 0x573   : > { %v2975_v12 = vsel %vm672_vm6, %v2801_v62, %v6089_v6  ;;  %v2976_v14 = vsel %vm672_vm6, %v7392_v7, %v6089_v6  ;;  %v2973_v17 = vsel %vm672_vm6, %v2798_v59, %v6088_v30  ;;  %v2974_v18 = vsel %vm672_vm6, %v7378_v35, %v6088_v30  ;;  %5554 = vmatpush3.bf16.msra.mxu1 %v7388_v54  ;;  %v6234_v7 = vld [vmem:[%s8037_s22 + $0x130] sm:$0xff]   ;;  %v6238_v6 = vld [vmem:[%s8037_s22 + $0x180] sm:$0xff]  }
 0x574   : > { %v6102_v19 = vpop.permute.xlu0 %6101  ;;  %v6092_v20 = vpop.permute.xlu1 %6091  ;;  %v2995_v41 = vsel %vm1549_vm8, %v2975_v12, %v6098_v58  ;;  %v2996_v21 = vsel %vm1549_vm8, %v2976_v14, %v6099_v57  ;;  %v2993_v22 = vsel %vm1549_vm8, %v2973_v17, %v6083_v10  ;;  %v2994_v2 = vsel %vm1549_vm8, %v2974_v18, %v6084_v0  ;;  %5555 = vmatprep.subr.bf16.mxu1 %v6233_v8  ;;  %v6236_v57 = vld [vmem:[%s8037_s22 + $0x140] sm:$0xff]   ;;  %v6237_v0 = vld [vmem:[%s8037_s22 + $0x148] sm:$0xff]  }
 0x575   : > { %v3037_v23 = vrot.slane %v2995_v41, 7  ;;  %v3038_v35 = vrot.slane %v2996_v21, 7  ;;  %v3034_v47 = vrot.slane %v2993_v22, 7  ;;  %v3035_v54 = vrot.slane %v2994_v2, 7  ;;  %v6243_v14 = vld [vmem:[%s8037_s22 + $0x1a8] sm:$0xff]  }
 0x576   : > { %v6104_v27 = vunpack.i.h.bf16 %v6102_v19  ;;  %v6103_v44 = vunpack.i.l.bf16 %v6102_v19  ;;  %v6094_v50 = vunpack.i.h.bf16 %v6092_v20  ;;  %v6093_v11 = vunpack.i.l.bf16 %v6092_v20 }
 0x577   : > { %5556 = vmatpush3.bf16.msra.mxu1 %v6233_v8  ;;  %v3036_v56 = vsel %vm985_vm4, %v3034_v47, %v3035_v54  ;;  %v3039_v31 = vsel %vm985_vm4, %v3037_v23, %v3038_v35  ;;  %v3052_v30 = vpack.c.bf16 %v7460_v51, %v7450_v36  ;;  %v6241_v36 = vld [vmem:[%s8037_s22 + $0x198] sm:$0xff]   ;;  %v6245_v23 = vld [vmem:[%s8037_s22 + $0x1e8] sm:$0xff]   ;;  %v6246_v35 = vld [vmem:[%s8037_s22 + $0x1f0] sm:$0xff]  }
 0x578   : > { %v6107_v24 = vpop.permute.xlu0 %6106  ;;  %v2834_v5 = vpop.permute.xlu1 %2833  ;;  %v3000_v61 = vsel %vm1549_vm8, %v2980_v39, %v6104_v27  ;;  %v2999_v33 = vsel %vm1549_vm8, %v2979_v9, %v6103_v44  ;;  %v2998_v37 = vsel %vm1549_vm8, %v2978_v4, %v6094_v50  ;;  %v2997_v42 = vsel %vm1549_vm8, %v2977_v49, %v6093_v11  ;;  %5557 = vmatprep.subr.bf16.mxu1 %v6234_v7  ;;  %v6240_v9 = vld [vmem:[%s8037_s22 + $0x190] sm:$0xff]   ;;  %v5095_v47 = vld [vmem:[%s8040_s5 + $0x2] ss:$0 sm:$0xff] }
 0x579   : > { %v3071_v43 = vrot.slane %v3000_v61, 7  ;;  %v3070_v63 = vrot.slane %v2999_v33, 7  ;;  %v3041_v28 = vrot.slane %v2998_v37, 7  ;;  %v3040_v32 = vrot.slane %v2997_v42, 7  ;;  %v5096_v54 = vld [vmem:[%s8041_s6 + $0x2] ss:$0 sm:$0xff] }
 0x57a   : > { %v6109_v29 = vunpack.i.h.bf16 %v6107_v24  ;;  %v6108_v48 = vunpack.i.l.bf16 %v6107_v24  ;;  %v2963_v38 = vsel %vm672_vm6, %v2783_v25, %v2834_v5  ;;  %v2964_v40 = vsel %vm672_vm6, %v7404_v1, %v2834_v5 }
 0x57b   : > { %5558 = vmatpush3.bf16.msra.mxu1 %v6234_v7  ;;  %v3076_v45 = vpack.c.bf16 %v3039_v31, %v3036_v56  ;;  %v3042_v52 = vsel %vm985_vm4, %v3040_v32, %v3041_v28  ;;  %v3072_v53 = vsel %vm985_vm4, %v3070_v63, %v3071_v43  ;;  %v3053_v10 = vpack.c.bf16 %v3036_v56, %v7457_v34  ;;  %v6242_v34 = vld [vmem:[%s8037_s22 + $0x1a0] sm:$0xff]  }
 0x57c   : > { %v2983_v55 = vsel %vm1549_vm8, %v2963_v38, %v6108_v48  ;;  %v2984_v13 = vsel %vm1549_vm8, %v2964_v40, %v6109_v29  ;;  %5559 = vmatprep.subr.bf16.mxu1 %v6235_v16  ;;  %v3077_v1 = vpack.c.bf16 %v3072_v53, %v3042_v52  ;;  %v3054_v39 = vpack.c.bf16 %v3042_v52, %v3039_v31  ;;  %v6112_v51 = vpop.permute.xlu0 %6111  ;;  %v2852_v12 = vpop.permute.xlu1 %2851  ;;  %v6247_v48 = vld [vmem:[%s8037_s22 + $0x1f8] sm:$0xff]   ;;  %v3504_v52 = vld [vmem:[#allocation4 + $0x28] sm:$0xff] }
 0x57d   : > { %v3019_v58 = vrot.slane %v2983_v55, 7  ;;  %v3020_v59 = vrot.slane %v2984_v13, 7  ;;  %5549 = vmatprep.mubr.msk.bf16.mxu1 %vm1693_vm9, %v3076_v45  ;;  %v6114_v17 = vunpack.i.h.bf16 %v6112_v51  ;;  %v6113_v18 = vunpack.i.l.bf16 %v6112_v51 }
 0x57e   : > { %5550 = vmatmul.mubr.msk.bf16.gmra.mrb[20].mxu1 %vm1693_vm9, %v3077_v1  ;;  %v2981_v19 = vsel %vm672_vm6, %v2810_v60, %v2852_v12  ;;  %v2982_v20 = vsel %vm672_vm6, %v7413_v46, %v2852_v12  ;;  %v6244_v46 = vld [vmem:[%s8037_s22 + $0x1e0] sm:$0xff]   ;;  %v3513_v12 = vld [vmem:[#allocation4 + $0x70] sm:$0xff] }
 0x57f   : > { %5560 = vmatpush3.bf16.msra.mxu1 %v6235_v16  ;;  %v3021_v62 = vsel %vm985_vm4, %v3019_v58, %v3020_v59  ;;  %v3001_v15 = vsel %vm1549_vm8, %v2981_v19, %v6113_v18  ;;  %v3002_v41 = vsel %vm1549_vm8, %v2982_v20, %v6114_v17  ;;  %5593 = vmatprep.subr.bf16.mxu0 %v6244_v46  ;;  %v3507_v58 = vld [vmem:[#allocation4 + $0x40] sm:$0xff]  ;;  %v6249_v18 = vld [vmem:[%s8037_s22 + $0x208] sm:$0xff]  }
 0x580   : > { %5561 = vmatprep.subr.bf16.mxu1 %v6236_v57  ;;  %v3051_v8 = vpack.c.bf16 %v7447_v26, %v3021_v62  ;;  %v6239_v26 = vld [vmem:[%s8037_s22 + $0x188] sm:$0xff]   ;;  %v3319_v21 = vrot.slane %v3001_v15, 7  ;;  %v3320_v22 = vrot.slane %v3002_v41, 7  ;;  %5594 = vmatpush3.bf16.msra.mxu0 %v6244_v46  ;;  %v3593_v62 = vrot.slane %v3504_v52, 2 }
 0x581   : > { %5595 = vmatprep.subr.bf16.mxu0 %v6245_v23 }
 0x582   : > { %5565 = vmatprep.mubr.msk.bf16.mxu1 %vm1693_vm9, %v3051_v8  ;;  %v3321_v2 = vsel %vm985_vm4, %v3319_v21, %v3320_v22 }
 0x583   : > { %5562 = vmatpush3.bf16.msra.mxu1 %v6236_v57  ;;  %v3323_v7 = vpack.c.bf16 %v3321_v2, %v3072_v53  ;;  %v3602_v2 = vrot.slane %v3513_v12, 2 }
 0x584   : > { %5563 = vmatprep.subr.bf16.mxu1 %v6237_v0  ;;  %5596 = vmatpush3.bf16.msra.mxu0 %v6245_v23  ;;  %v3516_v23 = vld [vmem:[#allocation4 + $0x88] sm:$0xff] }
 0x585   : > { %5597 = vmatprep.subr.bf16.mxu0 %v6246_v35 }
 0x587   : > { %5564 = vmatpush3.bf16.msra.mxu1 %v6237_v0  ;;  %v6248_v0 = vld [vmem:[%s8037_s22 + $0x200] sm:$0xff]  }
 0x588   : > { %5573 = vmatprep.subr.bf16.mxu1 %v6238_v6  ;;  %5598 = vmatpush3.bf16.msra.mxu0 %v6246_v35 }
 0x589   : > { %5599 = vmatprep.subr.bf16.mxu0 %v6247_v48 }
 0x58a   : > { %5566 = vmatmul.mubr.msk.bf16.vlgmr.msra.gmra.mrb[16].mxu1 %vm1693_vm9, %v3052_v30 }
 0x58b   : > { %5569 = vmatprep.mubr.msk.bf16.mxu1 %vm1693_vm9, %v3053_v10  ;;  %5574 = vmatpush3.bf16.msra.mxu1 %v6238_v6 }
 0x58c   : > { %5575 = vmatprep.subr.bf16.mxu1 %v6239_v26  ;;  %5600 = vmatpush3.bf16.msra.mxu0 %v6247_v48 }
 0x58d   : > { %5601 = vmatprep.subr.bf16.mxu0 %v6248_v0 }
 0x58f   : > { %5576 = vmatpush3.bf16.msra.mxu1 %v6239_v26 }
 0x590   : > { %5577 = vmatprep.subr.bf16.mxu1 %v6240_v9  ;;  %5602 = vmatpush3.bf16.msra.mxu0 %v6248_v0  ;;  %v3528_v0 = vld [vmem:[#allocation4 + $0xe8] sm:$0xff] }
 0x591   : > { %5603 = vmatprep.subr.bf16.mxu0 %v6249_v18 }
 0x592   : > { %5570 = vmatmul.mubr.msk.bf16.gmra.mrb[20].mxu1 %vm1693_vm9, %v3054_v39 }
 0x593   : > { %5578 = vmatpush3.bf16.msra.mxu1 %v6240_v9  ;;  %5585 = vmatprep.mubr.msk.bf16.mxu1 %vm1693_vm9, %v3052_v30 }
 0x594   : > { %5579 = vmatprep.subr.bf16.mxu1 %v6241_v36  ;;  %5604 = vmatpush3.bf16.msra.mxu0 %v6249_v18 }
 0x597   : > { %5580 = vmatpush3.bf16.msra.mxu1 %v6241_v36  ;;  %v3510_v36 = vld [vmem:[#allocation4 + $0x58] sm:$0xff] }
 0x598   : > { %5581 = vmatprep.subr.bf16.mxu1 %v6242_v34  ;;  %v3599_v41 = vrot.slane %v3510_v36, 2  ;;  %v3617_v36 = vrot.slane %v3528_v0, 2 }
 0x59b   : > { %5582 = vmatpush3.bf16.msra.mxu1 %v6242_v34 }
 0x59c   : > { %5583 = vmatprep.subr.bf16.mxu1 %v6243_v14 }
 0x59f   : > { %5584 = vmatpush3.bf16.msra.mxu1 %v6243_v14 }
 0x5a0   : > { %5653 = vmatprep.subr.bf16.mxu1 %v6364_v3 }
 0x5a2   : > { %5586 = vmatmul.mubr.msk.bf16.vlgmr.msra.gmra.mrb[16].mxu1 %vm1693_vm9, %v3053_v10 }
 0x5a3   : > { %5589 = vmatprep.mubr.msk.bf16.mxu1 %vm1693_vm9, %v3054_v39  ;;  %v3596_v39 = vrot.slane %v3507_v58, 2 }
 0x5aa   : > { %5590 = vmatmul.mubr.msk.bf16.gmra.mrb[20].mxu1 %vm1693_vm9, %v3323_v7 }
 0x5ab   : > { %5661 = vmatprep.mubr.msk.bf16.mxu1 %vm6369_vm10, %v6364_v3 }
 0x675   : > { %v5587_v27 = vpop.f32.mrb[16].mxu1 }
 0x676   : > { %v3455_v44 = vmul.f32 %v5587_v27, %v5095_v47  ;;  %v3410_v50 = vpop.f32.mrb[17].mxu1 }
 0x677   : > { %v3453_v11 = vmul.f32 %v5095_v47, %v3410_v50  ;;  %v5588_v49 = vpop.f32.mrb[18].mxu1 }
 0x678   : > { %v3467_v4 = vadd.f32 %v5096_v54, %v3455_v44  ;;  %v3456_v24 = vmul.f32 %v5588_v49, %v5095_v47  ;;  %v3413_v25 = vpop.f32.mrb[19].mxu1 }
 0x679   : > { %v3465_v5 = vadd.f32 %v5096_v54, %v3453_v11  ;;  %v3454_v56 = vmul.f32 %v5095_v47, %v3413_v25  ;;  %v3605_v11 = vrot.slane %v3516_v23, 2  ;;  %v3519_v25 = vld [vmem:[#allocation4 + $0xa0] sm:$0xff] }
 0x67a   : > { %v3475_v31 = vmax.f32 %v3467_v4, 0.0  ;;  %v3468_v61 = vadd.f32 %v5096_v54, %v3456_v24  ;;  %v7615_v4 = vld [vmem:[%s8037_s22 + $0x1b0] sm:$0xff]  }
 0x67b   : > { %v3473_v33 = vmax.f32 %v3465_v5, 0.0  ;;  %v3466_v37 = vadd.f32 %v5096_v54, %v3454_v56  ;;  %5613 = vmatprep.subr.bf16.mxu0 %v7615_v4 }
 0x67c   : > { %3483 = vst.msk [vmem:[#allocation4 + $0x50] sm:$0xff] %vm672_vm6, %v3475_v31  ;;  %v3476_v42 = vmax.f32 %v3468_v61, 0.0 }
 0x67d   : > { %3481 = vst.msk [vmem:[#allocation4 + $0x20] sm:$0xff] %vm672_vm6, %v3473_v33  ;;  %v3474_v16 = vmax.f32 %v3466_v37, 0.0  ;;  %v5591_v43 = vpop.f32.mrb[20].mxu1 }
 0x67e   : > { %3484 = vst.msk [vmem:[#allocation4 + $0x68] sm:$0xff] %vm672_vm6, %v3476_v42  ;;  %v3459_v63 = vmul.f32 %v5591_v43, %v5095_v47  ;;  %v3426_v28 = vpop.f32.mrb[21].mxu1  ;;  %v3608_v42 = vrot.slane %v3519_v25, 2 }
 0x67f   : > { %3482 = vst.msk [vmem:[#allocation4 + $0x38] sm:$0xff] %vm672_vm6, %v3474_v16  ;;  %v3457_v32 = vmul.f32 %v5095_v47, %v3426_v28  ;;  %v5592_v29 = vpop.f32.mrb[22].mxu1  ;;  %v3522_v16 = vld [vmem:[#allocation4 + $0xb8] sm:$0xff] }
 0x680   : > { %v3471_v38 = vadd.f32 %v5096_v54, %v3459_v63  ;;  %v3460_v40 = vmul.f32 %v5592_v29, %v5095_v47  ;;  %v3429_v45 = vpop.f32.mrb[23].mxu1  ;;  %v3525_v63 = vld [vmem:[#allocation4 + $0xd0] sm:$0xff]  ;;  %v3611_v48 = vrot.slane %v3522_v16, 2 }
 0x681   : > { %v3469_v53 = vadd.f32 %v5096_v54, %v3457_v32  ;;  %v3458_v55 = vmul.f32 %v5095_v47, %v3429_v45 }
 0x682   : > { %v3479_v13 = vmax.f32 %v3471_v38, 0.0  ;;  %v3472_v57 = vadd.f32 %v5096_v54, %v3460_v40  ;;  %v7631_v38 = vld [vmem:[#allocation4 + $0x8] sm:$0xff]  ;;  %v3501_v40 = vld [vmem:[#allocation4 + $0x10] sm:$0xff] }
 0x683   : > { %v3477_v59 = vmax.f32 %v3469_v53, 0.0  ;;  %v3470_v1 = vadd.f32 %v5096_v54, %v3458_v55  ;;  %v7575_v8 = vld [vmem:[#allocation4 + $0x50] sm:$0xff]  ;;  %v3614_v53 = vrot.slane %v3525_v63, 2  ;;  %v3590_v58 = vrot.slane %v3501_v40, 2 }
 0x684   : > { %3487 = vst.msk [vmem:[#allocation4 + $0xb0] sm:$0xff] %vm672_vm6, %v3479_v13  ;;  %v3480_v6 = vmax.f32 %v3472_v57, 0.0  ;;  %v7581_v30 = vld [vmem:[#allocation4 + $0x20] sm:$0xff]  ;;  %v3542_v34 = vrot.slane %v7575_v8, 1  ;;  %v3598_v7 = vrot.slane %v7575_v8, 2  ;;  %v3589_v57 = vrot.slane %v7631_v38, 2 }
 0x685   : > { %3485 = vst.msk [vmem:[#allocation4 + $0x80] sm:$0xff] %vm672_vm6, %v3477_v59  ;;  %v3478_v26 = vmax.f32 %v3470_v1, 0.0  ;;  %v3592_v10 = vrot.slane %v7581_v30, 2  ;;  %v7585_v9 = vld [vmem:[#allocation4 + $0x68] sm:$0xff]  ;;  %v3540_v46 = vrot.slane %v7581_v30, 1 }
 0x686   : > { %3488 = vst.msk [vmem:[#allocation4 + $0xc8] sm:$0xff] %vm672_vm6, %v3480_v6  ;;  %v3543_v51 = vrot.slane %v7585_v9, 1  ;;  %v7590_v60 = vld [vmem:[#allocation4 + $0x38] sm:$0xff]  ;;  %v3601_v22 = vrot.slane %v7585_v9, 2  ;;  %v3600_v44 = vsel %vm837_vm2, %v3598_v7, %v3599_v41 }
 0x687   : > { %3486 = vst.msk [vmem:[#allocation4 + $0x98] sm:$0xff] %vm672_vm6, %v3478_v26  ;;  %v3594_v14 = vsel %vm837_vm2, %v3592_v10, %v3593_v62  ;;  %v3595_v17 = vrot.slane %v7590_v60, 2  ;;  %v3541_v15 = vrot.slane %v7590_v60, 1  ;;  %v6130_v31 = vpack.i.bf16 %v3600_v44, %v3598_v7  ;;  %v7640_v62 = vld [vmem:[#allocation4 + $0xe0] sm:$0xff]  ;;  %v3502_v7 = vld [vmem:[#allocation4 + $0x18] sm:$0xff] }
 0x688   : > { %v6120_v19 = vpack.i.bf16 %v3594_v14, %v3592_v10  ;;  %v6115_v20 = vpack.i.bf16 %v3543_v51, %v3542_v34  ;;  %v3603_v27 = vsel %vm837_vm2, %v3601_v22, %v3602_v2  ;;  %v3591_v10 = vsel %vm837_vm2, %v3589_v57, %v3590_v58 }
 0x689   : > { %v3597_v21 = vsel %vm837_vm2, %v3595_v17, %v3596_v39  ;;  %v6125_v47 = vpack.i.bf16 %v3541_v15, %v3540_v46  ;;  %v6140_v56 = vpack.i.bf16 %v3603_v27, %v3601_v22  ;;  %v3616_v39 = vrot.slane %v7640_v62, 2  ;;  %v3505_v46 = vld [vmem:[#allocation4 + $0x30] sm:$0xff] }
 0x68a   : > { %6121 = vrot.lane.b32.xlu1 %v6120_v19, %s8042_s24  ;;  %6116 = vrot.lane.b32.xlu0 %v6115_v20, %s8043_s2  ;;  %v6135_v35 = vpack.i.bf16 %v3597_v21, %v3595_v17  ;;  %v6175_v12 = vpack.i.bf16 %v3591_v10, %v3589_v57  ;;  %v3539_v14 = vrot.slane %v7631_v38, 1  ;;  %v3548_v19 = vrot.slane %v7640_v62, 1  ;;  %v3511_v21 = vld [vmem:[#allocation4 + $0x60] sm:$0xff] }
 0x68b   : > { %v7621_v5 = vld [vmem:[#allocation4 + $0xb0] sm:$0xff]  ;;  %v3618_v17 = vsel %vm837_vm2, %v3616_v39, %v3617_v36 }
 0x68c   : > { %v7605_v54 = vld [vmem:[#allocation4 + $0x80] sm:$0xff]  ;;  %v3546_v43 = vrot.slane %v7621_v5, 1  ;;  %v3610_v55 = vrot.slane %v7621_v5, 2  ;;  %v6180_v18 = vpack.i.bf16 %v3618_v17, %v3616_v39 }
 0x68d   : > { %v3604_v50 = vrot.slane %v7605_v54, 2  ;;  %v7610_v49 = vld [vmem:[#allocation4 + $0xc8] sm:$0xff]  ;;  %v3544_v13 = vrot.slane %v7605_v54, 1 }
 0x68e   : > { %6136 = vrot.lane.b32.xlu0 %v6135_v35, %s8042_s24  ;;  %6126 = vrot.lane.b32.xlu1 %v6125_v47, %s8043_s2  ;;  %v7619_v24 = vld [vmem:[#allocation4 + $0x98] sm:$0xff]  ;;  %v3547_v61 = vrot.slane %v7610_v49, 1  ;;  %v3613_v52 = vrot.slane %v7610_v49, 2  ;;  %v3612_v26 = vsel %vm837_vm2, %v3610_v55, %v3611_v48 }
 0x68f   : > { %v3606_v33 = vsel %vm837_vm2, %v3604_v50, %v3605_v11  ;;  %v3607_v37 = vrot.slane %v7619_v24, 2  ;;  %v3545_v29 = vrot.slane %v7619_v24, 1  ;;  %v6160_v51 = vpack.i.bf16 %v3612_v26, %v3610_v55 }
 0x690   : > { %v6150_v28 = vpack.i.bf16 %v3606_v33, %v3604_v50  ;;  %v6145_v32 = vpack.i.bf16 %v3547_v61, %v3546_v43  ;;  %v3615_v6 = vsel %vm837_vm2, %v3613_v52, %v3614_v53 }
 0x691   : > { %v3609_v45 = vsel %vm837_vm2, %v3607_v37, %v3608_v42  ;;  %v6155_v1 = vpack.i.bf16 %v3545_v29, %v3544_v13  ;;  %v6170_v34 = vpack.i.bf16 %v3615_v6, %v3613_v52  ;;  %v3508_v42 = vld [vmem:[#allocation4 + $0x48] sm:$0xff] }
 0x692   : > { %6141 = vrot.lane.b32.xlu0 %v6140_v56, %s8042_s24  ;;  %6131 = vrot.lane.b32.xlu1 %v6130_v31, %s8042_s24  ;;  %v6165_v59 = vpack.i.bf16 %v3609_v45, %v3607_v37 }
 0x696   : > { %6151 = vrot.lane.b32.xlu1 %v6150_v28, %s8042_s24  ;;  %6146 = vrot.lane.b32.xlu0 %v6145_v32, %s8043_s2 }
 0x69a   : > { %6166 = vrot.lane.b32.xlu0 %v6165_v59, %s8042_s24  ;;  %6156 = vrot.lane.b32.xlu1 %v6155_v1, %s8043_s2 }
 0x69e   : > { %6171 = vrot.lane.b32.xlu0 %v6170_v34, %s8042_s24  ;;  %6161 = vrot.lane.b32.xlu1 %v6160_v51, %s8042_s24 }
 0x6a2   : > { %6176 = vrot.lane.b32.xlu0 %v6175_v12, %s8042_s24  ;;  %3549 = vrot.lane.b32.xlu1 %v3539_v14, %s8043_s2 }
 0x6a6   : > { %6181 = vrot.lane.b32.xlu0 %v6180_v18, %s8042_s24  ;;  %3567 = vrot.lane.b32.xlu1 %v3548_v19, %s8043_s2  ;;  %v3523_v18 = vld [vmem:[#allocation4 + $0xc0] sm:$0xff]  ;;  %s628_s2 = scalar_lea.vmem [#allocation8], %s627_s30  ;;  %s4786_s24 = scalar_lea.sflag [#allocation9], %s627_s30 }
 0x6a7   : > { %s4801_s29 = sshll.u32 %s628_s2, 4  ;;  %s4802_s29 = int_to_ptr.vmem [resolvable:$true] %s4801_s29 }
 0x6a8   : > { %s6300_s27 = scalar_lea.vmem %s4802_s29, 16 }
 0x6a9   : > { %p6301_p11 = scmp.ne.s32.totalorder %s4802_s29, %s6300_s27 }
 0x6ab   : > { %p6302_p12 = pnand %p6301_p11, %p6524_p5 }
 0x6ad   : > { %p6303_p13 = pneg %p6302_p12 }
 0x6fc   : > { %v6122_v20 = vpop.permute.xlu1 %6121  ;;  %v6117_v15 = vpop.permute.xlu0 %6116 }
 0x6fd   : > { %v6119_v41 = vunpack.i.h.bf16 %v6117_v15  ;;  %v6124_v22 = vunpack.i.h.bf16 %v6122_v20  ;;  %v6123_v50 = vunpack.i.l.bf16 %v6122_v20  ;;  %v6118_v56 = vunpack.i.l.bf16 %v6117_v15 }
 0x6ff   : > { %v3687_v11 = vsel %vm672_vm6, %v3511_v21, %v6119_v41  ;;  %v3688_v25 = vsel %vm672_vm6, %v7585_v9, %v6119_v41  ;;  %v3686_v13 = vsel %vm672_vm6, %v7575_v8, %v6118_v56 }
 0x700   : > { %v6137_v2 = vpop.permute.xlu0 %6136  ;;  %v6127_v23 = vpop.permute.xlu1 %6126 }
 0x701   : > { %v6139_v35 = vunpack.i.h.bf16 %v6137_v2  ;;  %v6138_v47 = vunpack.i.l.bf16 %v6137_v2  ;;  %v6129_v27 = vunpack.i.h.bf16 %v6127_v23  ;;  %v6128_v44 = vunpack.i.l.bf16 %v6127_v23  ;;  %v3517_v2 = vld [vmem:[#allocation4 + $0x90] sm:$0xff] }
 0x703   : > { %v3683_v31 = vsel %vm672_vm6, %v3505_v46, %v6129_v27  ;;  %v3684_v61 = vsel %vm672_vm6, %v7590_v60, %v6129_v27  ;;  %v3681_v33 = vsel %vm672_vm6, %v3502_v7, %v6128_v44  ;;  %v3682_v37 = vsel %vm672_vm6, %v7581_v30, %v6128_v44  ;;  %v6251_v7 = vld [vmem:[%s8037_s22 + $0x1b8] sm:$0xff]  }
 0x704   : > { %v3703_v16 = vsel %vm1549_vm8, %v3683_v31, %v6138_v47  ;;  %v3704_v43 = vsel %vm1549_vm8, %v3684_v61, %v6139_v35  ;;  %v3701_v63 = vsel %vm1549_vm8, %v3681_v33, %v6123_v50  ;;  %v3702_v9 = vsel %vm1549_vm8, %v3682_v37, %v6124_v22  ;;  %v6142_v28 = vpop.permute.xlu0 %6141  ;;  %v6132_v32 = vpop.permute.xlu1 %6131  ;;  %v3514_v22 = vld [vmem:[#allocation4 + $0x78] sm:$0xff]  ;;  %v3520_v37 = vld [vmem:[#allocation4 + $0xa8] sm:$0xff] }
 0x705   : > { %v3741_v29 = vrot.slane %v3703_v16, 7  ;;  %v3742_v48 = vrot.slane %v3704_v43, 7  ;;  %v3738_v40 = vrot.slane %v3701_v63, 7  ;;  %v3739_v60 = vrot.slane %v3702_v9, 7 }
 0x706   : > { %v6144_v45 = vunpack.i.h.bf16 %v6142_v28  ;;  %v6143_v52 = vunpack.i.l.bf16 %v6142_v28  ;;  %v6134_v53 = vunpack.i.h.bf16 %v6132_v32  ;;  %v6133_v55 = vunpack.i.l.bf16 %v6132_v32 }
 0x707   : > { %v3685_v30 = vsel %vm672_vm6, %v3508_v42, %v6118_v56  ;;  %v7674_v57 = vsel %vm985_vm4, %v3738_v40, %v3739_v60  ;;  %v7677_v58 = vsel %vm985_vm4, %v3741_v29, %v3742_v48 }
 0x708   : > { %v3708_v59 = vsel %vm1549_vm8, %v3688_v25, %v6144_v45  ;;  %v3707_v1 = vsel %vm1549_vm8, %v3687_v11, %v6143_v52  ;;  %v3706_v0 = vsel %vm1549_vm8, %v3686_v13, %v6134_v53  ;;  %v3705_v6 = vsel %vm1549_vm8, %v3685_v30, %v6133_v55  ;;  %v6152_v26 = vpop.permute.xlu1 %6151  ;;  %v6147_v10 = vpop.permute.xlu0 %6146  ;;  %v3499_v52 = vld [vmem:[#allocation4] sm:$0xff] }
 0x709   : > { %v3748_v39 = vrot.slane %v3708_v59, 7  ;;  %v3747_v36 = vrot.slane %v3707_v1, 7  ;;  %v3745_v34 = vrot.slane %v3706_v0, 7  ;;  %v3744_v8 = vrot.slane %v3705_v6, 7 }
 0x70a   : > { %v6149_v12 = vunpack.i.h.bf16 %v6147_v10  ;;  %v3790_v17 = vpack.c.bf16 %v7677_v58, %v7674_v57  ;;  %v6154_v46 = vunpack.i.h.bf16 %v6152_v26  ;;  %v6153_v47 = vunpack.i.l.bf16 %v6152_v26 }
 0x70b   : > { %v7684_v51 = vsel %vm985_vm4, %v3747_v36, %v3748_v39  ;;  %v7687_v14 = vsel %vm985_vm4, %v3744_v8, %v3745_v34  ;;  %v6148_v50 = vunpack.i.l.bf16 %v6147_v10 }
 0x70c   : > { %v6167_v19 = vpop.permute.xlu0 %6166  ;;  %v6157_v20 = vpop.permute.xlu1 %6156  ;;  %v3791_v15 = vpack.c.bf16 %v7684_v51, %v7687_v14  ;;  %5605 = vmatprep.mubr.msk.bf16.mxu0 %vm1693_vm9, %v3790_v17  ;;  %v3695_v27 = vsel %vm672_vm6, %v3523_v18, %v6149_v12  ;;  %v3696_v44 = vsel %vm672_vm6, %v7610_v49, %v6149_v12 }
 0x70d   : > { %v6169_v41 = vunpack.i.h.bf16 %v6167_v19  ;;  %v6168_v21 = vunpack.i.l.bf16 %v6167_v19  ;;  %v6159_v23 = vunpack.i.h.bf16 %v6157_v20  ;;  %v6158_v35 = vunpack.i.l.bf16 %v6157_v20 }
 0x70e   : > { %5606 = vmatmul.mubr.msk.bf16.vlgmr.msra.gmra.mrb[16].mxu0 %vm1693_vm9, %v3791_v15  ;;  %v3693_v40 = vsel %vm672_vm6, %v3520_v37, %v6148_v50  ;;  %v3694_v60 = vsel %vm672_vm6, %v7621_v5, %v6148_v50  ;;  %v6253_v5 = vld [vmem:[%s8037_s22 + $0x1c8] sm:$0xff]   ;;  %v3526_v50 = vld [vmem:[#allocation4 + $0xd8] sm:$0xff] }
 0x70f   : > { %v3691_v11 = vsel %vm672_vm6, %v3517_v2, %v6159_v23  ;;  %v3692_v25 = vsel %vm672_vm6, %v7619_v24, %v6159_v23  ;;  %v3689_v56 = vsel %vm672_vm6, %v3514_v22, %v6158_v35  ;;  %v3690_v31 = vsel %vm672_vm6, %v7605_v54, %v6158_v35  ;;  %5614 = vmatpush3.bf16.msra.mxu0 %v7615_v4  ;;  %v6252_v24 = vld [vmem:[%s8037_s22 + $0x1c0] sm:$0xff]   ;;  %v6256_v23 = vld [vmem:[%s8037_s22 + $0x210] sm:$0xff]  }
 0x710   : > { %v6172_v61 = vpop.permute.xlu0 %6171  ;;  %v6162_v33 = vpop.permute.xlu1 %6161  ;;  %v3711_v49 = vsel %vm1549_vm8, %v3691_v11, %v6168_v21  ;;  %v3712_v42 = vsel %vm1549_vm8, %v3692_v25, %v6169_v41  ;;  %v3709_v16 = vsel %vm1549_vm8, %v3689_v56, %v6153_v47  ;;  %v3710_v43 = vsel %vm1549_vm8, %v3690_v31, %v6154_v46  ;;  %5615 = vmatprep.subr.bf16.mxu0 %v6251_v7  ;;  %v6254_v41 = vld [vmem:[%s8037_s22 + $0x1d0] sm:$0xff]   ;;  %v6255_v46 = vld [vmem:[%s8037_s22 + $0x1d8] sm:$0xff]  }
 0x711   : > { %v3753_v63 = vrot.slane %v3711_v49, 7  ;;  %v3754_v54 = vrot.slane %v3712_v42, 7  ;;  %v3750_v9 = vrot.slane %v3709_v16, 7  ;;  %v3751_v4 = vrot.slane %v3710_v43, 7  ;;  %v6261_v25 = vld [vmem:[%s8037_s22 + $0x238] sm:$0xff]  }
 0x712   : > { %v6174_v28 = vunpack.i.h.bf16 %v6172_v61  ;;  %v6173_v32 = vunpack.i.l.bf16 %v6172_v61  ;;  %v6164_v29 = vunpack.i.h.bf16 %v6162_v33  ;;  %v6163_v48 = vunpack.i.l.bf16 %v6162_v33 }
 0x713   : > { %5616 = vmatpush3.bf16.msra.mxu0 %v6251_v7  ;;  %v3752_v55 = vsel %vm985_vm4, %v3750_v9, %v3751_v4  ;;  %v3755_v30 = vsel %vm985_vm4, %v3753_v63, %v3754_v54  ;;  %v3768_v35 = vpack.c.bf16 %v7687_v14, %v7677_v58  ;;  %v6259_v58 = vld [vmem:[%s8037_s22 + $0x228] sm:$0xff]   ;;  %v6370_v63 = vmov 0   ;;  %v4335_v54 = vld [vmem:[#allocation6] sm:$0x1]  ;;  %v6262_v9 = vld [vmem:[%s8002_s10 + $0x20] sm:$0xff]  }
 0x714   : > { %v6177_v45 = vpop.permute.xlu0 %6176  ;;  %v3550_v53 = vpop.permute.xlu1 %3549  ;;  %v3716_v13 = vsel %vm1549_vm8, %v3696_v44, %v6174_v28  ;;  %v3715_v59 = vsel %vm1549_vm8, %v3695_v27, %v6173_v32  ;;  %v3714_v1 = vsel %vm1549_vm8, %v3694_v60, %v6164_v29  ;;  %v3713_v0 = vsel %vm1549_vm8, %v3693_v40, %v6163_v48  ;;  %5617 = vmatprep.subr.bf16.mxu0 %v6252_v24  ;;  %v6258_v27 = vld [vmem:[%s8037_s22 + $0x220] sm:$0xff]   ;;  %v6263_v28 = vld [vmem:[%s8002_s10 + $0x28] sm:$0xff]  }
 0x715   : > { %v3787_v6 = vrot.slane %v3716_v13, 7  ;;  %v3786_v26 = vrot.slane %v3715_v59, 7  ;;  %v3757_v10 = vrot.slane %v3714_v1, 7  ;;  %v3756_v39 = vrot.slane %v3713_v0, 7  ;;  %6185 = vset.pattern.permute.xlu1 %v6370_v63  ;;  %6186 = vset.pattern.permute.xlu0 %v6370_v63  ;;  %v4265_v4 = vld [vmem:[%s8000_s8] sm:$0x3] }
 0x716   : > { %v6179_v36 = vunpack.i.h.bf16 %v6177_v45  ;;  %v6178_v34 = vunpack.i.l.bf16 %v6177_v45  ;;  %v3679_v8 = vsel %vm672_vm6, %v3499_v52, %v3550_v53  ;;  %v3680_v12 = vsel %vm672_vm6, %v7631_v38, %v3550_v53  ;;  %4338 = vperm.xlu0 %6186, %v4335_v54   ;;  %v4272_v32 = vld [vmem:[%s8001_s9] sm:$0x3]  ;;  %v5163_v29 = vld [vmem:[%s8040_s5 + $0x3] ss:$0 sm:$0xff]  ;;  %s6304_s5 = sshll.u32 %s6371_s28, 4  ;;  %s6305_s5 = int_to_ptr.vmem [resolvable:$false] %s6304_s5 }
 0x717   : > { %5618 = vmatpush3.bf16.msra.mxu0 %v6252_v24  ;;  %v3792_v17 = vpack.c.bf16 %v3755_v30, %v3752_v55  ;;  %v3758_v18 = vsel %vm985_vm4, %v3756_v39, %v3757_v10  ;;  %v3788_v19 = vsel %vm985_vm4, %v3786_v26, %v3787_v6  ;;  %v3769_v47 = vpack.c.bf16 %v3752_v55, %v7684_v51  ;;  %v6260_v51 = vld [vmem:[%s8037_s22 + $0x230] sm:$0xff]   ;;  %v5164_v48 = vld [vmem:[%s8041_s6 + $0x3] ss:$0 sm:$0xff]  ;;  %v3492_v39 = vld [vmem:[#allocation3 + $0x68] sm:$0xff]  ;;  %s6306_s6 = scalar_lea.vmem %s6305_s5, 32  ;;  %p6307_p0 = scmp.lt.s32.totalorder %s4802_s29, %s6305_s5 }
 0x718   : > { %v3699_v20 = vsel %vm1549_vm8, %v3679_v8, %v6178_v34  ;;  %v3700_v15 = vsel %vm1549_vm8, %v3680_v12, %v6179_v36  ;;  %5619 = vmatprep.subr.bf16.mxu0 %v6253_v5  ;;  %v3793_v38 = vpack.c.bf16 %v3788_v19, %v3758_v18  ;;  %v3770_v44 = vpack.c.bf16 %v3758_v18, %v3755_v30  ;;  %v6182_v14 = vpop.permute.xlu0 %6181  ;;  %v3568_v11 = vpop.permute.xlu1 %3567  ;;  %v3491_v59 = vld [vmem:[#allocation3 + $0x50] sm:$0xff]  ;;  %v3489_v6 = vld [vmem:[#allocation3 + $0x20] sm:$0xff]  ;;  %v3490_v8 = vld [vmem:[#allocation3 + $0x38] sm:$0xff]  ;;  %p6308_p1 = scmp.lt.s32.totalorder %s6306_s6, %s6300_s27 }
 0x719   : > { %v3735_v21 = vrot.slane %v3699_v20, 7  ;;  %v3736_v22 = vrot.slane %v3700_v15, 7  ;;  %5609 = vmatprep.mubr.msk.bf16.mxu0 %vm1693_vm9, %v3792_v17  ;;  %v6184_v56 = vunpack.i.h.bf16 %v6182_v14  ;;  %v6183_v31 = vunpack.i.l.bf16 %v6182_v14 }
 0x71a   : > { %5610 = vmatmul.mubr.msk.bf16.gmra.mrb[20].mxu0 %vm1693_vm9, %v3793_v38  ;;  %v3697_v61 = vsel %vm672_vm6, %v3526_v50, %v3568_v11  ;;  %v3698_v33 = vsel %vm672_vm6, %v7640_v62, %v3568_v11  ;;  %v4324_v62 = vld [vmem:[#allocation5] sm:$0x1]  ;;  %v3496_v50 = vld [vmem:[#allocation3 + $0xc8] sm:$0xff]  ;;  %p6309_p2 = por %p6308_p1, %p6307_p0 }
 0x71b   : > { %5620 = vmatpush3.bf16.msra.mxu0 %v6253_v5  ;;  %v3737_v2 = vsel %vm985_vm4, %v3735_v21, %v3736_v22  ;;  %v3717_v37 = vsel %vm1549_vm8, %v3697_v61, %v6183_v31  ;;  %v3718_v49 = vsel %vm1549_vm8, %v3698_v33, %v6184_v56  ;;  %4327 = vperm.xlu1 %6185, %v4324_v62   ;;  %v3494_v31 = vld [vmem:[#allocation3 + $0x98] sm:$0xff] }
 0x71c   : > { %5621 = vmatprep.subr.bf16.mxu0 %v6254_v41  ;;  %v3767_v7 = vpack.c.bf16 %v7674_v57, %v3737_v2  ;;  %v6257_v57 = vld [vmem:[%s8037_s22 + $0x218] sm:$0xff]   ;;  %v4035_v42 = vrot.slane %v3717_v37, 7  ;;  %v4036_v16 = vrot.slane %v3718_v49, 7  ;;  %p6310_p3 = pnand %p6309_p2, %p6303_p13 }
 0x71e   : > { %5625 = vmatprep.mubr.msk.bf16.mxu0 %vm1693_vm9, %v3767_v7  ;;  %v4037_v43 = vsel %vm985_vm4, %v4035_v42, %v4036_v16 }
 0x71f   : > { %5622 = vmatpush3.bf16.msra.mxu0 %v6254_v41  ;;  %v4039_v24 = vpack.c.bf16 %v4037_v43, %v3788_v19  ;;  %4268 = vperm.xlu1 %6185, %v4265_v4   ;;  %v4280_v4 = vld [vmem:[%s8004_s12] sm:$0x1] }
 0x720   : > { %5623 = vmatprep.subr.bf16.mxu0 %v6255_v46 }
 0x723   : > { %5624 = vmatpush3.bf16.msra.mxu0 %v6255_v46  ;;  %4275 = vperm.xlu1 %6185, %v4272_v32   ;;  %v6265_v32 = vld [vmem:[%s8002_s10 + $0x38] sm:$0xff]  }
 0x724   : > { %5633 = vmatprep.subr.bf16.mxu0 %v6256_v23 }
 0x726   : > { %5626 = vmatmul.mubr.msk.bf16.vlgmr.msra.gmra.mrb[16].mxu0 %vm1693_vm9, %v3768_v35 }
 0x727   : > { %5629 = vmatprep.mubr.msk.bf16.mxu0 %vm1693_vm9, %v3769_v47  ;;  %5634 = vmatpush3.bf16.msra.mxu0 %v6256_v23 }
 0x728   : > { %5635 = vmatprep.subr.bf16.mxu0 %v6257_v57 }
 0x72b   : > { %5636 = vmatpush3.bf16.msra.mxu0 %v6257_v57 }
 0x72c   : > { %5637 = vmatprep.subr.bf16.mxu0 %v6258_v27 }
 0x72e   : > { %5630 = vmatmul.mubr.msk.bf16.gmra.mrb[20].mxu0 %vm1693_vm9, %v3770_v44 }
 0x72f   : > { %5638 = vmatpush3.bf16.msra.mxu0 %v6258_v27  ;;  %5645 = vmatprep.mubr.msk.bf16.mxu0 %vm1693_vm9, %v3768_v35  ;;  %v3495_v35 = vld [vmem:[#allocation3 + $0xb0] sm:$0xff] }
 0x730   : > { %5639 = vmatprep.subr.bf16.mxu0 %v6259_v58 }
 0x733   : > { %5640 = vmatpush3.bf16.msra.mxu0 %v6259_v58  ;;  %v3493_v58 = vld [vmem:[#allocation3 + $0x80] sm:$0xff] }
 0x734   : > { %5641 = vmatprep.subr.bf16.mxu0 %v6260_v51 }
 0x737   : > { %5642 = vmatpush3.bf16.msra.mxu0 %v6260_v51 }
 0x738   : > { %5643 = vmatprep.subr.bf16.mxu0 %v6261_v25 }
 0x73b   : > { %5644 = vmatpush3.bf16.msra.mxu0 %v6261_v25 }
 0x73c   : > { %5677 = vmatprep.subr.bf16.mxu0 %v6364_v3 }
 0x73e   : > { %5646 = vmatmul.mubr.msk.bf16.vlgmr.msra.gmra.mrb[16].mxu0 %vm1693_vm9, %v3769_v47 }
 0x73f   : > { %5649 = vmatprep.mubr.msk.bf16.mxu0 %vm1693_vm9, %v3770_v44  ;;  %5678 = vmatpush3.bf16.msra.mxu0 %v6262_v9  ;;  %v4209_v9 = vld [vmem:[%s7999_s7] sm:$0x1] }
 0x740   : > { %5679 = vmatprep.subr.bf16.mxu0 %v6364_v3 }
 0x743   : > { %5680 = vmatpush3.bf16.msra.mxu0 %v6263_v28  ;;  %v6264_v28 = vld [vmem:[%s8002_s10 + $0x30] sm:$0xff]  }
 0x744   : > { %5681 = vmatprep.subr.bf16.mxu0 %v6364_v3 }
 0x746   : > { %5650 = vmatmul.mubr.msk.bf16.gmra.mrb[20].mxu0 %vm1693_vm9, %v4039_v24 }
 0x747   : > { %5685 = vmatprep.mubr.msk.bf16.mxu0 %vm6369_vm10, %v6364_v3  ;;  %5682 = vmatpush3.bf16.msra.mxu0 %v6264_v28 }
 0x748   : > { %5683 = vmatprep.subr.bf16.mxu0 %v6364_v3 }
 0x74b   : > { %5684 = vmatpush3.bf16.msra.mxu0 %v6265_v32 }
 0x74c   : > { %5689 = vmatprep.subr.bf16.mxu0 %v6364_v3 }
 0x811   : > { %v5647_v40 = vpop.f32.mrb[16].mxu0 }
 0x812   : > { %v4171_v60 = vmul.f32 %v5647_v40, %v5163_v29  ;;  %v4126_v45 = vpop.f32.mrb[17].mxu0  ;;  %v6275_v40 = vld [vmem:[%s8006_s15 + $0x14] ss:$8 sps:$4 sm:$0xff]  }
 0x813   : > { %v4169_v52 = vmul.f32 %v5163_v29, %v4126_v45  ;;  %v5648_v53 = vpop.f32.mrb[18].mxu0  ;;  %v6276_v45 = vld [vmem:[%s8006_s15 + $0x20] ss:$8 sps:$4 sm:$0xff]  }
 0x814   : > { %v4183_v55 = vadd.f32 %v5164_v48, %v4171_v60  ;;  %v4172_v30 = vmul.f32 %v5648_v53, %v5163_v29  ;;  %v4129_v13 = vpop.f32.mrb[19].mxu0  ;;  %v6278_v60 = vld [vmem:[%s8006_s15 + $0x24] ss:$8 sps:$4 sm:$0xff]   ;;  %v6279_v53 = vld [vmem:[%s8006_s15 + $0x30] ss:$8 sps:$4 sm:$0xff]  }
 0x815   : > { %v4181_v1 = vadd.f32 %v5164_v48, %v4169_v52  ;;  %v4170_v0 = vmul.f32 %v5163_v29, %v4129_v13  ;;  %v6281_v52 = vld [vmem:[%s8006_s15 + $0x34] ss:$8 sps:$4 sm:$0xff]  }
 0x816   : > { %v4191_v5 = vadd.f32 %v4183_v55, %v3491_v59  ;;  %v4184_v26 = vadd.f32 %v5164_v48, %v4172_v30  ;;  %v4328_v55 = vpop.permute.xlu1 %4327 }
 0x817   : > { %v4189_v10 = vadd.f32 %v4181_v1, %v3489_v6  ;;  %v4182_v36 = vadd.f32 %v5164_v48, %v4170_v0 }
 0x818   : > { %v4192_v34 = vadd.f32 %v4184_v26, %v3492_v39  ;;  %v4199_v18 = vmax.f32 %v4191_v5, 0.0 }
 0x819   : > { %v4190_v12 = vadd.f32 %v4182_v36, %v3490_v8  ;;  %v5651_v17 = vpop.f32.mrb[20].mxu0  ;;  %v4197_v41 = vmax.f32 %v4189_v10, 0.0  ;;  %v6266_v36 = vld [vmem:[%s8002_s10] sm:$0xff]   ;;  %v6267_v8 = vld [vmem:[%s8002_s10 + $0x8] sm:$0xff]  }
 0x81a   : > { %v4200_v19 = vmax.f32 %v4192_v34, 0.0  ;;  %v4175_v20 = vmul.f32 %v5651_v17, %v5163_v29  ;;  %v4142_v15 = vpop.f32.mrb[21].mxu0  ;;  %v4269_v30 = vpop.permute.xlu1 %4268  ;;  %v4330_v17 = vlaneseq }
 0x81b   : > { %v4198_v21 = vmax.f32 %v4190_v12, 0.0  ;;  %v4173_v22 = vmul.f32 %v5163_v29, %v4142_v15  ;;  %v5652_v38 = vpop.f32.mrb[22].mxu0  ;;  %v6268_v12 = vld [vmem:[%s8002_s10 + $0x10] sm:$0xff]   ;;  %v4339_v15 = vpop.permute.xlu0 %4338 }
 0x81c   : > { %v4187_v2 = vadd.f32 %v5164_v48, %v4175_v20  ;;  %v4176_v7 = vmul.f32 %v5652_v38, %v5163_v29  ;;  %v4145_v46 = vpop.f32.mrb[23].mxu0  ;;  %v4206_v23 = vpack.c.bf16 %v4200_v19, %v4199_v18  ;;  %v6269_v18 = vld [vmem:[%s8002_s10 + $0x18] sm:$0xff]   ;;  %v7877_v19 = vshrl.u32 %v4330_v17, 7 }
 0x81d   : > { %v4185_v57 = vadd.f32 %v5164_v48, %v4173_v22  ;;  %v4174_v47 = vmul.f32 %v5163_v29, %v4145_v46  ;;  %v4205_v27 = vpack.c.bf16 %v4198_v21, %v4197_v41  ;;  %v6270_v29 = vld [vmem:[%s8006_s15] ss:$8 sps:$4 sm:$0xff]  }
 0x81e   : > { %v4195_v44 = vadd.f32 %v4187_v2, %v3495_v35  ;;  %v4188_v51 = vadd.f32 %v5164_v48, %v4176_v7  ;;  %v4217_v24 = vsel %vm672_vm6, %v4206_v23, 0  ;;  %v4276_v59 = vpop.permute.xlu1 %4275  ;;  %v7881_v20 = vsub.s32 0, %v7877_v19 }
 0x81f   : > { %v4193_v14 = vadd.f32 %v4185_v57, %v3493_v58  ;;  %v4186_v11 = vadd.f32 %v5164_v48, %v4174_v47  ;;  %v4214_v25 = vsel %vm672_vm6, %v4205_v27, 0  ;;  %v6273_v48 = vld [vmem:[%s8006_s15 + $0x10] ss:$8 sps:$4 sm:$0xff]   ;;  %v6283_v47 = vld [vmem:[%s8008_s17] sm:$0xff]   ;;  %v6284_v27 = vld [vmem:[%s8008_s17 + $0x48] sm:$0xff]  }
 0x820   : > { %v4196_v56 = vadd.f32 %v4188_v51, %v3496_v50  ;;  %5654 = vmatpush3.bf16.xpose.msra.mxu1 %v4214_v25  ;;  %v4203_v33 = vmax.f32 %v4195_v44, 0.0  ;;  %v4333_v41 = vrot.slane %v4328_v55, %v7881_v20  ;;  %v4344_v21 = vrot.slane %v4339_v15, %v7881_v20  ;;  %v6285_v44 = vld [vmem:[%s8008_s17 + $0x8] sm:$0xff]   ;;  %v6286_v58 = vld [vmem:[%s8008_s17 + $0x50] sm:$0xff]   ;;  %v6289_v50 = vld [vmem:[%s8008_s17 + $0x18] sm:$0xff]  }
 0x821   : > { %v4194_v61 = vadd.f32 %v4186_v11, %v3494_v31  ;;  %5655 = vmatprep.subr.bf16.mxu1 %v6364_v3  ;;  %v4201_v49 = vmax.f32 %v4193_v14, 0.0  ;;  %v6287_v51 = vld [vmem:[%s8008_s17 + $0x10] sm:$0xff]   ;;  %v6288_v14 = vld [vmem:[%s8008_s17 + $0x58] sm:$0xff]   ;;  %v6290_v11 = vld [vmem:[%s8008_s17 + $0x60] sm:$0xff]  }
 0x822   : > { %v4204_v37 = vmax.f32 %v4196_v56, 0.0  ;;  %v6292_v56 = vld [vmem:[%s8008_s17 + $0x68] sm:$0xff]  }
 0x823   : > { %v4202_v42 = vmax.f32 %v4194_v61, 0.0  ;;  %v6293_v31 = vld [vmem:[%s8008_s17 + $0x28] sm:$0xff]   ;;  %v6294_v61 = vld [vmem:[%s8008_s17 + $0x70] sm:$0xff]  }
 0x824   : > { %v4208_v16 = vpack.c.bf16 %v4204_v37, %v4203_v33  ;;  %v6295_v33 = vld [vmem:[%s8008_s17 + $0x30] sm:$0xff]   ;;  %v6296_v37 = vld [vmem:[%s8008_s17 + $0x78] sm:$0xff]  }
 0x825   : > { %v4207_v43 = vpack.c.bf16 %v4202_v42, %v4201_v49  ;;  %v6297_v49 = vld [vmem:[%s8008_s17 + $0x38] sm:$0xff]  }
 0x826   : > { %v4223_v54 = vsel %vm672_vm6, %v4208_v16, 0 }
 0x827   : > { %v4220_v62 = vsel %vm672_vm6, %v4207_v43, 0 }
 0x828   : > { %5656 = vmatpush3.bf16.xpose.msra.mxu1 %v4217_v24 }
 0x829   : > { %5657 = vmatprep.subr.bf16.mxu1 %v6364_v3 }
 0x830   : > { %5658 = vmatpush3.bf16.xpose.msra.mxu1 %v4220_v62 }
 0x831   : > { %5659 = vmatprep.subr.bf16.mxu1 %v6364_v3 }
 0x838   : > { %5660 = vmatpush3.bf16.xpose.msra.mxu1 %v4223_v54 }
 0x839   : > { %5665 = vmatprep.subr.bf16.mxu1 %v6364_v3 }
 0x83f   : > { %5662 = vmatmul.mubr.msk.bf16.vlgmr.msra.gmra.mrb[24].mxu1 %vm672_vm6, %v4209_v9 }
 0x840   : > { %5666 = vmatpush3.bf16.xpose.msra.mxu1 %v4214_v25  ;;  %5673 = vmatprep.mubr.msk.bf16.mxu1 %vm6369_vm10, %v6364_v3  ;;  %v6291_v25 = vld [vmem:[%s8008_s17 + $0x20] sm:$0xff]  }
 0x841   : > { %5667 = vmatprep.subr.bf16.mxu1 %v6364_v3 }
 0x848   : > { %5668 = vmatpush3.bf16.xpose.msra.mxu1 %v4217_v24 }
 0x849   : > { %5669 = vmatprep.subr.bf16.mxu1 %v6364_v3 }
 0x850   : > { %5670 = vmatpush3.bf16.xpose.msra.mxu1 %v4220_v62  ;;  %v4363_v62 = vld [vmem:[%s8003_s11] sm:$0x1] }
 0x851   : > { %5671 = vmatprep.subr.bf16.mxu1 %v6364_v3 }
 0x858   : > { %5672 = vmatpush3.bf16.xpose.msra.mxu1 %v4223_v54 }
 0x85f   : > { %5674 = vmatmul.mubr.msk.bf16.vlgmr.msra.gmra.mrb[28].mxu1 %vm672_vm6, %v4280_v4 }
 0x860   : > { %4633 = vmatprep.mubr.bf16.mxu1 %v6370_v63  ;;  %v6272_v63 = vld [vmem:[%s8006_s15 + $0x4] ss:$8 sps:$4 sm:$0xff]  }
 0x861   : > { %4601 = vmatprep.subr.bf16.mxu1 %v6272_v63  ;;  %v4372_v63 = vld [vmem:[%s8007_s16] sm:$0x3] }
 0x862   : > { %4602 = vmatpush1.bf16.msra.mxu1 %v6270_v29 }
 0x863   : > { %4603 = vmatprep.subr.bf16.mxu1 %v6275_v40  ;;  %v4591_v40 = vrot.slane %v4372_v63, %v7881_v20 }
 0x866   : > { %4604 = vmatpush1.bf16.msra.mxu1 %v6273_v48  ;;  %v4594_v48 = vsub.s32 1, %v7877_v19 }
 0x867   : > { %4605 = vmatprep.subr.bf16.mxu1 %v6278_v60 }
 0x868   : > { %v4595_v60 = vrot.slane %v4372_v63, %v4594_v48 }
 0x86a   : > { %4606 = vmatpush1.bf16.msra.mxu1 %v6276_v45 }
 0x86b   : > { %4607 = vmatprep.subr.bf16.mxu1 %v6281_v52 }
 0x86e   : > { %4608 = vmatpush1.bf16.msra.mxu1 %v6279_v53 }
 0x912   : > { %v4259_v13 = vpop.f32.mrb[24].mxu1 }
 0x913   : > { %v4271_v1 = vmul.f32 %v4269_v30, %v4259_v13  ;;  %v5663_v0 = vpop.f32.mrb[25].mxu1 }
 0x914   : > { %v4262_v5 = vpop.f32.mrb[26].mxu1 }
 0x915   : > { %v4278_v6 = vadd.f32 %v4276_v59, %v4271_v1  ;;  %v5664_v26 = vpop.f32.mrb[27].mxu1 }
 0x917   : > { %v4279_v10 = vmax.f32 %v4278_v6, 0.0 }
 0x919   : > { %v4406_v39 = vpack.c.bf16 %v4279_v10, %v4279_v10 }
 0x91b   : > { %v4408_v34 = vshrl.u32 %v4406_v39, 16 }
 0x91d   : > { %5686 = vmatmul.mubr.msk.bf16.vlgmr.msra.gmra.mrb[24].mxu0 %vm1549_vm8, %v4408_v34 }
 0x91e   : > { %5690 = vmatpush3.bf16.msra.mxu0 %v6266_v36  ;;  %5697 = vmatprep.mubr.msk.bf16.mxu0 %vm6369_vm10, %v6364_v3 }
 0x91f   : > { %5691 = vmatprep.subr.bf16.mxu0 %v6364_v3 }
 0x922   : > { %5692 = vmatpush3.bf16.msra.mxu0 %v6267_v8 }
 0x923   : > { %5693 = vmatprep.subr.bf16.mxu0 %v6364_v3 }
 0x926   : > { %5694 = vmatpush3.bf16.msra.mxu0 %v6268_v12 }
 0x927   : > { %5695 = vmatprep.subr.bf16.mxu0 %v6364_v3  ;;  %v6282_v3 = vld [vmem:[%s8008_s17 + $0x40] sm:$0xff]  }
 0x92a   : > { %5696 = vmatpush3.bf16.msra.mxu0 %v6269_v18 }
 0x92b   : > { %5361 = vmatprep.subr.bf16.mxu0 %v6282_v3 }
 0x92d   : > { %5698 = vmatmul.mubr.msk.bf16.vlgmr.msra.gmra.mrb[28].mxu0 %vm1549_vm8, %v4406_v39 }
 0x92e   : > { %5362 = vmatpush3.bf16.msra.mxu0 %v6283_v47 }
 0x92f   : > { %5363 = vmatprep.subr.bf16.mxu0 %v6284_v27 }
 0x932   : > { %v4318_v22 = vpop.f32.mrb[28].mxu1  ;;  %5364 = vmatpush3.bf16.msra.mxu0 %v6285_v44 }
 0x933   : > { %v4334_v38 = vmul.f32 %v4333_v41, %v4318_v22  ;;  %v5675_v2 = vpop.f32.mrb[29].mxu1  ;;  %5365 = vmatprep.subr.bf16.mxu0 %v6286_v58 }
 0x934   : > { %v4321_v7 = vpop.f32.mrb[30].mxu1 }
 0x935   : > { %v4345_v46 = vadd.f32 %v4344_v21, %v4334_v38  ;;  %v5676_v23 = vpop.f32.mrb[31].mxu1 }
 0x936   : > { %5366 = vmatpush3.bf16.msra.mxu0 %v6287_v51 }
 0x937   : > { %v4346_v35 = vmax.f32 %v4345_v46, 0.0  ;;  %5367 = vmatprep.subr.bf16.mxu0 %v6288_v14 }
 0x939   : > { %v4546_v57 = vpack.c.bf16 %v4346_v35, %v4346_v35 }
 0x93a   : > { %5368 = vmatpush3.bf16.msra.mxu0 %v6289_v50 }
 0x93b   : > { %5185 = vmatmul.mubr.msk.bf16.vlgmr.msra.gmra.mrb[32].mxu1 %vm1549_vm8, %v4546_v57  ;;  %5369 = vmatprep.subr.bf16.mxu0 %v6290_v11 }
 0x93e   : > { %5370 = vmatpush3.bf16.msra.mxu0 %v6291_v25 }
 0x93f   : > { %5371 = vmatprep.subr.bf16.mxu0 %v6292_v56 }
 0x942   : > { %5372 = vmatpush3.bf16.msra.mxu0 %v6293_v31 }
 0x943   : > { %5373 = vmatprep.subr.bf16.mxu0 %v6294_v61 }
 0x946   : > { %5374 = vmatpush3.bf16.msra.mxu0 %v6295_v33 }
 0x947   : > { %5375 = vmatprep.subr.bf16.mxu0 %v6296_v37 }
 0x94a   : > { %5376 = vmatpush3.bf16.msra.mxu0 %v6297_v49 }
 0x9f0   : > { %v4471_v42 = vpop.f32.mrb[24].mxu0 }
 0x9f1   : > { %v5687_v16 = vpop.f32.mrb[25].mxu0 }
 0x9f2   : > { %v4474_v43 = vpop.f32.mrb[26].mxu0 }
 0x9f3   : > { %v5688_v24 = vpop.f32.mrb[27].mxu0 }
 0xa00   : > { %v4537_v54 = vpop.f32.mrb[28].mxu0 }
 0xa01   : > { %v4538_v9 = vadd.f32 %v4537_v54, %v4471_v42  ;;  %v5699_v4 = vpop.f32.mrb[29].mxu0 }
 0xa02   : > { %v4540_v28 = vpop.f32.mrb[30].mxu0 }
 0xa03   : > { %v4543_v32 = vadd.f32 %v4538_v9, %v4363_v62  ;;  %v5700_v29 = vpop.f32.mrb[31].mxu0 }
 0xa05   : > { %4545 = vst.msk [vmem:[%s628_s2] sm:$0x1] %vm4544_vm11, %v4543_v32 }
 0xa0e   : > { %v4635_v45 = vpop.f32.mrb[32].mxu1 }
 0xa0f   : > { %v4636_v52 = vadd.f32 %v4635_v45, %v4591_v40  ;;  %v4637_v53 = vpop.f32.mrb[33].mxu1 }
 0xa10   : > { %v4638_v55 = vadd.f32 %v4637_v53, %v4595_v60  ;;  %v4639_v30 = vpop.f32.mrb[34].mxu1 }
 0xa11   : > { %v4642_v13 = vmax.f32 %v4636_v52, 0.0  ;;  %v4640_v59 = vpop.f32.mrb[35].mxu1 }
 0xa12   : > { %v4643_v1 = vmax.f32 %v4638_v55, 0.0 }
 0xa13   : > { %v4644_v5 = vpack.c.bf16 %v4642_v13, %v4642_v13 }
 0xa14   : > { %v4645_v0 = vpack.c.bf16 %v4643_v1, %v4643_v1 }
 0xa16   : > { %4774 = vmatprep.mubr.bf16.mxu0 %v4645_v0 }
 0xa17   : > { %4775 = vmatmul.mubr.bf16.vlgmr.msra.gmra.mrb[32].mxu0 %v4644_v5 }
 0xa18   : > { %6313 = shalt.err (!%p6310_p3)
}
 0xa19   : > { %s6314_s14 = scalar_lea.hbm %s7950_s23, 16  ;;  %s6318_s25 = scalar_lea.hbm %s8009_s19, 32 }
 0xa1a   : > { %p6315_p4 = scmp.ne.s32.totalorder %s7950_s23, %s6314_s14  ;;  %p6319_p9 = scmp.lt.u32.totalorder %s7950_s23, %s8009_s19 }
 0xa1b   : > { %p6320_p10 = scmp.lt.u32.totalorder %s6318_s25, %s6314_s14  ;;  %p6322_p12 = scmp.lt.u32.totalorder %s6314_s14, %s7950_s23 }
 0xa1c   : > { %p6316_p7 = pnand %p6315_p4, %p6524_p5 }
 0xa1d   : > { %p6321_p11 = por %p6320_p10, %p6319_p9 }
 0xa1e   : > { %p6317_p8 = pneg %p6316_p7 }
 0xa1f   : > { %p6323_p13 = por %p6322_p12, %p6321_p11 }
 0xa21   : > { %p6324_p0 = pnand %p6323_p13, %p6317_p8 }
 0xa23   : > { %6327 = shalt.err (!%p6324_p0)
}
 0xa24   : > { %5784 = dma.vmem_to_hbm [thread:$0]  (%p6524_p5), %s4802_s29, 16, %s7950_s23, %s4786_s24   ;;  %v4405_v26 = vld [vmem:[#allocation7] sm:$0x1]  ;;  %vm4783_vm12 = vcmask 0  }
 0xa25   : > { %s641_s27 = scalar_lea.vmem %s8010_s20, %s6584_s1 }
 0xaea   : > { %v5377_v6 = vpop.f32.mrb[32].mxu0 }
 0xaeb   : > { %v5378_v10 = vpop.f32.mrb[33].mxu0 }
 0xaec   : > { %v5379_v39 = vadd.f32 %v5378_v10, %v5377_v6  ;;  %v5380_v36 = vpop.f32.mrb[34].mxu0 }
 0xaed   : > { %v5381_v34 = vpop.f32.mrb[35].mxu0 }
 0xaee   : > { %v4777_v8 = vadd.f32 %v5379_v39, %v4405_v26 }
 0xaf0   : > { %6298 = vtanh.f32 %v4777_v8 }
 0xafa   : > { %v6299_v12 = vpop.eup %6298 }
 0xafb   : > { %4784 = vst.msk [vmem:[%s641_s27] sm:$0x1] %vm4783_vm12, %v6299_v12 }
 0xafc PF: > { %p5790_p5 = scmp.ge.s32.totalorder %s6362_s13, 2  ;;  %s4816_s0 = sand.u32 1, %s6350_s3  }
 0xafd   : > { %s4817_s29 = scalar_lea.sflag [#allocation9], %s4816_s0 }
 0xafe   : > { %p5787_p1 = pnand %p5790_p5, %p6528_p6 }
 0xb00   : > { %6345 = dma.done.wait (!%p5787_p1), %s4817_s29, 16  }
 0xb01   : > { %6347 = vsyncadd (!%p5787_p1), %s4817_s29, 4294967280  ;;  %s8044_s13 = sld [smem:[#allocation12_spill]]  ;;  %s8045_s23 = sld [smem:[#allocation11_spill]] }
 0xb02   : > { %s8046_s27 = sld [smem:[#allocation13_spill]]  ;;  %s8047_s3 = smov %s6354_s26 }
 0xb07   : > { %p37_p2 = scmp.ge.s32.totalorder %s8044_s13, 4   ;;  %s8048_s26 = smov %s8045_s23 }
 0xb09   :  { %39 = sbr.rel (!%p37_p2) target bundleno = 11 (0xb), region = 162 }
 0xb10   :  { %4827 = vsyncpa [#allocation9], 1 }
 0xb11   :  { %4829 = vsyncpa [#allocation9 + $0x1], 1 }

</bundles_post_ra>
